<compile_context>
chip_gen: v7x
topology: tpu7x:2x2x1
jax: 0.10.0
libtpu: 0.0.40
codegen_flags: <defaults>
</compile_context>

<pallas_src>
import functools
import math

import jax
import jax.numpy as jnp
from jax.experimental import pallas as pl
from jax.experimental.pallas import tpu as pltpu

EPS = 1e-5
PREEMPH_A = 0.95  # y_pre[t] = y[t] - 0.95 * y[t-1],  y[-1] = 0  (Conv1d [-0.95, 1])


def _round_up(x, m):
    return ((x + m - 1) // m) * m


def _make_kernel(B, R8, W, tile, F, n_fold, ragged):
    """Fused ESR+DC partial-sum kernel for static (B, R8, W, tile, F)."""
    A = PREEMPH_A

    def fold(x):  # (R8, tile) -> (R8, F) via pure elementwise chunk adds
        s = x[:, 0:F]
        for c in range(1, n_fold):
            s = s + x[:, c * F:(c + 1) * F]
        return s

    def kernel(o_ref, t_ref,
               esr_num_ref, esr_den_ref, dc_den_ref, dsum_ref,
               corr_num_ref, corr_den_ref,
               carry_d_ref, carry_t_ref):
        i = pl.program_id(0)

        @pl.when(i == 0)
        def _init():
            esr_num_ref[...] = jnp.zeros_like(esr_num_ref)
            esr_den_ref[...] = jnp.zeros_like(esr_den_ref)
            dc_den_ref[...] = jnp.zeros_like(dc_den_ref)
            dsum_ref[...] = jnp.zeros_like(dsum_ref)
            corr_num_ref[...] = jnp.zeros_like(corr_num_ref)
            corr_den_ref[...] = jnp.zeros_like(corr_den_ref)
            carry_d_ref[...] = jnp.zeros_like(carry_d_ref)
            carry_t_ref[...] = jnp.zeros_like(carry_t_ref)

        # Previous-tile tails: true "previous sample" for this tile's first B
        # lanes (zero on the very first tile => y[-1] = 0 for row 0; rows >= 1
        # are corrected in the wrapper).
        carry_d = carry_d_ref[...]          # (R8, B)
        carry_t = carry_t_ref[...]          # (R8, B)

        o_raw = o_ref[...]                  # (R8, tile), time*batch lane-dense
        t_raw = t_ref[...]

        def accumulate(o, t, mask):
            d = t - o                       # linearity: o_pre never formed
            # Previous sample (flat offset -B) inside the tile; wrong only for
            # the first B lanes (fixed by the narrow correction below).
            d_roll = pltpu.roll(d, B, axis=1)
            t_roll = pltpu.roll(t, B, axis=1)
            d_pre = d - A * d_roll
            t_pre = t - A * t_roll
            e_num = d_pre * d_pre
            e_den = t_pre * t_pre
            if mask is not None:            # ragged last tile only
                e_num = jnp.where(mask, e_num, 0.0)
                e_den = jnp.where(mask, e_den, 0.0)

            # Deferred reductions: elementwise chunk adds into (R8, F) accs.
            esr_num_ref[...] += fold(e_num)
            esr_den_ref[...] += fold(e_den)
            dc_den_ref[...] += fold(t * t)
            dsum_ref[...] += fold(d)

            # First-B-lanes fix: replace the in-tile (wrong) previous sample
            # with the carried tail of the previous tile.
            head_d = d[:, 0:B]
            head_t = t[:, 0:B]
            tail_d = d[:, tile - B:tile]
            tail_t = t[:, tile - B:tile]
            pw_d = head_d - A * tail_d      # what the full-width pass used
            pr_d = head_d - A * carry_d     # what it should have used
            pw_t = head_t - A * tail_t
            pr_t = head_t - A * carry_t
            corr_num_ref[...] += pr_d * pr_d - pw_d * pw_d
            corr_den_ref[...] += pr_t * pr_t - pw_t * pw_t

            # Carry this tile's tail into the next grid step (unused on last).
            carry_d_ref[...] = tail_d
            carry_t_ref[...] = tail_t

        if ragged:
            n = pl.num_programs(0)

            @pl.when(i < n - 1)
            def _fast():
                accumulate(o_raw, t_raw, None)

            @pl.when(i == n - 1)
            def _masked():
                lane = jax.lax.broadcasted_iota(jnp.int32, (R8, tile), 1)
                valid = (lane + i * tile) < W
                # Clean (avoid garbage/NaN from the overhang) AND mask the
                # pre-emphasized squares at the valid/invalid boundary.
                o_c = jnp.where(valid, o_raw, 0.0)
                t_c = jnp.where(valid, t_raw, 0.0)
                accumulate(o_c, t_c, valid)
        else:
            accumulate(o_raw, t_raw, None)

    return kernel


def loss_fn(output, target, *, target_block_elems=1 << 20):
    """output, target: [T, B, 1] float -> scalar loss (== torch `Loss`)."""
    assert output.shape == target.shape and output.shape[-1] == 1
    T, B, _ = output.shape

    o2d = output[..., 0].astype(jnp.float32)        # [T, B] (free squeeze)
    t2d = target[..., 0].astype(jnp.float32)

    # Free, contiguous reshape: fold time onto <=8 sublanes; the long
    # time*batch axis stays lane-dense.  No transpose, no extra HBM pass.
    R8 = math.gcd(T, 8)
    W = (T // R8) * B                               # flattened row length
    o_r = o2d.reshape(R8, W)
    t_r = t2d.reshape(R8, W)

    # Tile geometry: lane tile = F * n_fold, with F a multiple of both 128
    # (lane alignment) and B (batch identity of lanes), targeting ~1M
    # elements (~4 MiB) per input per grid step.
    lcmB = (B * 128) // math.gcd(B, 128)
    tile_target = max(lcmB, target_block_elems // R8)
    tile_target = min(tile_target, _round_up(W, lcmB))
    n_fold = max(1, min(8, tile_target // lcmB))
    F = _round_up(-(-tile_target // n_fold), lcmB)
    tile = F * n_fold
    num_tiles = pl.cdiv(W, tile)
    ragged = (W % tile) != 0

    kernel = _make_kernel(B, R8, W, tile, F, n_fold, ragged)

    grid_spec = pltpu.PrefetchScalarGridSpec(
        num_scalar_prefetch=0,
        grid=(num_tiles,),
        in_specs=[
            pl.BlockSpec((R8, tile), lambda i: (0, i)),
            pl.BlockSpec((R8, tile), lambda i: (0, i)),
        ],
        out_specs=[
            pl.BlockSpec((R8, F), lambda i: (0, 0)),   # sum (t_pre - o_pre)^2
            pl.BlockSpec((R8, F), lambda i: (0, 0)),   # sum t_pre^2
            pl.BlockSpec((R8, F), lambda i: (0, 0)),   # sum t^2
            pl.BlockSpec((R8, F), lambda i: (0, 0)),   # per-lane sum (t - o)
            pl.BlockSpec((R8, B), lambda i: (0, 0)),   # head-lane correction (num)
            pl.BlockSpec((R8, B), lambda i: (0, 0)),   # head-lane correction (den)
        ],
        scratch_shapes=[
            pltpu.VMEM((R8, B), jnp.float32),          # carry: tail of d
            pltpu.VMEM((R8, B), jnp.float32),          # carry: tail of t
        ],
    )

    outs = pl.pallas_call(
        kernel,
        grid_spec=grid_spec,
        out_shape=(
            jax.ShapeDtypeStruct((R8, F), jnp.float32),
            jax.ShapeDtypeStruct((R8, F), jnp.float32),
            jax.ShapeDtypeStruct((R8, F), jnp.float32),
            jax.ShapeDtypeStruct((R8, F), jnp.float32),
            jax.ShapeDtypeStruct((R8, B), jnp.float32),
            jax.ShapeDtypeStruct((R8, B), jnp.float32),
        ),
        compiler_params=pltpu.CompilerParams(
            dimension_semantics=("arbitrary",),         # sequential carry
            vmem_limit_bytes=48 * 1024 * 1024,          # safe on v7x (64 MiB)
        ),
        cost_estimate=pl.CostEstimate(
            flops=14 * T * B,
            transcendentals=0,
            bytes_accessed=2 * T * B * 4,
        ),
    )(o_r, t_r)

    esr_num_acc, esr_den_acc, dc_den_acc, dsum_acc, corr_num, corr_den = outs

    # Finalize (tiny, wrapper-side): cross-lane reduces + divides.
    esr_num = jnp.sum(esr_num_acc) + jnp.sum(corr_num)
    esr_den = jnp.sum(esr_den_acc) + jnp.sum(corr_den)
    dc_den = jnp.sum(dc_den_acc)
    dsum_b = jnp.sum(dsum_acc.reshape(R8, F // B, B), axis=(0, 1))  # per-batch

    # Cross-row boundary fix: the first sample of rows 1..R8-1 was
    # pre-emphasized against 0 in the kernel; its true previous sample is the
    # last sample of the previous row.  Only (R8-1)*B samples -> tiny gather.
    if R8 > 1:
        step = T // R8
        idx = jnp.arange(1, R8) * step
        o_h, t_h = o2d[idx, :], t2d[idx, :]
        o_p, t_p = o2d[idx - 1, :], t2d[idx - 1, :]
        d_h = t_h - o_h
        d_p = t_p - o_p
        esr_num = esr_num + jnp.sum((d_h - PREEMPH_A * d_p) ** 2 - d_h ** 2)
        esr_den = esr_den + jnp.sum((t_h - PREEMPH_A * t_p) ** 2 - t_h ** 2)

    inv_TB = 1.0 / float(T * B)
    esr = (esr_num * inv_TB) / (esr_den * inv_TB + EPS)
    dc_num = jnp.mean((dsum_b / float(T)) ** 2)
    dc = dc_num / (dc_den * inv_TB + EPS)
    return esr + dc


def _reference_loss(output, target):
    """Pure-JAX replica of the PyTorch forward, for validation."""
    o2d = output[..., 0].astype(jnp.float32)
    t2d = target[..., 0].astype(jnp.float32)
    zero = jnp.zeros((1, o2d.shape[1]), o2d.dtype)
    o_pre = o2d - PREEMPH_A * jnp.concatenate([zero, o2d[:-1]], axis=0)
    t_pre = t2d - PREEMPH_A * jnp.concatenate([zero, t2d[:-1]], axis=0)
    esr = jnp.mean((t_pre - o_pre) ** 2) / (jnp.mean(t_pre ** 2) + EPS)
    dc = jnp.mean((jnp.mean(t2d, 0) - jnp.mean(o2d, 0)) ** 2) / (
        jnp.mean(t2d ** 2) + EPS)
    return esr + dc


if __name__ == "__main__":
    key = jax.random.PRNGKey(0)

    # (T, B, target_block_elems) -- small shapes chosen to exercise multi-tile
    # carries, ragged last tiles, non-128-multiple row widths and R8 < 8.
    cases = [
        (1024, 4, 2048),     # R8=8, 2 full tiles (carry across tiles)
        (1000, 4, 2048),     # R8=8, 2 tiles, ragged last tile
        (1000, 3, 1 << 20),  # R8=8, single ragged tile, W not multiple of 128
        (250, 4, 2048),      # R8=2 (partially filled sublanes), ragged
        (33, 5, 1 << 20),    # R8=1 degenerate layout, single ragged tile
    ]

    for T, B, blk in cases:
        key, k1, k2 = jax.random.split(key, 3)
        out = jax.random.normal(k1, (T, B, 1), dtype=jnp.float32)
        tgt = jax.random.normal(k2, (T, B, 1), dtype=jnp.float32)
        f = jax.jit(functools.partial(loss_fn, target_block_elems=blk))
        got = jax.block_until_ready(f(out, tgt))
        ref = _reference_loss(out, tgt)
        assert jnp.allclose(got, ref, rtol=2e-4, atol=1e-5), (T, B, blk, got, ref)

    print("KERNEL_OK")
</pallas_src>

<mosaic_0001>
module attributes {stable_mosaic.version = 11 : i64} {
  func.func @kernel(%arg0: i32, %arg1: memref<8x256xf32, #tpu.memory_space<vmem>>, %arg2: memref<8x256xf32, #tpu.memory_space<vmem>>, %arg3: memref<8x128xf32, #tpu.memory_space<vmem>>, %arg4: memref<8x128xf32, #tpu.memory_space<vmem>>, %arg5: memref<8x128xf32, #tpu.memory_space<vmem>>, %arg6: memref<8x128xf32, #tpu.memory_space<vmem>>, %arg7: memref<8x4xf32, #tpu.memory_space<vmem>>, %arg8: memref<8x4xf32, #tpu.memory_space<vmem>>, %arg9: memref<8x4xf32, #tpu.memory_space<vmem>>, %arg10: memref<8x4xf32, #tpu.memory_space<vmem>>) attributes {dimension_semantics = [#tpu.dimension_semantics<arbitrary>], iteration_bounds = array<i64: 2>, scalar_prefetch = 0 : i64, scratch_operands = 2 : i64, tpu.core_type = #tpu.core_type<tc>, window_params = [{transform_indices = @transform_0, window_bounds = array<i64: 8, 256>}, {transform_indices = @transform_1, window_bounds = array<i64: 8, 256>}, {pipeline_mode = #tpu.pipeline_mode<synchronous>, transform_indices = @transform_2, window_bounds = array<i64: 8, 128>}, {pipeline_mode = #tpu.pipeline_mode<synchronous>, transform_indices = @transform_3, window_bounds = array<i64: 8, 128>}, {pipeline_mode = #tpu.pipeline_mode<synchronous>, transform_indices = @transform_4, window_bounds = array<i64: 8, 128>}, {pipeline_mode = #tpu.pipeline_mode<synchronous>, transform_indices = @transform_5, window_bounds = array<i64: 8, 128>}, {pipeline_mode = #tpu.pipeline_mode<synchronous>, transform_indices = @transform_6, window_bounds = array<i64: 8, 4>}, {pipeline_mode = #tpu.pipeline_mode<synchronous>, transform_indices = @transform_7, window_bounds = array<i64: 8, 4>}]} {
    %c0_i32 = arith.constant 0 : i32
    %0 = arith.cmpi eq, %arg0, %c0_i32 : i32
    %1 = arith.extui %0 : i1 to i32
    %c0_i32_0 = arith.constant 0 : i32
    %2 = arith.cmpi ne, %1, %c0_i32_0 : i32
    scf.if %2 {
      %cst_42 = arith.constant 0.000000e+00 : f32
      %73 = vector.broadcast %cst_42 : f32 to vector<8x128xf32>
      %c0_43 = arith.constant 0 : index
      %c0_44 = arith.constant 0 : index
      %74 = vector.load %arg3[%c0_43, %c0_44] : memref<8x128xf32, #tpu.memory_space<vmem>>, vector<8x128xf32>
      tpu.vector_store %arg3[%c0_43, %c0_44], %73 {strides = array<i32>} : memref<8x128xf32, #tpu.memory_space<vmem>>, vector<8x128xf32>,
      %cst_45 = arith.constant 0.000000e+00 : f32
      %75 = vector.broadcast %cst_45 : f32 to vector<8x128xf32>
      %c0_46 = arith.constant 0 : index
      %c0_47 = arith.constant 0 : index
      %76 = vector.load %arg4[%c0_46, %c0_47] : memref<8x128xf32, #tpu.memory_space<vmem>>, vector<8x128xf32>
      tpu.vector_store %arg4[%c0_46, %c0_47], %75 {strides = array<i32>} : memref<8x128xf32, #tpu.memory_space<vmem>>, vector<8x128xf32>,
      %cst_48 = arith.constant 0.000000e+00 : f32
      %77 = vector.broadcast %cst_48 : f32 to vector<8x128xf32>
      %c0_49 = arith.constant 0 : index
      %c0_50 = arith.constant 0 : index
      %78 = vector.load %arg5[%c0_49, %c0_50] : memref<8x128xf32, #tpu.memory_space<vmem>>, vector<8x128xf32>
      tpu.vector_store %arg5[%c0_49, %c0_50], %77 {strides = array<i32>} : memref<8x128xf32, #tpu.memory_space<vmem>>, vector<8x128xf32>,
      %cst_51 = arith.constant 0.000000e+00 : f32
      %79 = vector.broadcast %cst_51 : f32 to vector<8x128xf32>
      %c0_52 = arith.constant 0 : index
      %c0_53 = arith.constant 0 : index
      %80 = vector.load %arg6[%c0_52, %c0_53] : memref<8x128xf32, #tpu.memory_space<vmem>>, vector<8x128xf32>
      tpu.vector_store %arg6[%c0_52, %c0_53], %79 {strides = array<i32>} : memref<8x128xf32, #tpu.memory_space<vmem>>, vector<8x128xf32>,
      %cst_54 = arith.constant 0.000000e+00 : f32
      %81 = vector.broadcast %cst_54 : f32 to vector<8x4xf32>
      %c0_55 = arith.constant 0 : index
      %c0_56 = arith.constant 0 : index
      %82 = vector.load %arg7[%c0_55, %c0_56] : memref<8x4xf32, #tpu.memory_space<vmem>>, vector<8x4xf32>
      tpu.vector_store %arg7[%c0_55, %c0_56], %81 {strides = array<i32>} : memref<8x4xf32, #tpu.memory_space<vmem>>, vector<8x4xf32>,
      %cst_57 = arith.constant 0.000000e+00 : f32
      %83 = vector.broadcast %cst_57 : f32 to vector<8x4xf32>
      %c0_58 = arith.constant 0 : index
      %c0_59 = arith.constant 0 : index
      %84 = vector.load %arg8[%c0_58, %c0_59] : memref<8x4xf32, #tpu.memory_space<vmem>>, vector<8x4xf32>
      tpu.vector_store %arg8[%c0_58, %c0_59], %83 {strides = array<i32>} : memref<8x4xf32, #tpu.memory_space<vmem>>, vector<8x4xf32>,
      %cst_60 = arith.constant 0.000000e+00 : f32
      %85 = vector.broadcast %cst_60 : f32 to vector<8x4xf32>
      %c0_61 = arith.constant 0 : index
      %c0_62 = arith.constant 0 : index
      %86 = vector.load %arg9[%c0_61, %c0_62] : memref<8x4xf32, #tpu.memory_space<vmem>>, vector<8x4xf32>
      tpu.vector_store %arg9[%c0_61, %c0_62], %85 {strides = array<i32>} : memref<8x4xf32, #tpu.memory_space<vmem>>, vector<8x4xf32>,
      %cst_63 = arith.constant 0.000000e+00 : f32
      %87 = vector.broadcast %cst_63 : f32 to vector<8x4xf32>
      %c0_64 = arith.constant 0 : index
      %c0_65 = arith.constant 0 : index
      %88 = vector.load %arg10[%c0_64, %c0_65] : memref<8x4xf32, #tpu.memory_space<vmem>>, vector<8x4xf32>
      tpu.vector_store %arg10[%c0_64, %c0_65], %87 {strides = array<i32>} : memref<8x4xf32, #tpu.memory_space<vmem>>, vector<8x4xf32>,
    } else {
    }
    %c0 = arith.constant 0 : index
    %c0_1 = arith.constant 0 : index
    %3 = vector.load %arg9[%c0, %c0_1] : memref<8x4xf32, #tpu.memory_space<vmem>>, vector<8x4xf32>
    %c0_2 = arith.constant 0 : index
    %c0_3 = arith.constant 0 : index
    %4 = vector.load %arg10[%c0_2, %c0_3] : memref<8x4xf32, #tpu.memory_space<vmem>>, vector<8x4xf32>
    %c0_4 = arith.constant 0 : index
    %c0_5 = arith.constant 0 : index
    %5 = vector.load %arg1[%c0_4, %c0_5] : memref<8x256xf32, #tpu.memory_space<vmem>>, vector<8x256xf32>
    %c0_6 = arith.constant 0 : index
    %c0_7 = arith.constant 0 : index
    %6 = vector.load %arg2[%c0_6, %c0_7] : memref<8x256xf32, #tpu.memory_space<vmem>>, vector<8x256xf32>
    %7 = arith.subf %6, %5 : vector<8x256xf32>
    %c4_i32 = arith.constant 4 : i32
    %8 = tpu.dynamic_rotate %7 by %c4_i32 dim 1 : vector<8x256xf32>, i32 -> vector<8x256xf32>
    %c4_i32_8 = arith.constant 4 : i32
    %9 = tpu.dynamic_rotate %6 by %c4_i32_8 dim 1 : vector<8x256xf32>, i32 -> vector<8x256xf32>
    %cst = arith.constant 0.949999988 : f32
    %10 = vector.broadcast %cst : f32 to vector<8x256xf32>
    %11 = arith.mulf %10, %8 : vector<8x256xf32>
    %12 = arith.subf %7, %11 : vector<8x256xf32>
    %cst_9 = arith.constant 0.949999988 : f32
    %13 = vector.broadcast %cst_9 : f32 to vector<8x256xf32>
    %14 = arith.mulf %13, %9 : vector<8x256xf32>
    %15 = arith.subf %6, %14 : vector<8x256xf32>
    %16 = arith.mulf %12, %12 : vector<8x256xf32>
    %17 = arith.mulf %15, %15 : vector<8x256xf32>
    %c0_10 = arith.constant 0 : index
    %c0_11 = arith.constant 0 : index
    %18 = vector.load %arg3[%c0_10, %c0_11] : memref<8x128xf32, #tpu.memory_space<vmem>>, vector<8x128xf32>
    %19 = vector.extract_strided_slice %16 {offsets = [0, 0], sizes = [8, 128], strides = [1, 1]} : vector<8x256xf32> to vector<8x128xf32>
    %20 = vector.extract_strided_slice %16 {offsets = [0, 128], sizes = [8, 128], strides = [1, 1]} : vector<8x256xf32> to vector<8x128xf32>
    %21 = arith.addf %19, %20 : vector<8x128xf32>
    %22 = arith.addf %18, %21 : vector<8x128xf32>
    %c0_12 = arith.constant 0 : index
    %c0_13 = arith.constant 0 : index
    %23 = vector.load %arg3[%c0_12, %c0_13] : memref<8x128xf32, #tpu.memory_space<vmem>>, vector<8x128xf32>
    tpu.vector_store %arg3[%c0_12, %c0_13], %22 {strides = array<i32>} : memref<8x128xf32, #tpu.memory_space<vmem>>, vector<8x128xf32>,
    %c0_14 = arith.constant 0 : index
    %c0_15 = arith.constant 0 : index
    %24 = vector.load %arg4[%c0_14, %c0_15] : memref<8x128xf32, #tpu.memory_space<vmem>>, vector<8x128xf32>
    %25 = vector.extract_strided_slice %17 {offsets = [0, 0], sizes = [8, 128], strides = [1, 1]} : vector<8x256xf32> to vector<8x128xf32>
    %26 = vector.extract_strided_slice %17 {offsets = [0, 128], sizes = [8, 128], strides = [1, 1]} : vector<8x256xf32> to vector<8x128xf32>
    %27 = arith.addf %25, %26 : vector<8x128xf32>
    %28 = arith.addf %24, %27 : vector<8x128xf32>
    %c0_16 = arith.constant 0 : index
    %c0_17 = arith.constant 0 : index
    %29 = vector.load %arg4[%c0_16, %c0_17] : memref<8x128xf32, #tpu.memory_space<vmem>>, vector<8x128xf32>
    tpu.vector_store %arg4[%c0_16, %c0_17], %28 {strides = array<i32>} : memref<8x128xf32, #tpu.memory_space<vmem>>, vector<8x128xf32>,
    %c0_18 = arith.constant 0 : index
    %c0_19 = arith.constant 0 : index
    %30 = vector.load %arg5[%c0_18, %c0_19] : memref<8x128xf32, #tpu.memory_space<vmem>>, vector<8x128xf32>
    %31 = arith.mulf %6, %6 : vector<8x256xf32>
    %32 = vector.extract_strided_slice %31 {offsets = [0, 0], sizes = [8, 128], strides = [1, 1]} : vector<8x256xf32> to vector<8x128xf32>
    %33 = vector.extract_strided_slice %31 {offsets = [0, 128], sizes = [8, 128], strides = [1, 1]} : vector<8x256xf32> to vector<8x128xf32>
    %34 = arith.addf %32, %33 : vector<8x128xf32>
    %35 = arith.addf %30, %34 : vector<8x128xf32>
    %c0_20 = arith.constant 0 : index
    %c0_21 = arith.constant 0 : index
    %36 = vector.load %arg5[%c0_20, %c0_21] : memref<8x128xf32, #tpu.memory_space<vmem>>, vector<8x128xf32>
    tpu.vector_store %arg5[%c0_20, %c0_21], %35 {strides = array<i32>} : memref<8x128xf32, #tpu.memory_space<vmem>>, vector<8x128xf32>,
    %c0_22 = arith.constant 0 : index
    %c0_23 = arith.constant 0 : index
    %37 = vector.load %arg6[%c0_22, %c0_23] : memref<8x128xf32, #tpu.memory_space<vmem>>, vector<8x128xf32>
    %38 = vector.extract_strided_slice %7 {offsets = [0, 0], sizes = [8, 128], strides = [1, 1]} : vector<8x256xf32> to vector<8x128xf32>
    %39 = vector.extract_strided_slice %7 {offsets = [0, 128], sizes = [8, 128], strides = [1, 1]} : vector<8x256xf32> to vector<8x128xf32>
    %40 = arith.addf %38, %39 : vector<8x128xf32>
    %41 = arith.addf %37, %40 : vector<8x128xf32>
    %c0_24 = arith.constant 0 : index
    %c0_25 = arith.constant 0 : index
    %42 = vector.load %arg6[%c0_24, %c0_25] : memref<8x128xf32, #tpu.memory_space<vmem>>, vector<8x128xf32>
    tpu.vector_store %arg6[%c0_24, %c0_25], %41 {strides = array<i32>} : memref<8x128xf32, #tpu.memory_space<vmem>>, vector<8x128xf32>,
    %43 = vector.extract_strided_slice %7 {offsets = [0, 0], sizes = [8, 4], strides = [1, 1]} : vector<8x256xf32> to vector<8x4xf32>
    %44 = vector.extract_strided_slice %6 {offsets = [0, 0], sizes = [8, 4], strides = [1, 1]} : vector<8x256xf32> to vector<8x4xf32>
    %45 = vector.extract_strided_slice %7 {offsets = [0, 252], sizes = [8, 4], strides = [1, 1]} : vector<8x256xf32> to vector<8x4xf32>
    %46 = vector.extract_strided_slice %6 {offsets = [0, 252], sizes = [8, 4], strides = [1, 1]} : vector<8x256xf32> to vector<8x4xf32>
    %cst_26 = arith.constant 0.949999988 : f32
    %47 = vector.broadcast %cst_26 : f32 to vector<8x4xf32>
    %48 = arith.mulf %47, %45 : vector<8x4xf32>
    %49 = arith.subf %43, %48 : vector<8x4xf32>
    %cst_27 = arith.constant 0.949999988 : f32
    %50 = vector.broadcast %cst_27 : f32 to vector<8x4xf32>
    %51 = arith.mulf %50, %3 : vector<8x4xf32>
    %52 = arith.subf %43, %51 : vector<8x4xf32>
    %cst_28 = arith.constant 0.949999988 : f32
    %53 = vector.broadcast %cst_28 : f32 to vector<8x4xf32>
    %54 = arith.mulf %53, %46 : vector<8x4xf32>
    %55 = arith.subf %44, %54 : vector<8x4xf32>
    %cst_29 = arith.constant 0.949999988 : f32
    %56 = vector.broadcast %cst_29 : f32 to vector<8x4xf32>
    %57 = arith.mulf %56, %4 : vector<8x4xf32>
    %58 = arith.subf %44, %57 : vector<8x4xf32>
    %c0_30 = arith.constant 0 : index
    %c0_31 = arith.constant 0 : index
    %59 = vector.load %arg7[%c0_30, %c0_31] : memref<8x4xf32, #tpu.memory_space<vmem>>, vector<8x4xf32>
    %60 = arith.mulf %52, %52 : vector<8x4xf32>
    %61 = arith.mulf %49, %49 : vector<8x4xf32>
    %62 = arith.subf %60, %61 : vector<8x4xf32>
    %63 = arith.addf %59, %62 : vector<8x4xf32>
    %c0_32 = arith.constant 0 : index
    %c0_33 = arith.constant 0 : index
    %64 = vector.load %arg7[%c0_32, %c0_33] : memref<8x4xf32, #tpu.memory_space<vmem>>, vector<8x4xf32>
    tpu.vector_store %arg7[%c0_32, %c0_33], %63 {strides = array<i32>} : memref<8x4xf32, #tpu.memory_space<vmem>>, vector<8x4xf32>,
    %c0_34 = arith.constant 0 : index
    %c0_35 = arith.constant 0 : index
    %65 = vector.load %arg8[%c0_34, %c0_35] : memref<8x4xf32, #tpu.memory_space<vmem>>, vector<8x4xf32>
    %66 = arith.mulf %58, %58 : vector<8x4xf32>
    %67 = arith.mulf %55, %55 : vector<8x4xf32>
    %68 = arith.subf %66, %67 : vector<8x4xf32>
    %69 = arith.addf %65, %68 : vector<8x4xf32>
    %c0_36 = arith.constant 0 : index
    %c0_37 = arith.constant 0 : index
    %70 = vector.load %arg8[%c0_36, %c0_37] : memref<8x4xf32, #tpu.memory_space<vmem>>, vector<8x4xf32>
    tpu.vector_store %arg8[%c0_36, %c0_37], %69 {strides = array<i32>} : memref<8x4xf32, #tpu.memory_space<vmem>>, vector<8x4xf32>,
    %c0_38 = arith.constant 0 : index
    %c0_39 = arith.constant 0 : index
    %71 = vector.load %arg9[%c0_38, %c0_39] : memref<8x4xf32, #tpu.memory_space<vmem>>, vector<8x4xf32>
    tpu.vector_store %arg9[%c0_38, %c0_39], %45 {strides = array<i32>} : memref<8x4xf32, #tpu.memory_space<vmem>>, vector<8x4xf32>,
    %c0_40 = arith.constant 0 : index
    %c0_41 = arith.constant 0 : index
    %72 = vector.load %arg10[%c0_40, %c0_41] : memref<8x4xf32, #tpu.memory_space<vmem>>, vector<8x4xf32>
    tpu.vector_store %arg10[%c0_40, %c0_41], %46 {strides = array<i32>} : memref<8x4xf32, #tpu.memory_space<vmem>>, vector<8x4xf32>,
    return
  }
  func.func @transform_0(%arg0: i32) -> (i32, i32) {
    %c0_i32 = arith.constant 0 : i32
    %c0_i32_0 = arith.constant 0 : i32
    return %c0_i32, %arg0 : i32, i32
  }
  func.func @transform_1(%arg0: i32) -> (i32, i32) {
    %c0_i32 = arith.constant 0 : i32
    %c0_i32_0 = arith.constant 0 : i32
    return %c0_i32, %arg0 : i32, i32
  }
  func.func @transform_2(%arg0: i32) -> (i32, i32) {
    %c0_i32 = arith.constant 0 : i32
    %c0_i32_0 = arith.constant 0 : i32
    %c0_i32_1 = arith.constant 0 : i32
    return %c0_i32, %c0_i32_0 : i32, i32
  }
  func.func @transform_3(%arg0: i32) -> (i32, i32) {
    %c0_i32 = arith.constant 0 : i32
    %c0_i32_0 = arith.constant 0 : i32
    %c0_i32_1 = arith.constant 0 : i32
    return %c0_i32, %c0_i32_0 : i32, i32
  }
  func.func @transform_4(%arg0: i32) -> (i32, i32) {
    %c0_i32 = arith.constant 0 : i32
    %c0_i32_0 = arith.constant 0 : i32
    %c0_i32_1 = arith.constant 0 : i32
    return %c0_i32, %c0_i32_0 : i32, i32
  }
  func.func @transform_5(%arg0: i32) -> (i32, i32) {
    %c0_i32 = arith.constant 0 : i32
    %c0_i32_0 = arith.constant 0 : i32
    %c0_i32_1 = arith.constant 0 : i32
    return %c0_i32, %c0_i32_0 : i32, i32
  }
  func.func @transform_6(%arg0: i32) -> (i32, i32) {
    %c0_i32 = arith.constant 0 : i32
    %c0_i32_0 = arith.constant 0 : i32
    %c0_i32_1 = arith.constant 0 : i32
    return %c0_i32, %c0_i32_0 : i32, i32
  }
  func.func @transform_7(%arg0: i32) -> (i32, i32) {
    %c0_i32 = arith.constant 0 : i32
    %c0_i32_0 = arith.constant 0 : i32
    %c0_i32_1 = arith.constant 0 : i32
    return %c0_i32, %c0_i32_0 : i32, i32
  }
}

</mosaic_0001>

<bundles_post_ra>
// kernel: squeeze.6
= control target key start
LH: loop header
LB: loop body
LE: loop exit
PB: predicated region body
PF: predicated region fallthrough
CT: control target
= control target key end

     0   :  { %vm5_vm0 = vcmask 1041409   ;;  %vm9_vm1 = vcmask 1042434   ;;  %vm13_vm2 = vcmask 1043459   ;;  %vm17_vm3 = vcmask 1044484   ;;  %s5603_s25 = smov 124   ;;  %s5604_s29 = smov 120   ;;  %s10387_s0 = inlined_call_operand.vmem [shape: f32[1024,4,1], index: 0, kind: input, shape index: {}]   ;;  %s10388_s1 = inlined_call_operand.vmem [shape: f32[8,512], index: 1, kind: output, shape index: {}]  }
   0x1   :  { %vm21_vm4 = vcmask 1045509   ;;  %vm25_vm5 = vcmask 1046534   ;;  %v4504_v0 = vld [vmem:[%s10387_s0 + $0x5f] sm:$0x1]   ;;  %vm29_vm6 = vcmask 1047559   ;;  %s5605_s10 = smov 116  }
   0x2   :  { %v4505_v1 = vld [vmem:[%s10387_s0 + $0xde] sm:$0x2]   ;;  %v4530_v52 = vld [vmem:[%s10387_s0 + $0x3e] sm:$0x1]   ;;  %s5606_s17 = smov 112   ;;  %s5607_s27 = smov 108  }
   0x3   :  { %v4506_v2 = vld [vmem:[%s10387_s0 + $0x15d] sm:$0x4]   ;;  %v214_v4 = vsel %vm5_vm0, %v4505_v1, %v4504_v0  ;;  %v4531_v53 = vld [vmem:[%s10387_s0 + $0xbd] sm:$0x2]   ;;  %s5608_s6 = smov 104   ;;  %s5609_s9 = smov 100  }
   0x4   :  { %v4507_v3 = vld [vmem:[%s10387_s0 + $0x1dc] sm:$0x8]   ;;  %v218_v7 = vsel %vm9_vm1, %v4506_v2, %v214_v4  ;;  %v318_v56 = vsel %vm5_vm0, %v4531_v53, %v4530_v52  ;;  %v4532_v57 = vld [vmem:[%s10387_s0 + $0x13c] sm:$0x4]   ;;  %s5611_s26 = smov 92   ;;  %s5612_s5 = smov 88  }
   0x5   :  { %v4508_v5 = vld [vmem:[%s10387_s0 + $0x25b] sm:$0x10]   ;;  %v222_v11 = vsel %vm13_vm2, %v4507_v3, %v218_v7  ;;  %v4533_v58 = vld [vmem:[%s10387_s0 + $0x1bb] sm:$0x8]   ;;  %v322_v63 = vsel %vm9_vm1, %v4532_v57, %v318_v56  ;;  %v4568_v56 = vld [vmem:[%s10387_s0 + $0x1ba] sm:$0x8]  }
   0x6   :  { %v4509_v6 = vld [vmem:[%s10387_s0 + $0x2da] sm:$0x20]   ;;  %v226_v16 = vsel %vm17_vm3, %v4508_v5, %v222_v11  ;;  %v4534_v59 = vld [vmem:[%s10387_s0 + $0x23a] sm:$0x10]   ;;  %v326_v3 = vsel %vm13_vm2, %v4533_v58, %v322_v63  ;;  %v4569_v57 = vld [vmem:[%s10387_s0 + $0x239] sm:$0x10]  }
   0x7   :  { %v4510_v8 = vld [vmem:[%s10387_s0 + $0x359] sm:$0x40]   ;;  %v230_v21 = vsel %vm21_vm4, %v4509_v6, %v226_v16  ;;  %v4535_v0 = vld [vmem:[%s10387_s0 + $0x2b9] sm:$0x20]   ;;  %v4557_v63 = vld [vmem:[%s10387_s0 + $0x1d] sm:$0x1]  }
   0x8   :  { %v4487_v9 = vld [vmem:[%s10387_s0 + $0x1f] sm:$0x1]   ;;  %v234_v26 = vsel %vm25_vm5, %v4510_v8, %v230_v21  ;;  %v4536_v1 = vld [vmem:[%s10387_s0 + $0x338] sm:$0x40]   ;;  %v330_v8 = vsel %vm17_vm3, %v4534_v59, %v326_v3  ;;  %v4559_v3 = vld [vmem:[%s10387_s0 + $0x11b] sm:$0x4]  }
   0x9   :  { %v4488_v10 = vld [vmem:[%s10387_s0 + $0x9e] sm:$0x2]   ;;  %v4522_v4 = vld [vmem:[%s10387_s0 + $0x1e] sm:$0x1]   ;;  %s5613_s16 = smov 84   ;;  %s5614_s22 = smov 80  }
   0xa   :  { %v145_v12 = vsel %vm5_vm0, %v4488_v10, %v4487_v9  ;;  %v4489_v13 = vld [vmem:[%s10387_s0 + $0x11d] sm:$0x4]   ;;  %v4523_v5 = vld [vmem:[%s10387_s0 + $0x9d] sm:$0x2]   ;;  %s5616_s4 = smov 72   ;;  %s5617_s15 = smov 68  }
   0xb   :  { %v4490_v14 = vld [vmem:[%s10387_s0 + $0x19c] sm:$0x8]   ;;  %v149_v18 = vsel %vm9_vm1, %v4489_v13, %v145_v12  ;;  %v4524_v6 = vld [vmem:[%s10387_s0 + $0x11c] sm:$0x4]   ;;  %v284_v10 = vsel %vm5_vm0, %v4523_v5, %v4522_v4  ;;  %v4560_v4 = vld [vmem:[%s10387_s0 + $0x19a] sm:$0x8]  }
   0xc   :  { %v4491_v15 = vld [vmem:[%s10387_s0 + $0x21b] sm:$0x10]   ;;  %v153_v22 = vsel %vm13_vm2, %v4490_v14, %v149_v18  ;;  %v4537_v9 = vld [vmem:[%s10387_s0 + $0x3b7] sm:$0x80]   ;;  %v334_v14 = vsel %vm21_vm4, %v4535_v0, %v330_v8  ;;  %vm31_vm7 = vcmask 31744   ;;  %s5618_s21 = smov 64  }
   0xd   :  { %v4511_v17 = vld [vmem:[%s10387_s0 + $0x3d8] sm:$0x80]   ;;  %v157_v27 = vsel %vm17_vm3, %v4491_v15, %v153_v22  ;;  %v4525_v11 = vld [vmem:[%s10387_s0 + $0x19b] sm:$0x8]   ;;  %v288_v15 = vsel %vm9_vm1, %v4524_v6, %v284_v10  ;;  %v4562_v10 = vld [vmem:[%s10387_s0 + $0x298] sm:$0x20]  }
   0xe   :  { %v4492_v19 = vld [vmem:[%s10387_s0 + $0x29a] sm:$0x20]   ;;  %v238_v32 = vsel %vm29_vm6, %v4511_v17, %v234_v26  ;;  %v4526_v12 = vld [vmem:[%s10387_s0 + $0x21a] sm:$0x10]   ;;  %vm172_vm8 = vcmask 1048544   ;;  %vm311_vm9 = vcmask 1015744  }
   0xf   :  { %v4493_v20 = vld [vmem:[%s10387_s0 + $0x319] sm:$0x40]   ;;  %v161_v33 = vsel %vm21_vm4, %v4492_v19, %v157_v27  ;;  %239 = vrot.lane.b32.xlu1 %v238_v32, %s5603_s25  ;;  %v4527_v16 = vld [vmem:[%s10387_s0 + $0x299] sm:$0x20]   ;;  %v338_v19 = vsel %vm25_vm5, %v4536_v1, %v334_v14  ;;  %v4583_v14 = vld [vmem:[%s10387_s0 + $0x7d] sm:$0x1]  }
  0x10   :  { %v4513_v23 = vld [vmem:[%s10387_s0 + $0x7f] sm:$0x1]   ;;  %v165_v38 = vsel %vm25_vm5, %v4493_v20, %v161_v33  ;;  %v4528_v17 = vld [vmem:[%s10387_s0 + $0x318] sm:$0x40]   ;;  %v292_v20 = vsel %vm13_vm2, %v4525_v11, %v288_v15  ;;  %v4584_v15 = vld [vmem:[%s10387_s0 + $0xfc] sm:$0x2]  }
  0x11   :  { %v4514_v24 = vld [vmem:[%s10387_s0 + $0xfe] sm:$0x2]   ;;  %v4548_v18 = vld [vmem:[%s10387_s0 + $0x7e] sm:$0x1]   ;;  %vm450_vm10 = vcmask 982944   ;;  %s5619_s24 = smov 60  }
  0x12   :  { %v4515_v25 = vld [vmem:[%s10387_s0 + $0x17d] sm:$0x4]   ;;  %v249_v29 = vsel %vm5_vm0, %v4514_v24, %v4513_v23  ;;  %v4549_v21 = vld [vmem:[%s10387_s0 + $0xfd] sm:$0x2]   ;;  %v342_v24 = vsel %vm29_vm6, %v4537_v9, %v338_v19  ;;  %v4561_v9 = vld [vmem:[%s10387_s0 + $0x219] sm:$0x10]  }
  0x13   :  { %v4494_v28 = vld [vmem:[%s10387_s0 + $0x398] sm:$0x80]   ;;  %v253_v34 = vsel %vm9_vm1, %v4515_v25, %v249_v29  ;;  %v4550_v22 = vld [vmem:[%s10387_s0 + $0x17c] sm:$0x4]   ;;  %v296_v25 = vsel %vm17_vm3, %v4526_v12, %v292_v20  ;;  %v388_v27 = vsel %vm5_vm0, %v4549_v21, %v4548_v18  ;;  %v527_v18 = vsel %vm5_vm0, %v4584_v15, %v4583_v14  ;;  %v4585_v19 = vld [vmem:[%s10387_s0 + $0x17b] sm:$0x4]  }
  0x14   :  { %v4516_v30 = vld [vmem:[%s10387_s0 + $0x1fc] sm:$0x8]   ;;  %v169_v43 = vsel %vm29_vm6, %v4494_v28, %v165_v38  ;;  %v4551_v23 = vld [vmem:[%s10387_s0 + $0x1fb] sm:$0x8]   ;;  %v4586_v20 = vld [vmem:[%s10387_s0 + $0x1fa] sm:$0x8]  }
  0x15   :  { %v4517_v31 = vld [vmem:[%s10387_s0 + $0x27b] sm:$0x10]   ;;  %v257_v39 = vsel %vm13_vm2, %v4516_v30, %v253_v34  ;;  %170 = vrot.lane.b32.xlu0 %v169_v43, %s5603_s25  ;;  %v4529_v26 = vld [vmem:[%s10387_s0 + $0x397] sm:$0x80]   ;;  %v300_v30 = vsel %vm21_vm4, %v4527_v16, %v296_v25  ;;  %v4587_v21 = vld [vmem:[%s10387_s0 + $0x279] sm:$0x10]   ;;  %v531_v25 = vsel %vm9_vm1, %v4585_v19, %v527_v18 }
  0x16   :  { %v4518_v35 = vld [vmem:[%s10387_s0 + $0x2fa] sm:$0x20]   ;;  %v261_v44 = vsel %vm17_vm3, %v4517_v31, %v257_v39  ;;  %v4552_v28 = vld [vmem:[%s10387_s0 + $0x27a] sm:$0x10]   ;;  %v392_v31 = vsel %vm9_vm1, %v4550_v22, %v388_v27  ;;  %v4589_v27 = vld [vmem:[%s10387_s0 + $0x377] sm:$0x40]  }
  0x17   :  { %v4519_v36 = vld [vmem:[%s10387_s0 + $0x379] sm:$0x40]   ;;  %v265_v49 = vsel %vm21_vm4, %v4518_v35, %v261_v44  ;;  %v4553_v29 = vld [vmem:[%s10387_s0 + $0x2f9] sm:$0x20]   ;;  %v304_v35 = vsel %vm25_vm5, %v4528_v17, %v300_v30  ;;  %v4574_v30 = vld [vmem:[%s10387_s0 + $0x5d] sm:$0x1]  }
  0x18   :  { %v4495_v37 = vld [vmem:[%s10387_s0 + $0x3f] sm:$0x1]   ;;  %v269_v54 = vsel %vm25_vm5, %v4519_v36, %v265_v49  ;;  %v4554_v32 = vld [vmem:[%s10387_s0 + $0x378] sm:$0x40]   ;;  %v396_v36 = vsel %vm13_vm2, %v4551_v23, %v392_v31  ;;  %v4565_v49 = vld [vmem:[%s10387_s0 + $0x3d] sm:$0x1]  }
  0x19   :  { %v4496_v40 = vld [vmem:[%s10387_s0 + $0xbe] sm:$0x2]   ;;  %v4539_v33 = vld [vmem:[%s10387_s0 + $0x5e] sm:$0x1]   ;;  %v4575_v31 = vld [vmem:[%s10387_s0 + $0xdc] sm:$0x2]  }
  0x1a   :  { %v4497_v41 = vld [vmem:[%s10387_s0 + $0x13d] sm:$0x4]   ;;  %v179_v46 = vsel %vm5_vm0, %v4496_v40, %v4495_v37  ;;  %v4540_v34 = vld [vmem:[%s10387_s0 + $0xdd] sm:$0x2]   ;;  %v4620_v15 = vld [vmem:[%s10387_s0 + $0x17a] sm:$0x4]  }
  0x1b   :  { %v4498_v42 = vld [vmem:[%s10387_s0 + $0x1bc] sm:$0x8]   ;;  %v183_v50 = vsel %vm9_vm1, %v4497_v41, %v179_v46  ;;  %v353_v37 = vsel %vm5_vm0, %v4540_v34, %v4539_v33  ;;  %v4541_v38 = vld [vmem:[%s10387_s0 + $0x15c] sm:$0x4]   ;;  %v308_v41 = vsel %vm29_vm6, %v4529_v26, %v304_v35  ;;  %v4588_v26 = vld [vmem:[%s10387_s0 + $0x2f8] sm:$0x20]  }
  0x1c   :  { %v4520_v45 = vld [vmem:[%s10387_s0 + $0x3f8] sm:$0x80]   ;;  %v187_v55 = vsel %vm13_vm2, %v4498_v42, %v183_v50  ;;  %v4542_v39 = vld [vmem:[%s10387_s0 + $0x1db] sm:$0x8]   ;;  %v400_v42 = vsel %vm17_vm3, %v4552_v28, %v396_v36  ;;  %v357_v44 = vsel %vm9_vm1, %v4541_v38, %v353_v37  ;;  %v4566_v50 = vld [vmem:[%s10387_s0 + $0xbc] sm:$0x2]   ;;  %v492_v36 = vsel %vm5_vm0, %v4575_v31, %v4574_v30 }
  0x1d   :  { %v4499_v47 = vld [vmem:[%s10387_s0 + $0x23b] sm:$0x10]   ;;  %v273_v60 = vsel %vm29_vm6, %v4520_v45, %v269_v54  ;;  %v4543_v40 = vld [vmem:[%s10387_s0 + $0x25a] sm:$0x10]   ;;  %v4590_v35 = vld [vmem:[%s10387_s0 + $0x3f6] sm:$0x80]  }
  0x1e   :  { %v4500_v48 = vld [vmem:[%s10387_s0 + $0x2ba] sm:$0x20]   ;;  %v191_v61 = vsel %vm17_vm3, %v4499_v47, %v187_v55  ;;  %274 = vrot.lane.b32.xlu1 %v273_v60, %s5603_s25  ;;  %v4555_v43 = vld [vmem:[%s10387_s0 + $0x3f7] sm:$0x80]   ;;  %v404_v47 = vsel %vm21_vm4, %v4553_v29, %v400_v42  ;;  %v457_v55 = vsel %vm5_vm0, %v4566_v50, %v4565_v49  ;;  %v535_v29 = vsel %vm13_vm2, %v4586_v20, %v531_v25  ;;  %v4577_v37 = vld [vmem:[%s10387_s0 + $0x1da] sm:$0x8]  }
  0x1f   :  { %v4501_v51 = vld [vmem:[%s10387_s0 + $0x339] sm:$0x40]   ;;  %v195_v2 = vsel %vm21_vm4, %v4500_v48, %v191_v61  ;;  %v4544_v45 = vld [vmem:[%s10387_s0 + $0x2d9] sm:$0x20]   ;;  %v361_v48 = vsel %vm13_vm2, %v4542_v39, %v357_v44  ;;  %v408_v52 = vsel %vm25_vm5, %v4554_v32, %v404_v47  ;;  %v4570_v61 = vld [vmem:[%s10387_s0 + $0x2b8] sm:$0x20]   ;;  %v539_v34 = vsel %vm17_vm3, %v4587_v21, %v535_v29 }
  0x20   :  { %v4502_v62 = vld [vmem:[%s10387_s0 + $0x3b8] sm:$0x80]   ;;  %v199_v7 = vsel %vm25_vm5, %v4501_v51, %v195_v2  ;;  %v4545_v46 = vld [vmem:[%s10387_s0 + $0x358] sm:$0x40]   ;;  %v4567_v51 = vld [vmem:[%s10387_s0 + $0x13b] sm:$0x4]   ;;  %v365_v53 = vsel %vm17_vm3, %v4543_v40, %v361_v48  ;;  %v412_v58 = vsel %vm29_vm6, %v4555_v43, %v408_v52  ;;  %v543_v40 = vsel %vm21_vm4, %v4588_v26, %v539_v34 }
  0x21   :  { %v203_v13 = vsel %vm29_vm6, %v4502_v62, %v199_v7  ;;  %v4546_v54 = vld [vmem:[%s10387_s0 + $0x3d7] sm:$0x80]   ;;  %v369_v59 = vsel %vm21_vm4, %v4544_v45, %v365_v53  ;;  %v461_v60 = vsel %vm9_vm1, %v4567_v51, %v457_v55  ;;  %v4571_v62 = vld [vmem:[%s10387_s0 + $0x337] sm:$0x40]   ;;  %v547_v45 = vsel %vm25_vm5, %v4589_v27, %v543_v40  ;;  %v4600_v47 = vld [vmem:[%s10387_s0 + $0x3c] sm:$0x1]  }
  0x22   :  { %204 = vrot.lane.b32.xlu0 %v203_v13, %s5603_s25  ;;  %343 = vrot.lane.b32.xlu1 %v342_v24, %s5604_s29  ;;  %v373_v0 = vsel %vm25_vm5, %v4545_v46, %v369_v59  ;;  %v465_v1 = vsel %vm13_vm2, %v4568_v56, %v461_v60  ;;  %v4558_v2 = vld [vmem:[%s10387_s0 + $0x9c] sm:$0x2]   ;;  %v4601_v48 = vld [vmem:[%s10387_s0 + $0xbb] sm:$0x2]   ;;  %v551_v50 = vsel %vm29_vm6, %v4590_v35, %v547_v45  ;;  %s5610_s25 = smov 96   ;;  %vm589_vm11 = vcmask 950144  }
  0x23   :  { %v377_v5 = vsel %vm29_vm6, %v4546_v54, %v373_v0  ;;  %v469_v6 = vsel %vm17_vm3, %v4569_v57, %v465_v1  ;;  %v4572_v7 = vld [vmem:[%s10387_s0 + $0x3b6] sm:$0x80]   ;;  %v423_v8 = vsel %vm5_vm0, %v4558_v2, %v4557_v63  ;;  %v4602_v49 = vld [vmem:[%s10387_s0 + $0x13a] sm:$0x4]   ;;  %v596_v52 = vsel %vm5_vm0, %v4601_v48, %v4600_v47  ;;  %v4635_v40 = vld [vmem:[%s10387_s0 + $0x3b] sm:$0x1]  }
  0x24   :  { %v473_v11 = vsel %vm21_vm4, %v4570_v61, %v469_v6  ;;  %v427_v12 = vsel %vm9_vm1, %v4559_v3, %v423_v8  ;;  %v4563_v13 = vld [vmem:[%s10387_s0 + $0x317] sm:$0x40]   ;;  %v4603_v53 = vld [vmem:[%s10387_s0 + $0x1b9] sm:$0x8]   ;;  %v600_v56 = vsel %vm9_vm1, %v4602_v49, %v596_v52  ;;  %v4638_v45 = vld [vmem:[%s10387_s0 + $0x1b8] sm:$0x8]  }
  0x25   :  { %v477_v16 = vsel %vm25_vm5, %v4571_v62, %v473_v11  ;;  %v431_v17 = vsel %vm13_vm2, %v4560_v4, %v427_v12  ;;  %v4564_v24 = vld [vmem:[%s10387_s0 + $0x396] sm:$0x80]   ;;  %v4604_v54 = vld [vmem:[%s10387_s0 + $0x238] sm:$0x10]   ;;  %v604_v61 = vsel %vm13_vm2, %v4603_v53, %v600_v56  ;;  %v4628_v56 = vld [vmem:[%s10387_s0 + $0x9a] sm:$0x2]  }
  0x26   :  { %309 = vrot.lane.b32.xlu0 %v308_v41, %s5604_s29  ;;  %413 = vrot.lane.b32.xlu1 %v412_v58, %s5604_s29  ;;  %v481_v22 = vsel %vm29_vm6, %v4572_v7, %v477_v16  ;;  %v435_v23 = vsel %vm17_vm3, %v4561_v9, %v431_v17  ;;  %v4576_v32 = vld [vmem:[%s10387_s0 + $0x15b] sm:$0x4]   ;;  %v4605_v57 = vld [vmem:[%s10387_s0 + $0x2b7] sm:$0x20]   ;;  %v608_v2 = vsel %vm17_vm3, %v4604_v54, %v604_v61  ;;  %s5620_s11 = smov 56   ;;  %vm728_vm12 = vcmask 917344  }
  0x27   :  { %v439_v28 = vsel %vm21_vm4, %v4562_v10, %v435_v23  ;;  %v4578_v38 = vld [vmem:[%s10387_s0 + $0x259] sm:$0x10]   ;;  %v496_v41 = vsel %vm9_vm1, %v4576_v32, %v492_v36  ;;  %v4606_v58 = vld [vmem:[%s10387_s0 + $0x336] sm:$0x40]   ;;  %v612_v7 = vsel %vm21_vm4, %v4605_v57, %v608_v2  ;;  %v4641_v54 = vld [vmem:[%s10387_s0 + $0x335] sm:$0x40]  }
  0x28   :  { %v443_v33 = vsel %vm25_vm5, %v4563_v13, %v439_v28  ;;  %v4579_v42 = vld [vmem:[%s10387_s0 + $0x2d8] sm:$0x20]   ;;  %v500_v46 = vsel %vm13_vm2, %v4577_v37, %v496_v41  ;;  %v4592_v59 = vld [vmem:[%s10387_s0 + $0x1c] sm:$0x1]   ;;  %v616_v12 = vsel %vm25_vm5, %v4606_v58, %v612_v7  ;;  %v4630_v61 = vld [vmem:[%s10387_s0 + $0x198] sm:$0x8]  }
  0x29   :  { %v447_v39 = vsel %vm29_vm6, %v4564_v24, %v443_v33  ;;  %v4580_v43 = vld [vmem:[%s10387_s0 + $0x357] sm:$0x40]   ;;  %v504_v51 = vsel %vm17_vm3, %v4578_v38, %v500_v46  ;;  %v4593_v62 = vld [vmem:[%s10387_s0 + $0x9b] sm:$0x2]   ;;  %v4653_v7 = vld [vmem:[%s10387_s0 + $0x7b] sm:$0x1]  }
  0x2a   :  { %378 = vrot.lane.b32.xlu0 %v377_v5, %s5604_s29  ;;  %482 = vrot.lane.b32.xlu1 %v481_v22, %s5605_s10  ;;  %v4581_v44 = vld [vmem:[%s10387_s0 + $0x3d6] sm:$0x80]   ;;  %v508_v55 = vsel %vm21_vm4, %v4579_v42, %v504_v51  ;;  %v4594_v63 = vld [vmem:[%s10387_s0 + $0x11a] sm:$0x4]   ;;  %v562_v4 = vsel %vm5_vm0, %v4593_v62, %v4592_v59  ;;  %vm867_vm13 = vcmask 884544   ;;  %s5622_s14 = smov 48  }
  0x2b   :  { %v512_v60 = vsel %vm25_vm5, %v4580_v43, %v508_v55  ;;  %v4595_v0 = vld [vmem:[%s10387_s0 + $0x199] sm:$0x8]   ;;  %v566_v8 = vsel %vm9_vm1, %v4594_v63, %v562_v4  ;;  %v4636_v43 = vld [vmem:[%s10387_s0 + $0xba] sm:$0x2]   ;;  %vm1006_vm14 = vcmask 851744   ;;  %s5623_s30 = smov 44  }
  0x2c   :  { %v516_v1 = vsel %vm29_vm6, %v4581_v44, %v512_v60  ;;  %v4607_v3 = vld [vmem:[%s10387_s0 + $0x3b5] sm:$0x80]   ;;  %v570_v13 = vsel %vm13_vm2, %v4595_v0, %v566_v8  ;;  %v4637_v44 = vld [vmem:[%s10387_s0 + $0x139] sm:$0x4]   ;;  %v735_v49 = vsel %vm5_vm0, %v4636_v43, %v4635_v40  ;;  %v4671_v40 = vld [vmem:[%s10387_s0 + $0xb9] sm:$0x2]  }
  0x2d   :  { %v4596_v5 = vld [vmem:[%s10387_s0 + $0x218] sm:$0x10]   ;;  %v620_v18 = vsel %vm29_vm6, %v4607_v3, %v616_v12  ;;  %v4640_v51 = vld [vmem:[%s10387_s0 + $0x2b6] sm:$0x20]   ;;  %v739_v53 = vsel %vm9_vm1, %v4637_v44, %v735_v49  ;;  %vm1145_vm15 = vcmask 818944   ;;  %s5626_s19 = smov 32  }
  0x2e   :  { %448 = vrot.lane.b32.xlu0 %v447_v39, %s5605_s10  ;;  %552 = vrot.lane.b32.xlu1 %v551_v50, %s5605_s10  ;;  %v4597_v6 = vld [vmem:[%s10387_s0 + $0x297] sm:$0x20]   ;;  %v574_v19 = vsel %vm17_vm3, %v4596_v5, %v570_v13  ;;  %v4639_v50 = vld [vmem:[%s10387_s0 + $0x237] sm:$0x10]   ;;  %v743_v58 = vsel %vm13_vm2, %v4638_v45, %v739_v53  ;;  %s5627_s7 = smov 28   ;;  %s5628_s20 = smov 24  }
  0x2f   :  { %v4598_v9 = vld [vmem:[%s10387_s0 + $0x316] sm:$0x40]   ;;  %v578_v24 = vsel %vm21_vm4, %v4597_v6, %v574_v19  ;;  %v4627_v55 = vld [vmem:[%s10387_s0 + $0x1b] sm:$0x1]   ;;  %v747_v0 = vsel %vm17_vm3, %v4639_v50, %v743_v58  ;;  %v4676_v50 = vld [vmem:[%s10387_s0 + $0x334] sm:$0x40]  }
  0x30   :  { %v4618_v10 = vld [vmem:[%s10387_s0 + $0x7c] sm:$0x1]   ;;  %v582_v29 = vsel %vm25_vm5, %v4598_v9, %v578_v24  ;;  %v701_v59 = vsel %vm5_vm0, %v4628_v56, %v4627_v55  ;;  %v4629_v60 = vld [vmem:[%s10387_s0 + $0x119] sm:$0x4]   ;;  %v751_v5 = vsel %vm21_vm4, %v4640_v51, %v747_v0  ;;  %v4662_v51 = vld [vmem:[%s10387_s0 + $0x1a] sm:$0x1]  }
  0x31   :  { %v4619_v11 = vld [vmem:[%s10387_s0 + $0xfb] sm:$0x2]   ;;  %v4631_v62 = vld [vmem:[%s10387_s0 + $0x217] sm:$0x10]   ;;  %v705_v2 = vsel %vm9_vm1, %v4629_v60, %v701_v59  ;;  %v4664_v56 = vld [vmem:[%s10387_s0 + $0x118] sm:$0x4]  }
  0x32   :  { %517 = vrot.lane.b32.xlu0 %v516_v1, %s5605_s10  ;;  %v666_v14 = vsel %vm5_vm0, %v4619_v11, %v4618_v10  ;;  %v4621_v16 = vld [vmem:[%s10387_s0 + $0x1f9] sm:$0x8]   ;;  %621 = vrot.lane.b32.xlu1 %v620_v18, %s5606_s17  ;;  %v4642_v1 = vld [vmem:[%s10387_s0 + $0x3b4] sm:$0x80]   ;;  %v709_v6 = vsel %vm13_vm2, %v4630_v61, %v705_v2  ;;  %v755_v10 = vsel %vm25_vm5, %v4641_v54, %v751_v5  ;;  %s5631_s12 = smov 12   ;;  %s5632_s10 = smov 8  }
  0x33   :  { %v4622_v17 = vld [vmem:[%s10387_s0 + $0x278] sm:$0x10]   ;;  %v670_v21 = vsel %vm9_vm1, %v4620_v15, %v666_v14  ;;  %v4632_v3 = vld [vmem:[%s10387_s0 + $0x296] sm:$0x20]   ;;  %v713_v11 = vsel %vm17_vm3, %v4631_v62, %v709_v6  ;;  %v4666_v58 = vld [vmem:[%s10387_s0 + $0x216] sm:$0x10]  }
  0x34   :  { %v4599_v20 = vld [vmem:[%s10387_s0 + $0x395] sm:$0x80]   ;;  %v674_v25 = vsel %vm13_vm2, %v4621_v16, %v670_v21  ;;  %v4633_v4 = vld [vmem:[%s10387_s0 + $0x315] sm:$0x40]   ;;  %v759_v16 = vsel %vm29_vm6, %v4642_v1, %v755_v10  ;;  %v4677_v61 = vld [vmem:[%s10387_s0 + $0x3b3] sm:$0x80]  }
  0x35   :  { %v4623_v22 = vld [vmem:[%s10387_s0 + $0x2f7] sm:$0x20]   ;;  %v678_v30 = vsel %vm17_vm3, %v4622_v17, %v674_v25  ;;  %v586_v35 = vsel %vm29_vm6, %v4599_v20, %v582_v29  ;;  %v4654_v8 = vld [vmem:[%s10387_s0 + $0xfa] sm:$0x2]   ;;  %v717_v17 = vsel %vm21_vm4, %v4632_v3, %v713_v11  ;;  %v4668_v0 = vld [vmem:[%s10387_s0 + $0x314] sm:$0x40]  }
  0x36   :  { %v4624_v23 = vld [vmem:[%s10387_s0 + $0x376] sm:$0x40]   ;;  %v682_v36 = vsel %vm21_vm4, %v4623_v22, %v678_v30  ;;  %587 = vrot.lane.b32.xlu0 %v586_v35, %s5606_s17  ;;  %v4655_v9 = vld [vmem:[%s10387_s0 + $0x179] sm:$0x4]   ;;  %v805_v13 = vsel %vm5_vm0, %v4654_v8, %v4653_v7  ;;  %v721_v22 = vsel %vm25_vm5, %v4633_v4, %v717_v17  ;;  %v4688_v3 = vld [vmem:[%s10387_s0 + $0x7a] sm:$0x1]  }
  0x37   :  { %v4609_v26 = vld [vmem:[%s10387_s0 + $0x5c] sm:$0x1]   ;;  %v686_v41 = vsel %vm25_vm5, %v4624_v23, %v682_v36  ;;  %v4634_v12 = vld [vmem:[%s10387_s0 + $0x394] sm:$0x80]   ;;  %v809_v18 = vsel %vm9_vm1, %v4655_v9, %v805_v13  ;;  %v4689_v4 = vld [vmem:[%s10387_s0 + $0xf9] sm:$0x2]  }
  0x38   :  { %v4610_v27 = vld [vmem:[%s10387_s0 + $0xdb] sm:$0x2]   ;;  %v4656_v14 = vld [vmem:[%s10387_s0 + $0x1f8] sm:$0x8]   ;;  %v4690_v5 = vld [vmem:[%s10387_s0 + $0x178] sm:$0x4]   ;;  %v944_v9 = vsel %vm5_vm0, %v4689_v4, %v4688_v3 }
  0x39   :  { %v4611_v28 = vld [vmem:[%s10387_s0 + $0x15a] sm:$0x4]   ;;  %v631_v32 = vsel %vm5_vm0, %v4610_v27, %v4609_v26  ;;  %v4657_v15 = vld [vmem:[%s10387_s0 + $0x277] sm:$0x10]   ;;  %v813_v23 = vsel %vm13_vm2, %v4656_v14, %v809_v18  ;;  %v725_v27 = vsel %vm29_vm6, %v4634_v12, %v721_v22  ;;  %v4669_v8 = vld [vmem:[%s10387_s0 + $0x393] sm:$0x80]   ;;  %v948_v14 = vsel %vm9_vm1, %v4690_v5, %v944_v9 }
  0x3a   :  { %v4625_v31 = vld [vmem:[%s10387_s0 + $0x3f5] sm:$0x80]   ;;  %v635_v37 = vsel %vm9_vm1, %v4611_v28, %v631_v32  ;;  %v4658_v19 = vld [vmem:[%s10387_s0 + $0x2f6] sm:$0x20]   ;;  %v817_v28 = vsel %vm17_vm3, %v4657_v15, %v813_v23  ;;  %v4691_v10 = vld [vmem:[%s10387_s0 + $0x1f7] sm:$0x8]  }
  0x3b   :  { %v4612_v33 = vld [vmem:[%s10387_s0 + $0x1d9] sm:$0x8]   ;;  %v690_v46 = vsel %vm29_vm6, %v4625_v31, %v686_v41  ;;  %v4659_v20 = vld [vmem:[%s10387_s0 + $0x375] sm:$0x40]   ;;  %v4672_v41 = vld [vmem:[%s10387_s0 + $0x138] sm:$0x4]  }
  0x3c   :  { %v4613_v34 = vld [vmem:[%s10387_s0 + $0x258] sm:$0x10]   ;;  %v639_v42 = vsel %vm13_vm2, %v4612_v33, %v635_v37  ;;  %691 = vrot.lane.b32.xlu1 %v690_v46, %s5606_s17  ;;  %v4644_v21 = vld [vmem:[%s10387_s0 + $0x5b] sm:$0x1]   ;;  %v821_v33 = vsel %vm21_vm4, %v4658_v19, %v817_v28  ;;  %v4670_v37 = vld [vmem:[%s10387_s0 + $0x3a] sm:$0x1]   ;;  %v952_v19 = vsel %vm13_vm2, %v4691_v10, %v948_v14 }
  0x3d   :  { %v4614_v38 = vld [vmem:[%s10387_s0 + $0x2d7] sm:$0x20]   ;;  %v643_v47 = vsel %vm17_vm3, %v4613_v34, %v639_v42  ;;  %v4645_v24 = vld [vmem:[%s10387_s0 + $0xda] sm:$0x2]   ;;  %v4673_v42 = vld [vmem:[%s10387_s0 + $0x1b7] sm:$0x8]   ;;  %v874_v45 = vsel %vm5_vm0, %v4671_v40, %v4670_v37 }
  0x3e   :  { %v4615_v39 = vld [vmem:[%s10387_s0 + $0x356] sm:$0x40]   ;;  %v647_v52 = vsel %vm21_vm4, %v4614_v38, %v643_v47  ;;  %v4646_v25 = vld [vmem:[%s10387_s0 + $0x159] sm:$0x4]   ;;  %v770_v30 = vsel %vm5_vm0, %v4645_v24, %v4644_v21  ;;  %v825_v38 = vsel %vm25_vm5, %v4659_v20, %v821_v33  ;;  %v4674_v46 = vld [vmem:[%s10387_s0 + $0x236] sm:$0x10]   ;;  %v878_v49 = vsel %vm9_vm1, %v4672_v41, %v874_v45 }
  0x3f   :  { %v4616_v48 = vld [vmem:[%s10387_s0 + $0x3d5] sm:$0x80]   ;;  %v651_v57 = vsel %vm25_vm5, %v4615_v39, %v647_v52  ;;  %v4647_v26 = vld [vmem:[%s10387_s0 + $0x1d8] sm:$0x8]   ;;  %v774_v34 = vsel %vm9_vm1, %v4646_v25, %v770_v30  ;;  %v4675_v47 = vld [vmem:[%s10387_s0 + $0x2b5] sm:$0x20]   ;;  %v882_v54 = vsel %vm13_vm2, %v4673_v42, %v878_v49 }
  0x40   :  { %v655_v63 = vsel %vm29_vm6, %v4616_v48, %v651_v57  ;;  %760 = vrot.lane.b32.xlu1 %v759_v16, %s5607_s27  ;;  %v4660_v29 = vld [vmem:[%s10387_s0 + $0x3f4] sm:$0x80]   ;;  %v778_v39 = vsel %vm13_vm2, %v4647_v26, %v774_v34  ;;  %v4663_v52 = vld [vmem:[%s10387_s0 + $0x99] sm:$0x2]   ;;  %v886_v60 = vsel %vm17_vm3, %v4674_v46, %v882_v54  ;;  %v4706_v33 = vld [vmem:[%s10387_s0 + $0xb8] sm:$0x2]  }
  0x41   :  { %656 = vrot.lane.b32.xlu0 %v655_v63, %s5606_s17  ;;  %v4648_v31 = vld [vmem:[%s10387_s0 + $0x257] sm:$0x10]   ;;  %v829_v43 = vsel %vm29_vm6, %v4660_v29, %v825_v38  ;;  %v840_v55 = vsel %vm5_vm0, %v4663_v52, %v4662_v51  ;;  %v4665_v57 = vld [vmem:[%s10387_s0 + $0x197] sm:$0x8]   ;;  %v890_v1 = vsel %vm21_vm4, %v4675_v47, %v886_v60  ;;  %v4707_v37 = vld [vmem:[%s10387_s0 + $0x137] sm:$0x4]  }
  0x42   :  { %v4649_v32 = vld [vmem:[%s10387_s0 + $0x2d6] sm:$0x20]   ;;  %v782_v44 = vsel %vm17_vm3, %v4648_v31, %v778_v39  ;;  %v844_v62 = vsel %vm9_vm1, %v4664_v56, %v840_v55  ;;  %v4667_v63 = vld [vmem:[%s10387_s0 + $0x295] sm:$0x20]   ;;  %v894_v6 = vsel %vm25_vm5, %v4676_v50, %v890_v1  ;;  %v4708_v38 = vld [vmem:[%s10387_s0 + $0x1b6] sm:$0x8]  }
  0x43   :  { %v4650_v35 = vld [vmem:[%s10387_s0 + $0x355] sm:$0x40]   ;;  %v786_v48 = vsel %vm21_vm4, %v4649_v32, %v782_v44  ;;  %v848_v2 = vsel %vm13_vm2, %v4665_v57, %v844_v62  ;;  %v4692_v11 = vld [vmem:[%s10387_s0 + $0x276] sm:$0x10]   ;;  %v898_v12 = vsel %vm29_vm6, %v4677_v61, %v894_v6  ;;  %v4705_v32 = vld [vmem:[%s10387_s0 + $0x39] sm:$0x1]  }
  0x44   :  { %v4651_v36 = vld [vmem:[%s10387_s0 + $0x3d4] sm:$0x80]   ;;  %830 = vrot.lane.b32.xlu1 %v829_v43, %s5607_s27  ;;  %v790_v53 = vsel %vm25_vm5, %v4650_v35, %v786_v48  ;;  %v852_v7 = vsel %vm17_vm3, %v4666_v58, %v848_v2  ;;  %v4693_v15 = vld [vmem:[%s10387_s0 + $0x2f5] sm:$0x20]   ;;  %v956_v24 = vsel %vm17_vm3, %v4692_v11, %v952_v19  ;;  %v4709_v39 = vld [vmem:[%s10387_s0 + $0x235] sm:$0x10]  }
  0x45   :  { %726 = vrot.lane.b32.xlu0 %v725_v27, %s5607_s27  ;;  %v794_v59 = vsel %vm29_vm6, %v4651_v36, %v790_v53  ;;  %v856_v13 = vsel %vm21_vm4, %v4667_v63, %v852_v7  ;;  %v4694_v16 = vld [vmem:[%s10387_s0 + $0x374] sm:$0x40]   ;;  %v960_v29 = vsel %vm21_vm4, %v4693_v15, %v956_v24  ;;  %v1013_v36 = vsel %vm5_vm0, %v4706_v33, %v4705_v32  ;;  %v4710_v44 = vld [vmem:[%s10387_s0 + $0x2b4] sm:$0x20]   ;;  %s5633_s13 = smov 4  }
  0x46   :  { %v4679_v17 = vld [vmem:[%s10387_s0 + $0x5a] sm:$0x1]   ;;  %v860_v18 = vsel %vm25_vm5, %v4668_v0, %v856_v13  ;;  %v964_v34 = vsel %vm25_vm5, %v4694_v16, %v960_v29  ;;  %v1017_v43 = vsel %vm9_vm1, %v4707_v37, %v1013_v36  ;;  %v4711_v45 = vld [vmem:[%s10387_s0 + $0x333] sm:$0x40]   ;;  %v4743_v36 = vld [vmem:[%s10387_s0 + $0x1b5] sm:$0x8]  }
  0x47   :  { %v4680_v20 = vld [vmem:[%s10387_s0 + $0xd9] sm:$0x2]   ;;  %v864_v23 = vsel %vm29_vm6, %v4669_v8, %v860_v18  ;;  %v1021_v47 = vsel %vm13_vm2, %v4708_v38, %v1017_v43  ;;  %v4697_v48 = vld [vmem:[%s10387_s0 + $0x19] sm:$0x1]   ;;  %v4744_v37 = vld [vmem:[%s10387_s0 + $0x234] sm:$0x10]  }
  0x48   :  { %899 = vrot.lane.b32.xlu1 %v898_v12, %s5608_s6  ;;  %v4681_v21 = vld [vmem:[%s10387_s0 + $0x158] sm:$0x4]   ;;  %v909_v26 = vsel %vm5_vm0, %v4680_v20, %v4679_v17  ;;  %v4698_v49 = vld [vmem:[%s10387_s0 + $0x98] sm:$0x2]   ;;  %v1025_v52 = vsel %vm17_vm3, %v4709_v39, %v1021_v47  ;;  %v4734_v47 = vld [vmem:[%s10387_s0 + $0x116] sm:$0x4]  }
  0x49   :  { %795 = vrot.lane.b32.xlu0 %v794_v59, %s5607_s27  ;;  %v4682_v22 = vld [vmem:[%s10387_s0 + $0x1d7] sm:$0x8]   ;;  %v913_v30 = vsel %vm9_vm1, %v4681_v21, %v909_v26  ;;  %v4699_v50 = vld [vmem:[%s10387_s0 + $0x117] sm:$0x4]   ;;  %v979_v54 = vsel %vm5_vm0, %v4698_v49, %v4697_v48  ;;  %v1029_v58 = vsel %vm21_vm4, %v4710_v44, %v1025_v52  ;;  %v4735_v52 = vld [vmem:[%s10387_s0 + $0x195] sm:$0x8]  }
  0x4a   :  { %v4695_v25 = vld [vmem:[%s10387_s0 + $0x3f3] sm:$0x80]   ;;  %v917_v35 = vsel %vm13_vm2, %v4682_v22, %v913_v30  ;;  %v4712_v53 = vld [vmem:[%s10387_s0 + $0x3b2] sm:$0x80]   ;;  %v983_v59 = vsel %vm9_vm1, %v4699_v50, %v979_v54  ;;  %v1033_v63 = vsel %vm25_vm5, %v4711_v45, %v1029_v58  ;;  %v4740_v30 = vld [vmem:[%s10387_s0 + $0x38] sm:$0x1]  }
  0x4b   :  { %v4683_v27 = vld [vmem:[%s10387_s0 + $0x256] sm:$0x10]   ;;  %v968_v40 = vsel %vm29_vm6, %v4695_v25, %v964_v34  ;;  %v4700_v55 = vld [vmem:[%s10387_s0 + $0x196] sm:$0x8]   ;;  %v1037_v4 = vsel %vm29_vm6, %v4712_v53, %v1033_v63  ;;  %v4732_v45 = vld [vmem:[%s10387_s0 + $0x18] sm:$0x1]  }
  0x4c   :  { %v4684_v28 = vld [vmem:[%s10387_s0 + $0x2d5] sm:$0x20]   ;;  %v921_v41 = vsel %vm17_vm3, %v4683_v27, %v917_v35  ;;  %969 = vrot.lane.b32.xlu1 %v968_v40, %s5608_s6  ;;  %v4701_v56 = vld [vmem:[%s10387_s0 + $0x215] sm:$0x10]   ;;  %v987_v0 = vsel %vm13_vm2, %v4700_v55, %v983_v59  ;;  %v4742_v35 = vld [vmem:[%s10387_s0 + $0x136] sm:$0x4]  }
  0x4d   :  { %865 = vrot.lane.b32.xlu0 %v864_v23, %s5608_s6  ;;  %v4685_v31 = vld [vmem:[%s10387_s0 + $0x354] sm:$0x40]   ;;  %v925_v46 = vsel %vm21_vm4, %v4684_v28, %v921_v41  ;;  %v4702_v60 = vld [vmem:[%s10387_s0 + $0x294] sm:$0x20]   ;;  %v991_v5 = vsel %vm17_vm3, %v4701_v56, %v987_v0  ;;  %v4745_v41 = vld [vmem:[%s10387_s0 + $0x2b3] sm:$0x20]  }
  0x4e   :  { %v4686_v42 = vld [vmem:[%s10387_s0 + $0x3d3] sm:$0x80]   ;;  %v929_v51 = vsel %vm25_vm5, %v4685_v31, %v925_v46  ;;  %v4703_v61 = vld [vmem:[%s10387_s0 + $0x313] sm:$0x40]   ;;  %v995_v10 = vsel %vm21_vm4, %v4702_v60, %v991_v5  ;;  %v4741_v31 = vld [vmem:[%s10387_s0 + $0xb7] sm:$0x2]  }
  0x4f   :  { %v933_v57 = vsel %vm29_vm6, %v4686_v42, %v929_v51  ;;  %v4723_v62 = vld [vmem:[%s10387_s0 + $0x79] sm:$0x1]   ;;  %v999_v15 = vsel %vm25_vm5, %v4703_v61, %v995_v10  ;;  %v1152_v34 = vsel %vm5_vm0, %v4741_v31, %v4740_v30  ;;  %v4746_v42 = vld [vmem:[%s10387_s0 + $0x332] sm:$0x40]  }
  0x50   :  { %v4724_v1 = vld [vmem:[%s10387_s0 + $0xf8] sm:$0x2]   ;;  %1038 = vrot.lane.b32.xlu1 %v1037_v4, %s5609_s9  ;;  %v1156_v40 = vsel %vm9_vm1, %v4742_v35, %v1152_v34  ;;  %v4733_v46 = vld [vmem:[%s10387_s0 + $0x97] sm:$0x2]  }
  0x51   :  { %934 = vrot.lane.b32.xlu0 %v933_v57, %s5608_s6  ;;  %v4725_v2 = vld [vmem:[%s10387_s0 + $0x177] sm:$0x4]   ;;  %v1083_v7 = vsel %vm5_vm0, %v4724_v1, %v4723_v62  ;;  %v1160_v44 = vsel %vm13_vm2, %v4743_v36, %v1156_v40  ;;  %v4747_v50 = vld [vmem:[%s10387_s0 + $0x3b1] sm:$0x80]   ;;  %v1118_v51 = vsel %vm5_vm0, %v4733_v46, %v4732_v45  ;;  %s5615_s6 = smov 76  }
  0x52   :  { %v4726_v3 = vld [vmem:[%s10387_s0 + $0x1f6] sm:$0x8]   ;;  %v1087_v11 = vsel %vm9_vm1, %v4725_v2, %v1083_v7  ;;  %v1164_v49 = vsel %vm17_vm3, %v4744_v37, %v1160_v44  ;;  %v4736_v53 = vld [vmem:[%s10387_s0 + $0x214] sm:$0x10]   ;;  %v1122_v55 = vsel %vm9_vm1, %v4734_v47, %v1118_v51  ;;  %v4780_v37 = vld [vmem:[%s10387_s0 + $0x2b2] sm:$0x20]  }
  0x53   :  { %v4704_v6 = vld [vmem:[%s10387_s0 + $0x392] sm:$0x80]   ;;  %v1091_v16 = vsel %vm13_vm2, %v4726_v3, %v1087_v11  ;;  %v1168_v54 = vsel %vm21_vm4, %v4745_v41, %v1164_v49  ;;  %v4737_v56 = vld [vmem:[%s10387_s0 + $0x293] sm:$0x20]   ;;  %v1126_v60 = vsel %vm13_vm2, %v4735_v52, %v1122_v55  ;;  %v4770_v44 = vld [vmem:[%s10387_s0 + $0x194] sm:$0x8]  }
  0x54   :  { %v4727_v8 = vld [vmem:[%s10387_s0 + $0x275] sm:$0x10]   ;;  %v1003_v21 = vsel %vm29_vm6, %v4704_v6, %v999_v15  ;;  %v4738_v57 = vld [vmem:[%s10387_s0 + $0x312] sm:$0x40]   ;;  %v1172_v59 = vsel %vm25_vm5, %v4746_v42, %v1168_v54  ;;  %v1130_v1 = vsel %vm17_vm3, %v4736_v53, %v1126_v60  ;;  %v4768_v42 = vld [vmem:[%s10387_s0 + $0x96] sm:$0x2]  }
  0x55   :  { %v4728_v9 = vld [vmem:[%s10387_s0 + $0x2f4] sm:$0x20]   ;;  %v1095_v22 = vsel %vm17_vm3, %v4727_v8, %v1091_v16  ;;  %1004 = vrot.lane.b32.xlu0 %v1003_v21, %s5609_s9  ;;  %v4758_v58 = vld [vmem:[%s10387_s0 + $0x78] sm:$0x1]   ;;  %v1176_v0 = vsel %vm29_vm6, %v4747_v50, %v1172_v59  ;;  %v1134_v6 = vsel %vm21_vm4, %v4737_v56, %v1130_v1  ;;  %v4782_v47 = vld [vmem:[%s10387_s0 + $0x3b0] sm:$0x80]  }
  0x56   :  { %v4729_v12 = vld [vmem:[%s10387_s0 + $0x373] sm:$0x40]   ;;  %v1099_v27 = vsel %vm21_vm4, %v4728_v9, %v1095_v22  ;;  %v4759_v61 = vld [vmem:[%s10387_s0 + $0xf7] sm:$0x2]   ;;  %v1138_v11 = vsel %vm25_vm5, %v4738_v57, %v1134_v6  ;;  %v4771_v49 = vld [vmem:[%s10387_s0 + $0x213] sm:$0x10]  }
  0x57   :  { %v4714_v13 = vld [vmem:[%s10387_s0 + $0x59] sm:$0x1]   ;;  %v1103_v32 = vsel %vm25_vm5, %v4729_v12, %v1099_v27  ;;  %v4760_v62 = vld [vmem:[%s10387_s0 + $0x176] sm:$0x4]   ;;  %v1222_v3 = vsel %vm5_vm0, %v4759_v61, %v4758_v58  ;;  %v4777_v27 = vld [vmem:[%s10387_s0 + $0x135] sm:$0x4]  }
  0x58   :  { %v4715_v14 = vld [vmem:[%s10387_s0 + $0xd8] sm:$0x2]   ;;  %v4761_v63 = vld [vmem:[%s10387_s0 + $0x1f5] sm:$0x8]   ;;  %v1226_v7 = vsel %vm9_vm1, %v4760_v62, %v1222_v3  ;;  %v4772_v50 = vld [vmem:[%s10387_s0 + $0x292] sm:$0x20]  }
  0x59   :  { %v1048_v17 = vsel %vm5_vm0, %v4715_v14, %v4714_v13  ;;  %v4716_v18 = vld [vmem:[%s10387_s0 + $0x157] sm:$0x4]   ;;  %v4739_v2 = vld [vmem:[%s10387_s0 + $0x391] sm:$0x80]   ;;  %v1230_v12 = vsel %vm13_vm2, %v4761_v63, %v1226_v7  ;;  %v4773_v53 = vld [vmem:[%s10387_s0 + $0x311] sm:$0x40]  }
  0x5a   :  { %v4717_v19 = vld [vmem:[%s10387_s0 + $0x1d6] sm:$0x8]   ;;  %v1052_v24 = vsel %vm9_vm1, %v4716_v18, %v1048_v17  ;;  %v4762_v4 = vld [vmem:[%s10387_s0 + $0x274] sm:$0x10]   ;;  %v1142_v17 = vsel %vm29_vm6, %v4739_v2, %v1138_v11  ;;  %v4793_v54 = vld [vmem:[%s10387_s0 + $0x77] sm:$0x1]  }
  0x5b   :  { %v4718_v20 = vld [vmem:[%s10387_s0 + $0x255] sm:$0x10]   ;;  %v1056_v28 = vsel %vm13_vm2, %v4717_v19, %v1052_v24  ;;  %v4763_v5 = vld [vmem:[%s10387_s0 + $0x2f3] sm:$0x20]   ;;  %v1234_v18 = vsel %vm17_vm3, %v4762_v4, %v1230_v12  ;;  %v4794_v55 = vld [vmem:[%s10387_s0 + $0xf6] sm:$0x2]  }
  0x5c   :  { %v4730_v23 = vld [vmem:[%s10387_s0 + $0x3f2] sm:$0x80]   ;;  %v1060_v33 = vsel %vm17_vm3, %v4718_v20, %v1056_v28  ;;  %v4764_v8 = vld [vmem:[%s10387_s0 + $0x372] sm:$0x40]   ;;  %v1361_v58 = vsel %vm5_vm0, %v4794_v55, %v4793_v54  ;;  %v4795_v59 = vld [vmem:[%s10387_s0 + $0x175] sm:$0x4]  }
  0x5d   :  { %v4719_v25 = vld [vmem:[%s10387_s0 + $0x2d4] sm:$0x20]   ;;  %v1107_v38 = vsel %vm29_vm6, %v4730_v23, %v1103_v32  ;;  %v4749_v9 = vld [vmem:[%s10387_s0 + $0x58] sm:$0x1]   ;;  %v1238_v23 = vsel %vm21_vm4, %v4763_v5, %v1234_v18  ;;  %v4778_v32 = vld [vmem:[%s10387_s0 + $0x1b4] sm:$0x8]   ;;  %v1365_v1 = vsel %vm9_vm1, %v4795_v59, %v1361_v58 }
  0x5e   :  { %v4720_v26 = vld [vmem:[%s10387_s0 + $0x353] sm:$0x40]   ;;  %v1064_v39 = vsel %vm21_vm4, %v4719_v25, %v1060_v33  ;;  %1108 = vrot.lane.b32.xlu1 %v1107_v38, %s5609_s9  ;;  %v4750_v10 = vld [vmem:[%s10387_s0 + $0xd7] sm:$0x2]   ;;  %v4775_v25 = vld [vmem:[%s10387_s0 + $0x37] sm:$0x1]   ;;  %v1242_v28 = vsel %vm25_vm5, %v4764_v8, %v1238_v23 }
  0x5f   :  { %v4721_v29 = vld [vmem:[%s10387_s0 + $0x3d2] sm:$0x80]   ;;  %v1068_v43 = vsel %vm25_vm5, %v4720_v26, %v1064_v39  ;;  %v1187_v13 = vsel %vm5_vm0, %v4750_v10, %v4749_v9  ;;  %v4751_v14 = vld [vmem:[%s10387_s0 + $0x156] sm:$0x4]   ;;  %v4776_v26 = vld [vmem:[%s10387_s0 + $0xb6] sm:$0x2]  }
  0x60   :  { %v1072_v48 = vsel %vm29_vm6, %v4721_v29, %v1068_v43  ;;  %v4752_v15 = vld [vmem:[%s10387_s0 + $0x1d5] sm:$0x8]   ;;  %v1191_v20 = vsel %vm9_vm1, %v4751_v14, %v1187_v13  ;;  %v1291_v31 = vsel %vm5_vm0, %v4776_v26, %v4775_v25  ;;  %v4779_v33 = vld [vmem:[%s10387_s0 + $0x233] sm:$0x10]   ;;  %v4810_v23 = vld [vmem:[%s10387_s0 + $0x36] sm:$0x1]  }
  0x61   :  { %1073 = vrot.lane.b32.xlu0 %v1072_v48, %s5609_s9  ;;  %v4753_v16 = vld [vmem:[%s10387_s0 + $0x254] sm:$0x10]   ;;  %v1195_v24 = vsel %vm13_vm2, %v4752_v15, %v1191_v20  ;;  %v1295_v36 = vsel %vm9_vm1, %v4777_v27, %v1291_v31  ;;  %v4781_v38 = vld [vmem:[%s10387_s0 + $0x331] sm:$0x40]   ;;  %v4812_v25 = vld [vmem:[%s10387_s0 + $0x134] sm:$0x4]  }
  0x62   :  { %1177 = vrot.lane.b32.xlu1 %v1176_v0, %s5610_s25  ;;  %v4765_v19 = vld [vmem:[%s10387_s0 + $0x3f1] sm:$0x80]   ;;  %v1199_v29 = vsel %vm17_vm3, %v4753_v16, %v1195_v24  ;;  %v4767_v39 = vld [vmem:[%s10387_s0 + $0x17] sm:$0x1]   ;;  %v1299_v41 = vsel %vm13_vm2, %v4778_v32, %v1295_v36  ;;  %v4811_v24 = vld [vmem:[%s10387_s0 + $0xb5] sm:$0x2]  }
  0x63   :  { %v4754_v21 = vld [vmem:[%s10387_s0 + $0x2d3] sm:$0x20]   ;;  %v1246_v34 = vsel %vm29_vm6, %v4765_v19, %v1242_v28  ;;  %v4769_v43 = vld [vmem:[%s10387_s0 + $0x115] sm:$0x4]   ;;  %v1303_v46 = vsel %vm17_vm3, %v4779_v33, %v1299_v41  ;;  %v1257_v48 = vsel %vm5_vm0, %v4768_v42, %v4767_v39  ;;  %v1430_v28 = vsel %vm5_vm0, %v4811_v24, %v4810_v23  ;;  %v4815_v33 = vld [vmem:[%s10387_s0 + $0x2b1] sm:$0x20]  }
  0x64   :  { %v4755_v22 = vld [vmem:[%s10387_s0 + $0x352] sm:$0x40]   ;;  %v1203_v35 = vsel %vm21_vm4, %v4754_v21, %v1199_v29  ;;  %v1307_v51 = vsel %vm21_vm4, %v4780_v37, %v1303_v46  ;;  %v1261_v52 = vsel %vm9_vm1, %v4769_v43, %v1257_v48  ;;  %v4796_v60 = vld [vmem:[%s10387_s0 + $0x1f4] sm:$0x8]   ;;  %v4813_v29 = vld [vmem:[%s10387_s0 + $0x1b3] sm:$0x8]   ;;  %v1434_v32 = vsel %vm9_vm1, %v4812_v25, %v1430_v28 }
  0x65   :  { %1143 = vrot.lane.b32.xlu0 %v1142_v17, %s5610_s25  ;;  %v4756_v30 = vld [vmem:[%s10387_s0 + $0x3d1] sm:$0x80]   ;;  %v1207_v40 = vsel %vm25_vm5, %v4755_v22, %v1203_v35  ;;  %v1311_v56 = vsel %vm25_vm5, %v4781_v38, %v1307_v51  ;;  %v1265_v57 = vsel %vm13_vm2, %v4770_v44, %v1261_v52  ;;  %v4797_v61 = vld [vmem:[%s10387_s0 + $0x273] sm:$0x10]   ;;  %v1369_v5 = vsel %vm13_vm2, %v4796_v60, %v1365_v1  ;;  %v4802_v35 = vld [vmem:[%s10387_s0 + $0x16] sm:$0x1]  }
  0x66   :  { %1247 = vrot.lane.b32.xlu1 %v1246_v34, %s5610_s25  ;;  %v1211_v45 = vsel %vm29_vm6, %v4756_v30, %v1207_v40  ;;  %v1315_v62 = vsel %vm29_vm6, %v4782_v47, %v1311_v56  ;;  %v1269_v63 = vsel %vm17_vm3, %v4771_v49, %v1265_v57  ;;  %v4774_v0 = vld [vmem:[%s10387_s0 + $0x390] sm:$0x80]   ;;  %v1373_v10 = vsel %vm17_vm3, %v4797_v61, %v1369_v5  ;;  %v4814_v30 = vld [vmem:[%s10387_s0 + $0x232] sm:$0x10]   ;;  %s5621_s9 = smov 52  }
  0x67   :  { %v4798_v2 = vld [vmem:[%s10387_s0 + $0x2f2] sm:$0x20]   ;;  %v1273_v4 = vsel %vm21_vm4, %v4772_v50, %v1269_v63  ;;  %v4816_v34 = vld [vmem:[%s10387_s0 + $0x330] sm:$0x40]   ;;  %v1438_v37 = vsel %vm13_vm2, %v4813_v29, %v1434_v32  ;;  %v4838_v32 = vld [vmem:[%s10387_s0 + $0x94] sm:$0x2]  }
  0x68   :  { %v4799_v3 = vld [vmem:[%s10387_s0 + $0x371] sm:$0x40]   ;;  %v1277_v9 = vsel %vm25_vm5, %v4773_v53, %v1273_v4  ;;  %v1377_v16 = vsel %vm21_vm4, %v4798_v2, %v1373_v10  ;;  %v4803_v38 = vld [vmem:[%s10387_s0 + $0x95] sm:$0x2]   ;;  %v1442_v42 = vsel %vm17_vm3, %v4814_v30, %v1438_v37  ;;  %v4851_v30 = vld [vmem:[%s10387_s0 + $0x32f] sm:$0x40]  }
  0x69   :  { %1212 = vrot.lane.b32.xlu0 %v1211_v45, %s5610_s25  ;;  %v4784_v6 = vld [vmem:[%s10387_s0 + $0x57] sm:$0x1]   ;;  %v1281_v15 = vsel %vm29_vm6, %v4774_v0, %v1277_v9  ;;  %v1381_v21 = vsel %vm25_vm5, %v4799_v3, %v1377_v16  ;;  %v4804_v39 = vld [vmem:[%s10387_s0 + $0x114] sm:$0x4]   ;;  %v1396_v44 = vsel %vm5_vm0, %v4803_v38, %v4802_v35  ;;  %v1446_v47 = vsel %vm21_vm4, %v4815_v33, %v1442_v42  ;;  %v4845_v16 = vld [vmem:[%s10387_s0 + $0x35] sm:$0x1]  }
  0x6a   :  { %1316 = vrot.lane.b32.xlu1 %v1315_v62, %s5611_s26  ;;  %v4785_v7 = vld [vmem:[%s10387_s0 + $0xd6] sm:$0x2]   ;;  %v4805_v40 = vld [vmem:[%s10387_s0 + $0x193] sm:$0x8]   ;;  %v1400_v48 = vsel %vm9_vm1, %v4804_v39, %v1396_v44  ;;  %v1450_v52 = vsel %vm25_vm5, %v4816_v34, %v1446_v47  ;;  %v4840_v37 = vld [vmem:[%s10387_s0 + $0x192] sm:$0x8]  }
  0x6b   :  { %v4786_v8 = vld [vmem:[%s10387_s0 + $0x155] sm:$0x4]   ;;  %v1326_v12 = vsel %vm5_vm0, %v4785_v7, %v4784_v6  ;;  %v4817_v43 = vld [vmem:[%s10387_s0 + $0x3af] sm:$0x80]   ;;  %v1404_v53 = vsel %vm13_vm2, %v4805_v40, %v1400_v48  ;;  %v4841_v38 = vld [vmem:[%s10387_s0 + $0x211] sm:$0x10]  }
  0x6c   :  { %v4800_v11 = vld [vmem:[%s10387_s0 + $0x3f0] sm:$0x80]   ;;  %v1330_v17 = vsel %vm9_vm1, %v4786_v8, %v1326_v12  ;;  %v4806_v45 = vld [vmem:[%s10387_s0 + $0x212] sm:$0x10]   ;;  %v1454_v58 = vsel %vm29_vm6, %v4817_v43, %v1450_v52  ;;  %v4842_v43 = vld [vmem:[%s10387_s0 + $0x290] sm:$0x20]  }
  0x6d   :  { %v4787_v13 = vld [vmem:[%s10387_s0 + $0x1d4] sm:$0x8]   ;;  %1282 = vrot.lane.b32.xlu0 %v1281_v15, %s5611_s26  ;;  %v1385_v26 = vsel %vm29_vm6, %v4800_v11, %v1381_v21  ;;  %v4807_v46 = vld [vmem:[%s10387_s0 + $0x291] sm:$0x20]   ;;  %v1408_v59 = vsel %vm17_vm3, %v4806_v45, %v1404_v53  ;;  %v4848_v21 = vld [vmem:[%s10387_s0 + $0x1b2] sm:$0x8]  }
  0x6e   :  { %v4788_v14 = vld [vmem:[%s10387_s0 + $0x253] sm:$0x10]   ;;  %v1334_v22 = vsel %vm13_vm2, %v4787_v13, %v1330_v17  ;;  %1386 = vrot.lane.b32.xlu1 %v1385_v26, %s5611_s26  ;;  %v4808_v49 = vld [vmem:[%s10387_s0 + $0x310] sm:$0x40]   ;;  %v1412_v0 = vsel %vm21_vm4, %v4807_v46, %v1408_v59  ;;  %v4849_v26 = vld [vmem:[%s10387_s0 + $0x231] sm:$0x10]  }
  0x6f   :  { %v4789_v18 = vld [vmem:[%s10387_s0 + $0x2d2] sm:$0x20]   ;;  %v1338_v27 = vsel %vm17_vm3, %v4788_v14, %v1334_v22  ;;  %v4828_v50 = vld [vmem:[%s10387_s0 + $0x76] sm:$0x1]   ;;  %v1416_v5 = vsel %vm25_vm5, %v4808_v49, %v1412_v0  ;;  %v4843_v44 = vld [vmem:[%s10387_s0 + $0x30f] sm:$0x40]  }
  0x70   :  { %v4790_v19 = vld [vmem:[%s10387_s0 + $0x351] sm:$0x40]   ;;  %v1342_v31 = vsel %vm21_vm4, %v4789_v18, %v1338_v27  ;;  %v4829_v51 = vld [vmem:[%s10387_s0 + $0xf5] sm:$0x2]   ;;  %v4850_v27 = vld [vmem:[%s10387_s0 + $0x2b0] sm:$0x20]  }
  0x71   :  { %v4791_v20 = vld [vmem:[%s10387_s0 + $0x3d0] sm:$0x80]   ;;  %v1346_v36 = vsel %vm25_vm5, %v4790_v19, %v1342_v31  ;;  %v1500_v54 = vsel %vm5_vm0, %v4829_v51, %v4828_v50  ;;  %v4830_v55 = vld [vmem:[%s10387_s0 + $0x174] sm:$0x4]   ;;  %v4846_v19 = vld [vmem:[%s10387_s0 + $0xb4] sm:$0x2]  }
  0x72   :  { %v1350_v41 = vsel %vm29_vm6, %v4791_v20, %v1346_v36  ;;  %v4831_v56 = vld [vmem:[%s10387_s0 + $0x1f3] sm:$0x8]   ;;  %v1504_v61 = vsel %vm9_vm1, %v4830_v55, %v1500_v54  ;;  %1455 = vrot.lane.b32.xlu1 %v1454_v58, %s5612_s5  ;;  %v4847_v20 = vld [vmem:[%s10387_s0 + $0x133] sm:$0x4]   ;;  %v1569_v25 = vsel %vm5_vm0, %v4846_v19, %v4845_v16  ;;  %v4881_v16 = vld [vmem:[%s10387_s0 + $0xb3] sm:$0x2]  }
  0x73   :  { %1351 = vrot.lane.b32.xlu0 %v1350_v41, %s5611_s26  ;;  %v4832_v57 = vld [vmem:[%s10387_s0 + $0x272] sm:$0x10]   ;;  %v1508_v1 = vsel %vm13_vm2, %v4831_v56, %v1504_v61  ;;  %v1573_v29 = vsel %vm9_vm1, %v4847_v20, %v1569_v25  ;;  %v4837_v31 = vld [vmem:[%s10387_s0 + $0x15] sm:$0x1]   ;;  %s5624_s26 = smov 40   ;;  %s5629_s25 = smov 20  }
  0x74   :  { %v4809_v60 = vld [vmem:[%s10387_s0 + $0x38f] sm:$0x80]   ;;  %v1512_v6 = vsel %vm17_vm3, %v4832_v57, %v1508_v1  ;;  %v1577_v34 = vsel %vm13_vm2, %v4848_v21, %v1573_v29  ;;  %v1535_v35 = vsel %vm5_vm0, %v4838_v32, %v4837_v31  ;;  %v4839_v36 = vld [vmem:[%s10387_s0 + $0x113] sm:$0x4]   ;;  %v4874_v32 = vld [vmem:[%s10387_s0 + $0x112] sm:$0x4]  }
  0x75   :  { %v4833_v62 = vld [vmem:[%s10387_s0 + $0x2f1] sm:$0x20]   ;;  %v1420_v11 = vsel %vm29_vm6, %v4809_v60, %v1416_v5  ;;  %v1581_v40 = vsel %vm17_vm3, %v4849_v26, %v1577_v34  ;;  %v4852_v41 = vld [vmem:[%s10387_s0 + $0x3ae] sm:$0x80]   ;;  %v1539_v42 = vsel %vm9_vm1, %v4839_v36, %v1535_v35  ;;  %v4886_v26 = vld [vmem:[%s10387_s0 + $0x32e] sm:$0x40]  }
  0x76   :  { %v4834_v63 = vld [vmem:[%s10387_s0 + $0x370] sm:$0x40]   ;;  %v1516_v12 = vsel %vm21_vm4, %v4833_v62, %v1512_v6  ;;  %v1585_v45 = vsel %vm21_vm4, %v4850_v27, %v1581_v40  ;;  %v1543_v46 = vsel %vm13_vm2, %v4840_v37, %v1539_v42  ;;  %v4863_v47 = vld [vmem:[%s10387_s0 + $0x75] sm:$0x1]   ;;  %v4872_v27 = vld [vmem:[%s10387_s0 + $0x14] sm:$0x1]  }
  0x77   :  { %v4819_v2 = vld [vmem:[%s10387_s0 + $0x56] sm:$0x1]   ;;  %1421 = vrot.lane.b32.xlu0 %v1420_v11, %s5612_s5  ;;  %v1520_v17 = vsel %vm25_vm5, %v4834_v63, %v1516_v12  ;;  %v4864_v48 = vld [vmem:[%s10387_s0 + $0xf4] sm:$0x2]   ;;  %v1589_v50 = vsel %vm25_vm5, %v4851_v30, %v1585_v45  ;;  %v1547_v51 = vsel %vm17_vm3, %v4841_v38, %v1543_v46  ;;  %v4876_v34 = vld [vmem:[%s10387_s0 + $0x210] sm:$0x10]  }
  0x78   :  { %v4820_v3 = vld [vmem:[%s10387_s0 + $0xd5] sm:$0x2]   ;;  %v4865_v49 = vld [vmem:[%s10387_s0 + $0x173] sm:$0x4]   ;;  %v1639_v53 = vsel %vm5_vm0, %v4864_v48, %v4863_v47  ;;  %v1593_v56 = vsel %vm29_vm6, %v4852_v41, %v1589_v50  ;;  %v1551_v57 = vsel %vm21_vm4, %v4842_v43, %v1547_v51  ;;  %v4887_v38 = vld [vmem:[%s10387_s0 + $0x3ad] sm:$0x80]  }
  0x79   :  { %v4821_v4 = vld [vmem:[%s10387_s0 + $0x154] sm:$0x4]   ;;  %v1465_v8 = vsel %vm5_vm0, %v4820_v3, %v4819_v2  ;;  %v4844_v52 = vld [vmem:[%s10387_s0 + $0x38e] sm:$0x80]   ;;  %v1643_v58 = vsel %vm9_vm1, %v4865_v49, %v1639_v53  ;;  %v1555_v62 = vsel %vm25_vm5, %v4843_v44, %v1551_v57  ;;  %v4877_v40 = vld [vmem:[%s10387_s0 + $0x28f] sm:$0x20]  }
  0x7a   :  { %v4835_v7 = vld [vmem:[%s10387_s0 + $0x3ef] sm:$0x80]   ;;  %v1469_v13 = vsel %vm9_vm1, %v4821_v4, %v1465_v8  ;;  %v4866_v54 = vld [vmem:[%s10387_s0 + $0x1f2] sm:$0x8]   ;;  %v1559_v3 = vsel %vm29_vm6, %v4844_v52, %v1555_v62  ;;  %v4878_v41 = vld [vmem:[%s10387_s0 + $0x30e] sm:$0x40]  }
  0x7b   :  { %v4822_v9 = vld [vmem:[%s10387_s0 + $0x1d3] sm:$0x8]   ;;  %v1524_v22 = vsel %vm29_vm6, %v4835_v7, %v1520_v17  ;;  %v4867_v55 = vld [vmem:[%s10387_s0 + $0x271] sm:$0x10]   ;;  %v1647_v63 = vsel %vm13_vm2, %v4866_v54, %v1643_v58  ;;  %v4882_v17 = vld [vmem:[%s10387_s0 + $0x132] sm:$0x4]  }
  0x7c   :  { %v4823_v10 = vld [vmem:[%s10387_s0 + $0x252] sm:$0x10]   ;;  %v1473_v18 = vsel %vm13_vm2, %v4822_v9, %v1469_v13  ;;  %1525 = vrot.lane.b32.xlu1 %v1524_v22, %s5612_s5  ;;  %v4868_v59 = vld [vmem:[%s10387_s0 + $0x2f0] sm:$0x20]   ;;  %v1651_v4 = vsel %vm17_vm3, %v4867_v55, %v1647_v63  ;;  %v4880_v13 = vld [vmem:[%s10387_s0 + $0x34] sm:$0x1]  }
  0x7d   :  { %v4824_v14 = vld [vmem:[%s10387_s0 + $0x2d1] sm:$0x20]   ;;  %v1477_v23 = vsel %vm17_vm3, %v4823_v10, %v1473_v18  ;;  %v4869_v60 = vld [vmem:[%s10387_s0 + $0x36f] sm:$0x40]   ;;  %v1655_v9 = vsel %vm21_vm4, %v4868_v59, %v1651_v4  ;;  %v4883_v18 = vld [vmem:[%s10387_s0 + $0x1b1] sm:$0x8]   ;;  %v1708_v21 = vsel %vm5_vm0, %v4881_v16, %v4880_v13 }
  0x7e   :  { %v4825_v15 = vld [vmem:[%s10387_s0 + $0x350] sm:$0x40]   ;;  %v1481_v28 = vsel %vm21_vm4, %v4824_v14, %v1477_v23  ;;  %v4854_v61 = vld [vmem:[%s10387_s0 + $0x55] sm:$0x1]   ;;  %v1659_v14 = vsel %vm25_vm5, %v4869_v60, %v1655_v9  ;;  %v4884_v22 = vld [vmem:[%s10387_s0 + $0x230] sm:$0x10]   ;;  %v1712_v25 = vsel %vm9_vm1, %v4882_v17, %v1708_v21 }
  0x7f   :  { %v4826_v24 = vld [vmem:[%s10387_s0 + $0x3cf] sm:$0x80]   ;;  %v1485_v33 = vsel %vm25_vm5, %v4825_v15, %v1481_v28  ;;  %v4855_v0 = vld [vmem:[%s10387_s0 + $0xd4] sm:$0x2]   ;;  %v4885_v23 = vld [vmem:[%s10387_s0 + $0x2af] sm:$0x20]   ;;  %v1716_v30 = vsel %vm13_vm2, %v4883_v18, %v1712_v25 }
  0x80   :  { %v1489_v39 = vsel %vm29_vm6, %v4826_v24, %v1485_v33  ;;  %1594 = vrot.lane.b32.xlu1 %v1593_v56, %s5613_s16  ;;  %v4856_v1 = vld [vmem:[%s10387_s0 + $0x153] sm:$0x4]   ;;  %v1604_v6 = vsel %vm5_vm0, %v4855_v0, %v4854_v61  ;;  %v4873_v28 = vld [vmem:[%s10387_s0 + $0x93] sm:$0x2]   ;;  %v1720_v37 = vsel %vm17_vm3, %v4884_v22, %v1716_v30  ;;  %v4917_v16 = vld [vmem:[%s10387_s0 + $0x131] sm:$0x4]  }
  0x81   :  { %1490 = vrot.lane.b32.xlu0 %v1489_v39, %s5612_s5  ;;  %v4857_v2 = vld [vmem:[%s10387_s0 + $0x1d2] sm:$0x8]   ;;  %v1608_v10 = vsel %vm9_vm1, %v4856_v1, %v1604_v6  ;;  %v1674_v31 = vsel %vm5_vm0, %v4873_v28, %v4872_v27  ;;  %v4875_v33 = vld [vmem:[%s10387_s0 + $0x191] sm:$0x8]   ;;  %v7090_v35 = vpop.permute.xlu1 %239   ;;  %v1724_v42 = vsel %vm21_vm4, %v4885_v23, %v1720_v37  ;;  %v4918_v17 = vld [vmem:[%s10387_s0 + $0x1b0] sm:$0x8]  }
  0x82   :  { %v4870_v5 = vld [vmem:[%s10387_s0 + $0x3ee] sm:$0x80]   ;;  %v1612_v15 = vsel %vm13_vm2, %v4857_v2, %v1608_v10  ;;  %v1678_v39 = vsel %vm9_vm1, %v4874_v32, %v1674_v31  ;;  %v4898_v44 = vld [vmem:[%s10387_s0 + $0x74] sm:$0x1]   ;;  %v1728_v48 = vsel %vm25_vm5, %v4886_v26, %v1724_v42  ;;  %v4919_v18 = vld [vmem:[%s10387_s0 + $0x22f] sm:$0x10]  }
  0x83   :  { %v4858_v7 = vld [vmem:[%s10387_s0 + $0x251] sm:$0x10]   ;;  %v1663_v19 = vsel %vm29_vm6, %v4870_v5, %v1659_v14  ;;  %v1682_v43 = vsel %vm13_vm2, %v4875_v33, %v1678_v39  ;;  %v4899_v45 = vld [vmem:[%s10387_s0 + $0xf3] sm:$0x2]   ;;  %v1732_v54 = vsel %vm29_vm6, %v4887_v38, %v1728_v48  ;;  %v4921_v25 = vld [vmem:[%s10387_s0 + $0x32d] sm:$0x40]  }
  0x84   :  { %v4859_v8 = vld [vmem:[%s10387_s0 + $0x2d0] sm:$0x20]   ;;  %v1616_v20 = vsel %vm17_vm3, %v4858_v7, %v1612_v15  ;;  %1664 = vrot.lane.b32.xlu1 %v1663_v19, %s5613_s16  ;;  %v4900_v46 = vld [vmem:[%s10387_s0 + $0x172] sm:$0x4]   ;;  %v1686_v49 = vsel %vm17_vm3, %v4876_v34, %v1682_v43  ;;  %v1778_v51 = vsel %vm5_vm0, %v4899_v45, %v4898_v44  ;;  %v4907_v28 = vld [vmem:[%s10387_s0 + $0x13] sm:$0x1]  }
  0x85   :  { %1560 = vrot.lane.b32.xlu0 %v1559_v3, %s5613_s16  ;;  %v4860_v11 = vld [vmem:[%s10387_s0 + $0x34f] sm:$0x40]   ;;  %v1620_v24 = vsel %vm21_vm4, %v4859_v8, %v1616_v20  ;;  %v4879_v50 = vld [vmem:[%s10387_s0 + $0x38d] sm:$0x80]   ;;  %v1690_v55 = vsel %vm21_vm4, %v4877_v40, %v1686_v49  ;;  %v1782_v56 = vsel %vm9_vm1, %v4900_v46, %v1778_v51  ;;  %v4909_v30 = vld [vmem:[%s10387_s0 + $0x111] sm:$0x4]  }
  0x86   :  { %v4861_v12 = vld [vmem:[%s10387_s0 + $0x3ce] sm:$0x80]   ;;  %v1624_v29 = vsel %vm25_vm5, %v4860_v11, %v1620_v24  ;;  %v4901_v52 = vld [vmem:[%s10387_s0 + $0x1f1] sm:$0x8]   ;;  %v1694_v60 = vsel %vm25_vm5, %v4878_v41, %v1690_v55  ;;  %v4915_v11 = vld [vmem:[%s10387_s0 + $0x33] sm:$0x1]  }
  0x87   :  { %v1628_v36 = vsel %vm29_vm6, %v4861_v12, %v1624_v29  ;;  %v7116_v47 = vpop.permute.xlu0 %170   ;;  %v4902_v53 = vld [vmem:[%s10387_s0 + $0x270] sm:$0x10]   ;;  %v1786_v61 = vsel %vm13_vm2, %v4901_v52, %v1782_v56  ;;  %v1698_v2 = vsel %vm29_vm6, %v4879_v50, %v1694_v60  ;;  %v4916_v12 = vld [vmem:[%s10387_s0 + $0xb2] sm:$0x2]  }
  0x88   :  { %v4903_v57 = vld [vmem:[%s10387_s0 + $0x2ef] sm:$0x20]   ;;  %1733 = vrot.lane.b32.xlu1 %v1732_v54, %s5614_s22  ;;  %v1790_v3 = vsel %vm17_vm3, %v4902_v53, %v1786_v61  ;;  %v1847_v15 = vsel %vm5_vm0, %v4916_v12, %v4915_v11  ;;  %v4920_v24 = vld [vmem:[%s10387_s0 + $0x2ae] sm:$0x20]  }
  0x89   :  { %1629 = vrot.lane.b32.xlu0 %v1628_v36, %s5613_s16  ;;  %v4904_v58 = vld [vmem:[%s10387_s0 + $0x36e] sm:$0x40]   ;;  %v1794_v8 = vsel %vm21_vm4, %v4903_v57, %v1790_v3  ;;  %v1851_v23 = vsel %vm9_vm1, %v4917_v16, %v1847_v15  ;;  %v4908_v29 = vld [vmem:[%s10387_s0 + $0x92] sm:$0x2]   ;;  %v4950_v16 = vld [vmem:[%s10387_s0 + $0x32] sm:$0x1]  }
  0x8a   :  { %v4889_v59 = vld [vmem:[%s10387_s0 + $0x54] sm:$0x1]   ;;  %v1798_v13 = vsel %vm25_vm5, %v4904_v58, %v1794_v8  ;;  %v1855_v27 = vsel %vm13_vm2, %v4918_v17, %v1851_v23  ;;  %v4922_v34 = vld [vmem:[%s10387_s0 + $0x3ac] sm:$0x80]   ;;  %v1813_v36 = vsel %vm5_vm0, %v4908_v29, %v4907_v28  ;;  %v4951_v17 = vld [vmem:[%s10387_s0 + $0xb1] sm:$0x2]  }
  0x8b   :  { %v4890_v62 = vld [vmem:[%s10387_s0 + $0xd3] sm:$0x2]   ;;  %v1859_v33 = vsel %vm17_vm3, %v4919_v18, %v1855_v27  ;;  %v4910_v37 = vld [vmem:[%s10387_s0 + $0x190] sm:$0x8]   ;;  %v1817_v41 = vsel %vm9_vm1, %v4909_v30, %v1813_v36  ;;  %v4952_v23 = vld [vmem:[%s10387_s0 + $0x130] sm:$0x4]  }
  0x8c   :  { %v4891_v63 = vld [vmem:[%s10387_s0 + $0x152] sm:$0x4]   ;;  %v1743_v5 = vsel %vm5_vm0, %v4890_v62, %v4889_v59  ;;  %v4911_v38 = vld [vmem:[%s10387_s0 + $0x20f] sm:$0x10]   ;;  %v1863_v40 = vsel %vm21_vm4, %v4920_v24, %v1859_v33  ;;  %v1821_v46 = vsel %vm13_vm2, %v4910_v37, %v1817_v41  ;;  %v4953_v24 = vld [vmem:[%s10387_s0 + $0x1af] sm:$0x8]  }
  0x8d   :  { %v4892_v0 = vld [vmem:[%s10387_s0 + $0x1d1] sm:$0x8]   ;;  %1699 = vrot.lane.b32.xlu0 %v1698_v2, %s5614_s22  ;;  %v1747_v9 = vsel %vm9_vm1, %v4891_v63, %v1743_v5  ;;  %v4912_v42 = vld [vmem:[%s10387_s0 + $0x28e] sm:$0x20]   ;;  %v1867_v45 = vsel %vm25_vm5, %v4921_v25, %v1863_v40  ;;  %v1825_v53 = vsel %vm17_vm3, %v4911_v38, %v1821_v46  ;;  %v4954_v25 = vld [vmem:[%s10387_s0 + $0x22e] sm:$0x10]  }
  0x8e   :  { %v4905_v4 = vld [vmem:[%s10387_s0 + $0x3ed] sm:$0x80]   ;;  %v1751_v14 = vsel %vm13_vm2, %v4892_v0, %v1747_v9  ;;  %v4913_v43 = vld [vmem:[%s10387_s0 + $0x30d] sm:$0x40]   ;;  %v1871_v52 = vsel %vm29_vm6, %v4922_v34, %v1867_v45  ;;  %v1829_v58 = vsel %vm21_vm4, %v4912_v42, %v1825_v53  ;;  %v4955_v29 = vld [vmem:[%s10387_s0 + $0x2ad] sm:$0x20]  }
  0x8f   :  { %v4893_v6 = vld [vmem:[%s10387_s0 + $0x250] sm:$0x10]   ;;  %v1802_v20 = vsel %vm29_vm6, %v4905_v4, %v1798_v13  ;;  %v4933_v44 = vld [vmem:[%s10387_s0 + $0x73] sm:$0x1]   ;;  %v1833_v63 = vsel %vm25_vm5, %v4913_v43, %v1829_v58  ;;  %v4956_v30 = vld [vmem:[%s10387_s0 + $0x32c] sm:$0x40]  }
  0x90   :  { %v7154_v1 = vpop.permute.xlu1 %274   ;;  %v4894_v7 = vld [vmem:[%s10387_s0 + $0x2cf] sm:$0x20]   ;;  %v1755_v21 = vsel %vm17_vm3, %v4893_v6, %v1751_v14  ;;  %1803 = vrot.lane.b32.xlu1 %v1802_v20, %s5614_s22  ;;  %v4934_v48 = vld [vmem:[%s10387_s0 + $0xf2] sm:$0x2]   ;;  %v4942_v34 = vld [vmem:[%s10387_s0 + $0x12] sm:$0x1]  }
  0x91   :  { %v4895_v10 = vld [vmem:[%s10387_s0 + $0x34e] sm:$0x40]   ;;  %v1759_v26 = vsel %vm21_vm4, %v4894_v7, %v1755_v21  ;;  %v4935_v49 = vld [vmem:[%s10387_s0 + $0x171] sm:$0x4]   ;;  %v1917_v55 = vsel %vm5_vm0, %v4934_v48, %v4933_v44  ;;  %v4943_v36 = vld [vmem:[%s10387_s0 + $0x91] sm:$0x2]  }
  0x92   :  { %v4896_v22 = vld [vmem:[%s10387_s0 + $0x3cd] sm:$0x80]   ;;  %v1763_v32 = vsel %vm25_vm5, %v4895_v10, %v1759_v26  ;;  %v4936_v50 = vld [vmem:[%s10387_s0 + $0x1f0] sm:$0x8]   ;;  %v1921_v59 = vsel %vm9_vm1, %v4935_v49, %v1917_v55  ;;  %v4944_v37 = vld [vmem:[%s10387_s0 + $0x110] sm:$0x4]   ;;  %v1952_v42 = vsel %vm5_vm0, %v4943_v36, %v4942_v34 }
  0x93   :  { %v1767_v39 = vsel %vm29_vm6, %v4896_v22, %v1763_v32  ;;  %v4914_v54 = vld [vmem:[%s10387_s0 + $0x38c] sm:$0x80]   ;;  %v1925_v0 = vsel %vm13_vm2, %v4936_v50, %v1921_v59  ;;  %v1986_v22 = vsel %vm5_vm0, %v4951_v17, %v4950_v16  ;;  %v4957_v41 = vld [vmem:[%s10387_s0 + $0x3ab] sm:$0x80]   ;;  %v1956_v46 = vsel %vm9_vm1, %v4944_v37, %v1952_v42  ;;  %v4989_v34 = vld [vmem:[%s10387_s0 + $0x22d] sm:$0x10]  }
  0x94   :  { %v7192_v19 = vpop.permute.xlu0 %204   ;;  %v7218_v31 = vpop.permute.xlu1 %343   ;;  %1768 = vrot.lane.b32.xlu0 %v1767_v39, %s5614_s22  ;;  %v4937_v56 = vld [vmem:[%s10387_s0 + $0x26f] sm:$0x10]   ;;  %1872 = vrot.lane.b32.xlu1 %v1871_v52, %s5615_s6  ;;  %v1837_v7 = vsel %vm29_vm6, %v4914_v54, %v1833_v63  ;;  %v1990_v28 = vsel %vm9_vm1, %v4952_v23, %v1986_v22  ;;  %v4945_v43 = vld [vmem:[%s10387_s0 + $0x18f] sm:$0x8]  }
  0x95   :  { %v4938_v57 = vld [vmem:[%s10387_s0 + $0x2ee] sm:$0x20]   ;;  %v1929_v8 = vsel %vm17_vm3, %v4937_v56, %v1925_v0  ;;  %v1994_v33 = vsel %vm13_vm2, %v4953_v24, %v1990_v28  ;;  %v4946_v44 = vld [vmem:[%s10387_s0 + $0x20e] sm:$0x10]   ;;  %v1960_v53 = vsel %vm13_vm2, %v4945_v43, %v1956_v46  ;;  %v4985_v24 = vld [vmem:[%s10387_s0 + $0x31] sm:$0x1]  }
  0x96   :  { %v4939_v60 = vld [vmem:[%s10387_s0 + $0x36d] sm:$0x40]   ;;  %v1933_v13 = vsel %vm21_vm4, %v4938_v57, %v1929_v8  ;;  %v1998_v40 = vsel %vm17_vm3, %v4954_v25, %v1994_v33  ;;  %v4947_v48 = vld [vmem:[%s10387_s0 + $0x28d] sm:$0x20]   ;;  %v1964_v59 = vsel %vm17_vm3, %v4946_v44, %v1960_v53  ;;  %v4986_v25 = vld [vmem:[%s10387_s0 + $0xb0] sm:$0x2]  }
  0x97   :  { %v4924_v61 = vld [vmem:[%s10387_s0 + $0x53] sm:$0x1]   ;;  %v1937_v20 = vsel %vm25_vm5, %v4939_v60, %v1933_v13  ;;  %v2002_v45 = vsel %vm21_vm4, %v4955_v29, %v1998_v40  ;;  %v4948_v49 = vld [vmem:[%s10387_s0 + $0x30c] sm:$0x40]   ;;  %v1968_v0 = vsel %vm21_vm4, %v4947_v48, %v1964_v59  ;;  %v4988_v33 = vld [vmem:[%s10387_s0 + $0x1ae] sm:$0x8]  }
  0x98   :  { %v7256_v51 = vpop.permute.xlu0 %309   ;;  %v4925_v62 = vld [vmem:[%s10387_s0 + $0xd2] sm:$0x2]   ;;  %v7294_v6 = vpop.permute.xlu1 %413   ;;  %1838 = vrot.lane.b32.xlu0 %v1837_v7, %s5615_s6  ;;  %v4968_v50 = vld [vmem:[%s10387_s0 + $0x72] sm:$0x1]   ;;  %v2006_v52 = vsel %vm25_vm5, %v4956_v30, %v2002_v45  ;;  %v1972_v8 = vsel %vm25_vm5, %v4948_v49, %v1968_v0  ;;  %v4990_v40 = vld [vmem:[%s10387_s0 + $0x2ac] sm:$0x20]  }
  0x99   :  { %v1882_v2 = vsel %vm5_vm0, %v4925_v62, %v4924_v61  ;;  %v4926_v3 = vld [vmem:[%s10387_s0 + $0x151] sm:$0x4]   ;;  %v4969_v54 = vld [vmem:[%s10387_s0 + $0xf1] sm:$0x2]   ;;  %v2010_v58 = vsel %vm29_vm6, %v4957_v41, %v2006_v52  ;;  %v4991_v41 = vld [vmem:[%s10387_s0 + $0x32b] sm:$0x40]  }
  0x9a   :  { %v4927_v4 = vld [vmem:[%s10387_s0 + $0x1d0] sm:$0x8]   ;;  %v1886_v10 = vsel %vm9_vm1, %v4926_v3, %v1882_v2  ;;  %v4970_v55 = vld [vmem:[%s10387_s0 + $0x170] sm:$0x4]   ;;  %v2056_v61 = vsel %vm5_vm0, %v4969_v54, %v4968_v50  ;;  %v4977_v42 = vld [vmem:[%s10387_s0 + $0x11] sm:$0x1]  }
  0x9b   :  { %v4928_v5 = vld [vmem:[%s10387_s0 + $0x24f] sm:$0x10]   ;;  %v1890_v14 = vsel %vm13_vm2, %v4927_v4, %v1886_v10  ;;  %v4971_v56 = vld [vmem:[%s10387_s0 + $0x1ef] sm:$0x8]   ;;  %v2060_v2 = vsel %vm9_vm1, %v4970_v55, %v2056_v61  ;;  %v4978_v45 = vld [vmem:[%s10387_s0 + $0x90] sm:$0x2]  }
  0x9c   :  { %v4940_v9 = vld [vmem:[%s10387_s0 + $0x3ec] sm:$0x80]   ;;  %v7320_v18 = vpop.permute.xlu0 %378   ;;  %v1894_v21 = vsel %vm17_vm3, %v4928_v5, %v1890_v14  ;;  %v7355_v38 = vpop.permute.xlu1 %482   ;;  %v4949_v60 = vld [vmem:[%s10387_s0 + $0x38b] sm:$0x80]   ;;  %v4979_v46 = vld [vmem:[%s10387_s0 + $0x10f] sm:$0x4]   ;;  %v2091_v54 = vsel %vm5_vm0, %v4978_v45, %v4977_v42 }
  0x9d   :  { %v4929_v11 = vld [vmem:[%s10387_s0 + $0x2ce] sm:$0x20]   ;;  %v1941_v26 = vsel %vm29_vm6, %v4940_v9, %v1937_v20  ;;  %v4972_v62 = vld [vmem:[%s10387_s0 + $0x26e] sm:$0x10]   ;;  %v2064_v9 = vsel %vm13_vm2, %v4971_v56, %v2060_v2  ;;  %v1976_v14 = vsel %vm29_vm6, %v4949_v60, %v1972_v8  ;;  %v4980_v48 = vld [vmem:[%s10387_s0 + $0x18e] sm:$0x8]   ;;  %v2095_v59 = vsel %vm9_vm1, %v4979_v46, %v2091_v54 }
  0x9e   :  { %v4930_v12 = vld [vmem:[%s10387_s0 + $0x34d] sm:$0x40]   ;;  %v1898_v27 = vsel %vm21_vm4, %v4929_v11, %v1894_v21  ;;  %1942 = vrot.lane.b32.xlu1 %v1941_v26, %s5615_s6  ;;  %v4973_v63 = vld [vmem:[%s10387_s0 + $0x2ed] sm:$0x20]   ;;  %v4987_v26 = vld [vmem:[%s10387_s0 + $0x12f] sm:$0x4]   ;;  %v2099_v0 = vsel %vm13_vm2, %v4980_v48, %v2095_v59 }
  0x9f   :  { %v4931_v15 = vld [vmem:[%s10387_s0 + $0x3cc] sm:$0x80]   ;;  %v1902_v32 = vsel %vm25_vm5, %v4930_v12, %v1898_v27  ;;  %v4974_v3 = vld [vmem:[%s10387_s0 + $0x36c] sm:$0x40]   ;;  %v4992_v53 = vld [vmem:[%s10387_s0 + $0x3aa] sm:$0x80]  }
  0xa0   :  { %v1906_v39 = vsel %vm29_vm6, %v4931_v15, %v1902_v32  ;;  %v7392_v57 = vpop.permute.xlu0 %448   ;;  %v4959_v4 = vld [vmem:[%s10387_s0 + $0x52] sm:$0x1]   ;;  %v7418_v7 = vpop.permute.xlu1 %552   ;;  %v2068_v15 = vsel %vm17_vm3, %v4972_v62, %v2064_v9  ;;  %v2125_v32 = vsel %vm5_vm0, %v4986_v25, %v4985_v24  ;;  %v4981_v55 = vld [vmem:[%s10387_s0 + $0x20d] sm:$0x10]   ;;  %v5021_v42 = vld [vmem:[%s10387_s0 + $0xaf] sm:$0x2]  }
  0xa1   :  { %1907 = vrot.lane.b32.xlu0 %v1906_v39, %s5615_s6  ;;  %v4960_v5 = vld [vmem:[%s10387_s0 + $0xd1] sm:$0x2]   ;;  %v2072_v22 = vsel %vm21_vm4, %v4973_v63, %v2068_v15  ;;  %v2129_v39 = vsel %vm9_vm1, %v4987_v26, %v2125_v32  ;;  %v4982_v56 = vld [vmem:[%s10387_s0 + $0x28c] sm:$0x20]  }
  0xa2   :  { %2011 = vrot.lane.b32.xlu1 %v2010_v58, %s5616_s4  ;;  %v2021_v10 = vsel %vm5_vm0, %v4960_v5, %v4959_v4  ;;  %v4961_v11 = vld [vmem:[%s10387_s0 + $0x150] sm:$0x4]   ;;  %v2076_v28 = vsel %vm25_vm5, %v4974_v3, %v2072_v22  ;;  %v2133_v44 = vsel %vm13_vm2, %v4988_v33, %v2129_v39  ;;  %v4983_v60 = vld [vmem:[%s10387_s0 + $0x30b] sm:$0x40]  }
  0xa3   :  { %v4962_v12 = vld [vmem:[%s10387_s0 + $0x1cf] sm:$0x8]   ;;  %v2025_v17 = vsel %vm9_vm1, %v4961_v11, %v2021_v10  ;;  %v2137_v52 = vsel %vm17_vm3, %v4989_v34, %v2133_v44  ;;  %v5003_v61 = vld [vmem:[%s10387_s0 + $0x71] sm:$0x1]   ;;  %v2103_v10 = vsel %vm17_vm3, %v4981_v55, %v2099_v0  ;;  %v5025_v55 = vld [vmem:[%s10387_s0 + $0x2ab] sm:$0x20]  }
  0xa4   :  { %v4963_v13 = vld [vmem:[%s10387_s0 + $0x24e] sm:$0x10]   ;;  %v2029_v23 = vsel %vm13_vm2, %v4962_v12, %v2025_v17  ;;  %v7456_v27 = vpop.permute.xlu0 %517   ;;  %v7494_v49 = vpop.permute.xlu1 %621   ;;  %v2141_v58 = vsel %vm21_vm4, %v4990_v40, %v2137_v52  ;;  %v5004_v62 = vld [vmem:[%s10387_s0 + $0xf0] sm:$0x2]   ;;  %v2107_v15 = vsel %vm21_vm4, %v4982_v56, %v2103_v10  ;;  %v5024_v52 = vld [vmem:[%s10387_s0 + $0x22c] sm:$0x10]  }
  0xa5   :  { %v4975_v16 = vld [vmem:[%s10387_s0 + $0x3eb] sm:$0x80]   ;;  %1977 = vrot.lane.b32.xlu0 %v1976_v14, %s5616_s4  ;;  %v2033_v29 = vsel %vm17_vm3, %v4963_v13, %v2029_v23  ;;  %v2145_v63 = vsel %vm25_vm5, %v4991_v41, %v2141_v58  ;;  %v2195_v2 = vsel %vm5_vm0, %v5004_v62, %v5003_v61  ;;  %v5005_v3 = vld [vmem:[%s10387_s0 + $0x16f] sm:$0x4]   ;;  %v2111_v23 = vsel %vm25_vm5, %v4983_v60, %v2107_v15  ;;  %v5020_v41 = vld [vmem:[%s10387_s0 + $0x30] sm:$0x1]  }
  0xa6   :  { %v4964_v20 = vld [vmem:[%s10387_s0 + $0x2cd] sm:$0x20]   ;;  %v2080_v36 = vsel %vm29_vm6, %v4975_v16, %v2076_v28  ;;  %v5006_v4 = vld [vmem:[%s10387_s0 + $0x1ee] sm:$0x8]   ;;  %v2149_v9 = vsel %vm29_vm6, %v4992_v53, %v2145_v63  ;;  %v2199_v12 = vsel %vm9_vm1, %v5005_v3, %v2195_v2  ;;  %v2264_v48 = vsel %vm5_vm0, %v5021_v42, %v5020_v41  ;;  %v5026_v56 = vld [vmem:[%s10387_s0 + $0x32a] sm:$0x40]  }
  0xa7   :  { %v4965_v21 = vld [vmem:[%s10387_s0 + $0x34c] sm:$0x40]   ;;  %v2037_v37 = vsel %vm21_vm4, %v4964_v20, %v2033_v29  ;;  %2081 = vrot.lane.b32.xlu1 %v2080_v36, %s5616_s4  ;;  %v5007_v5 = vld [vmem:[%s10387_s0 + $0x26d] sm:$0x10]   ;;  %v2203_v16 = vsel %vm13_vm2, %v5006_v4, %v2199_v12  ;;  %v5012_v58 = vld [vmem:[%s10387_s0 + $0x10] sm:$0x1]  }
  0xa8   :  { %v4966_v30 = vld [vmem:[%s10387_s0 + $0x3cb] sm:$0x80]   ;;  %v2041_v43 = vsel %vm25_vm5, %v4965_v21, %v2037_v37  ;;  %v7532_v8 = vpop.permute.xlu0 %587   ;;  %v4984_v11 = vld [vmem:[%s10387_s0 + $0x38a] sm:$0x80]   ;;  %v2207_v24 = vsel %vm17_vm3, %v5007_v5, %v2203_v16  ;;  %v5013_v61 = vld [vmem:[%s10387_s0 + $0x8f] sm:$0x2]  }
  0xa9   :  { %v2045_v50 = vsel %vm29_vm6, %v4966_v30, %v2041_v43  ;;  %v5008_v13 = vld [vmem:[%s10387_s0 + $0x2ec] sm:$0x20]   ;;  %v2115_v30 = vsel %vm29_vm6, %v4984_v11, %v2111_v23  ;;  %v5022_v43 = vld [vmem:[%s10387_s0 + $0x12e] sm:$0x4]   ;;  %v2230_v5 = vsel %vm5_vm0, %v5013_v61, %v5012_v58  ;;  %v2_v15 = vld [vmem:[%s10387_s0] sm:$0x1]  }
  0xaa   :  { %2046 = vrot.lane.b32.xlu0 %v2045_v50, %s5616_s4  ;;  %v5009_v14 = vld [vmem:[%s10387_s0 + $0x36b] sm:$0x40]   ;;  %v2211_v32 = vsel %vm21_vm4, %v5008_v13, %v2207_v24  ;;  %v5023_v50 = vld [vmem:[%s10387_s0 + $0x1ad] sm:$0x8]   ;;  %v2268_v54 = vsel %vm9_vm1, %v5022_v43, %v2264_v48  ;;  %v4450_v23 = vld [vmem:[%s10387_s0 + $0x3e] sm:$0x4]  }
  0xab   :  { %2150 = vrot.lane.b32.xlu1 %v2149_v9, %s5617_s15  ;;  %v4994_v17 = vld [vmem:[%s10387_s0 + $0x51] sm:$0x1]   ;;  %v2215_v39 = vsel %vm25_vm5, %v5009_v14, %v2211_v32  ;;  %v2272_v60 = vsel %vm13_vm2, %v5023_v50, %v2268_v54  ;;  %v5014_v62 = vld [vmem:[%s10387_s0 + $0x10e] sm:$0x4]   ;;  %v4451_v24 = vld [vmem:[%s10387_s0 + $0x5d] sm:$0x8]  }
  0xac   :  { %v4995_v20 = vld [vmem:[%s10387_s0 + $0xd0] sm:$0x2]   ;;  %v5015_v63 = vld [vmem:[%s10387_s0 + $0x18d] sm:$0x8]   ;;  %v2276_v3 = vsel %vm17_vm3, %v5024_v52, %v2272_v60  ;;  %v2234_v12 = vsel %vm9_vm1, %v5014_v62, %v2230_v5  ;;  %v4454_v32 = vld [vmem:[%s10387_s0 + $0xba] sm:$0x40]  }
  0xad   :  { %v4996_v21 = vld [vmem:[%s10387_s0 + $0x14f] sm:$0x4]   ;;  %v2160_v26 = vsel %vm5_vm0, %v4995_v20, %v4994_v17  ;;  %v5027_v4 = vld [vmem:[%s10387_s0 + $0x3a9] sm:$0x80]   ;;  %v2280_v11 = vsel %vm21_vm4, %v5025_v55, %v2276_v3  ;;  %v2238_v20 = vsel %vm13_vm2, %v5015_v63, %v2234_v12  ;;  %v4461_v48 = vld [vmem:[%s10387_s0 + $0x17c] sm:$0x10]  }
  0xae   :  { %v7558_v22 = vpop.permute.xlu1 %691   ;;  %v5010_v25 = vld [vmem:[%s10387_s0 + $0x3ea] sm:$0x80]   ;;  %v2164_v33 = vsel %vm9_vm1, %v4996_v21, %v2160_v26  ;;  %2116 = vrot.lane.b32.xlu0 %v2115_v30, %s5617_s15  ;;  %v5016_v9 = vld [vmem:[%s10387_s0 + $0x20c] sm:$0x10]   ;;  %v2284_v17 = vsel %vm25_vm5, %v5026_v56, %v2280_v11  ;;  %v4449_v21 = vld [vmem:[%s10387_s0 + $0x1f] sm:$0x2]  }
  0xaf   :  { %v4997_v28 = vld [vmem:[%s10387_s0 + $0x1ce] sm:$0x8]   ;;  %v2219_v45 = vsel %vm29_vm6, %v5010_v25, %v2215_v39  ;;  %v5017_v10 = vld [vmem:[%s10387_s0 + $0x28b] sm:$0x20]   ;;  %v2288_v25 = vsel %vm29_vm6, %v5027_v4, %v2284_v17  ;;  %v2242_v26 = vsel %vm17_vm3, %v5016_v9, %v2238_v20  ;;  %v4453_v30 = vld [vmem:[%s10387_s0 + $0x9b] sm:$0x20]  }
  0xb0   :  { %v4998_v29 = vld [vmem:[%s10387_s0 + $0x24d] sm:$0x10]   ;;  %v2168_v40 = vsel %vm13_vm2, %v4997_v28, %v2164_v33  ;;  %2220 = vrot.lane.b32.xlu1 %v2219_v45, %s5617_s15  ;;  %v5018_v13 = vld [vmem:[%s10387_s0 + $0x30a] sm:$0x40]   ;;  %v6_v28 = vsel %vm5_vm0, %v4449_v21, %v2_v15  ;;  %v2246_v33 = vsel %vm21_vm4, %v5017_v10, %v2242_v26  ;;  %v4458_v39 = vld [vmem:[%s10387_s0 + $0x11f] sm:$0x2]  }
  0xb1   :  { %v4999_v34 = vld [vmem:[%s10387_s0 + $0x2cc] sm:$0x20]   ;;  %v2172_v46 = vsel %vm17_vm3, %v4998_v29, %v2168_v40  ;;  %v5019_v14 = vld [vmem:[%s10387_s0 + $0x389] sm:$0x80]   ;;  %v4452_v29 = vld [vmem:[%s10387_s0 + $0x7c] sm:$0x10]   ;;  %v2250_v41 = vsel %vm25_vm5, %v5018_v13, %v2246_v33 }
  0xb2   :  { %v5000_v36 = vld [vmem:[%s10387_s0 + $0x34b] sm:$0x40]   ;;  %v2176_v53 = vsel %vm21_vm4, %v4999_v34, %v2172_v46  ;;  %v7630_v0 = vpop.permute.xlu1 %760   ;;  %v10_v34 = vsel %vm9_vm1, %v4450_v23, %v6_v28  ;;  %v4459_v45 = vld [vmem:[%s10387_s0 + $0x13e] sm:$0x4]   ;;  %v2254_v50 = vsel %vm29_vm6, %v5019_v14, %v2250_v41  ;;  %v5038_v41 = vld [vmem:[%s10387_s0 + $0x70] sm:$0x1]  }
  0xb3   :  { %v5001_v37 = vld [vmem:[%s10387_s0 + $0x3ca] sm:$0x80]   ;;  %v7596_v44 = vpop.permute.xlu0 %656   ;;  %v2180_v59 = vsel %vm25_vm5, %v5000_v36, %v2176_v53  ;;  %v4455_v36 = vld [vmem:[%s10387_s0 + $0xd9] sm:$0x80]   ;;  %v14_v42 = vsel %vm13_vm2, %v4451_v24, %v10_v34  ;;  %s5630_s4 = smov 16  }
  0xb4   :  { %v2184_v2 = vsel %vm29_vm6, %v5001_v37, %v2180_v59  ;;  %2289 = vrot.lane.b32.xlu1 %v2288_v25, %s5618_s21  ;;  %v4457_v37 = vld [vmem:[%s10387_s0 + $0x100] sm:$0x1]   ;;  %v18_v52 = vsel %vm17_vm3, %v4452_v29, %v14_v42  ;;  %v5039_v42 = vld [vmem:[%s10387_s0 + $0xef] sm:$0x2]  }
  0xb5   :  { %2185 = vrot.lane.b32.xlu0 %v2184_v2, %s5617_s15  ;;  %v40_v43 = vsel %vm5_vm0, %v4458_v39, %v4457_v37  ;;  %v4460_v46 = vld [vmem:[%s10387_s0 + $0x15d] sm:$0x8]   ;;  %v22_v58 = vsel %vm21_vm4, %v4453_v30, %v18_v52  ;;  %v5041_v52 = vld [vmem:[%s10387_s0 + $0x1ed] sm:$0x8]   ;;  %s5625_s15 = smov 36  }
  0xb6   :  { %v7693_v40 = vpop.permute.xlu1 %830   ;;  %v44_v53 = vsel %vm9_vm1, %v4459_v45, %v40_v43  ;;  %v4462_v54 = vld [vmem:[%s10387_s0 + $0x19b] sm:$0x20]   ;;  %v26_v2 = vsel %vm25_vm5, %v4454_v32, %v22_v58  ;;  %v5043_v58 = vld [vmem:[%s10387_s0 + $0x2eb] sm:$0x20]  }
  0xb7   :  { %v7656_v16 = vpop.permute.xlu0 %726   ;;  %v4463_v55 = vld [vmem:[%s10387_s0 + $0x1ba] sm:$0x40]   ;;  %v48_v59 = vsel %vm13_vm2, %v4460_v46, %v44_v53  ;;  %v30_v11 = vsel %vm29_vm6, %v4455_v36, %v26_v2  ;;  %v5042_v53 = vld [vmem:[%s10387_s0 + $0x26c] sm:$0x10]  }
  0xb8   :  { %v4464_v56 = vld [vmem:[%s10387_s0 + $0x1d9] sm:$0x80]   ;;  %v52_v3 = vsel %vm17_vm3, %v4461_v48, %v48_v59  ;;  %32 = vst.msk [vmem:[%s10388_s1] ss:$8 sm:$0xf] %vm31_vm7, %v30_v11   ;;  %v2334_v48 = vsel %vm5_vm0, %v5039_v42, %v5038_v41 }
  0xb9   :  { %2255 = vrot.lane.b32.xlu0 %v2254_v50, %s5618_s21  ;;  %v4467_v60 = vld [vmem:[%s10387_s0 + $0x200] sm:$0x1]   ;;  %v56_v12 = vsel %vm21_vm4, %v4462_v54, %v52_v3  ;;  %4456 = vst.msk [vmem:[%s10388_s1 - $0x1f] ss:$8 sm:$0xf0] %vm31_vm7, %v30_v11  }
  0xba   :  { %v4468_v61 = vld [vmem:[%s10387_s0 + $0x21f] sm:$0x2]   ;;  %v60_v20 = vsel %vm25_vm5, %v4463_v55, %v56_v12  ;;  %v7776_v26 = vpop.permute.xlu1 %899   ;;  %v5040_v50 = vld [vmem:[%s10387_s0 + $0x16e] sm:$0x4]   ;;  %v5048_v42 = vld [vmem:[%s10387_s0 + $0x8e] sm:$0x2]  }
  0xbb   :  { %v4469_v62 = vld [vmem:[%s10387_s0 + $0x23e] sm:$0x4]   ;;  %v7731_v63 = vpop.permute.xlu0 %795   ;;  %v75_v4 = vsel %vm5_vm0, %v4468_v61, %v4467_v60  ;;  %v64_v28 = vsel %vm29_vm6, %v4464_v56, %v60_v20  ;;  %v2338_v56 = vsel %vm9_vm1, %v5040_v50, %v2334_v48  ;;  %v5044_v59 = vld [vmem:[%s10387_s0 + $0x36a] sm:$0x40]   ;;  %v5052_v48 = vld [vmem:[%s10387_s0 + $0x28a] sm:$0x20]  }
  0xbc   :  { %v4470_v5 = vld [vmem:[%s10387_s0 + $0x25d] sm:$0x8]   ;;  %v79_v13 = vsel %vm9_vm1, %v4469_v62, %v75_v4  ;;  %4465 = vst.msk [vmem:[%s10388_s1 + $0x2] ss:$8 sm:$0xf] %vm31_vm7, %v64_v28   ;;  %v2342_v62 = vsel %vm13_vm2, %v5041_v52, %v2338_v56 }
  0xbd   :  { %v4471_v9 = vld [vmem:[%s10387_s0 + $0x27c] sm:$0x10]   ;;  %v83_v21 = vsel %vm13_vm2, %v4470_v5, %v79_v13  ;;  %4466 = vst.msk [vmem:[%s10388_s1 - $0x1d] ss:$8 sm:$0xf0] %vm31_vm7, %v64_v28  }
  0xbe   :  { %v4472_v10 = vld [vmem:[%s10387_s0 + $0x29b] sm:$0x20]   ;;  %v87_v29 = vsel %vm17_vm3, %v4471_v9, %v83_v21  ;;  %v5045_v60 = vld [vmem:[%s10387_s0 + $0x3e9] sm:$0x80]   ;;  %v7854_v5 = vpop.permute.xlu1 %969   ;;  %v5055_v28 = vld [vmem:[%s10387_s0 + $0x2f] sm:$0x1]  }
  0xbf   :  { %v4473_v14 = vld [vmem:[%s10387_s0 + $0x2ba] sm:$0x40]   ;;  %v91_v36 = vsel %vm21_vm4, %v4472_v10, %v87_v29  ;;  %v7809_v43 = vpop.permute.xlu0 %865   ;;  %v5029_v2 = vld [vmem:[%s10387_s0 + $0x50] sm:$0x1]   ;;  %v2346_v10 = vsel %vm17_vm3, %v5042_v53, %v2342_v62  ;;  %v5056_v29 = vld [vmem:[%s10387_s0 + $0xae] sm:$0x2]  }
  0xc0   :  { %v4474_v15 = vld [vmem:[%s10387_s0 + $0x2d9] sm:$0x80]   ;;  %v95_v45 = vsel %vm25_vm5, %v4473_v14, %v91_v36  ;;  %v5030_v3 = vld [vmem:[%s10387_s0 + $0xcf] sm:$0x2]   ;;  %v5047_v36 = vld [vmem:[%s10387_s0 + $0xf] sm:$0x1]  }
  0xc1   :  { %v4477_v17 = vld [vmem:[%s10387_s0 + $0x300] sm:$0x1]   ;;  %v99_v54 = vsel %vm29_vm6, %v4474_v15, %v95_v45  ;;  %v5031_v4 = vld [vmem:[%s10387_s0 + $0x14e] sm:$0x4]   ;;  %v2299_v11 = vsel %vm5_vm0, %v5030_v3, %v5029_v2  ;;  %v5049_v45 = vld [vmem:[%s10387_s0 + $0x10d] sm:$0x4]  }
  0xc2   :  { %v4478_v23 = vld [vmem:[%s10387_s0 + $0x31f] sm:$0x2]   ;;  %4475 = vst.msk [vmem:[%s10388_s1 + $0x4] ss:$8 sm:$0xf] %vm31_vm7, %v99_v54   ;;  %v2303_v20 = vsel %vm9_vm1, %v5031_v4, %v2299_v11 }
  0xc3   :  { %v4479_v24 = vld [vmem:[%s10387_s0 + $0x33e] sm:$0x4]   ;;  %v110_v30 = vsel %vm5_vm0, %v4478_v23, %v4477_v17  ;;  %4476 = vst.msk [vmem:[%s10388_s1 - $0x1b] ss:$8 sm:$0xf0] %vm31_vm7, %v99_v54   ;;  %v2350_v17 = vsel %vm21_vm4, %v5043_v58, %v2346_v10 }
  0xc4   :  { %v4480_v25 = vld [vmem:[%s10387_s0 + $0x35d] sm:$0x8]   ;;  %v114_v37 = vsel %vm9_vm1, %v4479_v24, %v110_v30  ;;  %v5032_v12 = vld [vmem:[%s10387_s0 + $0x1cd] sm:$0x8]   ;;  %v2354_v24 = vsel %vm25_vm5, %v5044_v59, %v2350_v17  ;;  %v5057_v30 = vld [vmem:[%s10387_s0 + $0x12d] sm:$0x4]  }
  0xc5   :  { %v4481_v32 = vld [vmem:[%s10387_s0 + $0x37c] sm:$0x10]   ;;  %v118_v46 = vsel %vm13_vm2, %v4480_v25, %v114_v37  ;;  %v5033_v13 = vld [vmem:[%s10387_s0 + $0x24c] sm:$0x10]   ;;  %v2307_v25 = vsel %vm13_vm2, %v5032_v12, %v2303_v20  ;;  %v7962_v37 = vpop.permute.xlu1 %1038   ;;  %v5053_v50 = vld [vmem:[%s10387_s0 + $0x309] sm:$0x40]  }
  0xc6   :  { %v4482_v33 = vld [vmem:[%s10387_s0 + $0x39b] sm:$0x20]   ;;  %v122_v55 = vsel %vm17_vm3, %v4481_v32, %v118_v46  ;;  %v5034_v14 = vld [vmem:[%s10387_s0 + $0x2cb] sm:$0x20]   ;;  %v7896_v32 = vpop.permute.xlu0 %934   ;;  %v5050_v46 = vld [vmem:[%s10387_s0 + $0x18c] sm:$0x8]  }
  0xc7   :  { %v4483_v34 = vld [vmem:[%s10387_s0 + $0x3ba] sm:$0x40]   ;;  %v126_v61 = vsel %vm21_vm4, %v4482_v33, %v122_v55  ;;  %v5035_v21 = vld [vmem:[%s10387_s0 + $0x34a] sm:$0x40]   ;;  %v5059_v33 = vld [vmem:[%s10387_s0 + $0x22b] sm:$0x10]  }
  0xc8   :  { %v4484_v39 = vld [vmem:[%s10387_s0 + $0x3d9] sm:$0x80]   ;;  %v130_v9 = vsel %vm25_vm5, %v4483_v34, %v126_v61  ;;  %v5036_v23 = vld [vmem:[%s10387_s0 + $0x3c9] sm:$0x80]   ;;  %v5060_v34 = vld [vmem:[%s10387_s0 + $0x2aa] sm:$0x20]  }
  0xc9   :  { %v134_v15 = vsel %vm29_vm6, %v4484_v39, %v130_v9  ;;  %v5054_v54 = vld [vmem:[%s10387_s0 + $0x388] sm:$0x80]  }
  0xca   :  { %4485 = vst.msk [vmem:[%s10388_s1 + $0x6] ss:$8 sm:$0xf] %vm31_vm7, %v134_v15   ;;  %4486 = vst.msk [vmem:[%s10388_s1 - $0x19] ss:$8 sm:$0xf0] %vm31_vm7, %v134_v15   ;;  %v8019_v58 = vpop.permute.xlu0 %1004  }
  0xcb   :  { %4503 = vst.msk [vmem:[%s10388_s1 + $0x8] sm:$0xff] %vm172_vm8, %v7192_v19   ;;  %173 = vst.msk [vmem:[%s10388_s1] sm:$0xff] %vm172_vm8, %v7116_v47   ;;  %v2311_v47 = vsel %vm17_vm3, %v5033_v13, %v2307_v25  ;;  %v5058_v19 = vld [vmem:[%s10387_s0 + $0x1ac] sm:$0x8]   ;;  %vm1284_vm7 = vcmask 786144  }
  0xcc   :  { %4512 = vst.msk [vmem:[%s10388_s1 + $0x10] sm:$0xff] %vm172_vm8, %v7090_v35   ;;  %4521 = vst.msk [vmem:[%s10388_s1 + $0x18] sm:$0xff] %vm172_vm8, %v7154_v1   ;;  %v2358_v35 = vsel %vm29_vm6, %v5045_v60, %v2354_v24  ;;  %v2403_v1 = vsel %vm5_vm0, %v5056_v29, %v5055_v28  ;;  %v5073_v55 = vld [vmem:[%s10387_s0 + $0x6f] sm:$0x1]   ;;  %vm1423_vm8 = vcmask 753344  }
  0xcd   :  { %4538 = vst.msk [vmem:[%s10388_s1 + $0x8] sm:$0xff] %vm311_vm9, %v7218_v31   ;;  %312 = vst.msk [vmem:[%s10388_s1] sm:$0xff] %vm311_vm9, %v7256_v51   ;;  %2359 = vrot.lane.b32.xlu1 %v2358_v35, %s5618_s21  ;;  %v2315_v31 = vsel %vm21_vm4, %v5034_v14, %v2311_v47  ;;  %v2407_v51 = vsel %vm9_vm1, %v5057_v30, %v2403_v1  ;;  %v5074_v56 = vld [vmem:[%s10387_s0 + $0xee] sm:$0x2]  }
  0xce   :  { %4556 = vst.msk [vmem:[%s10388_s1 + $0x18] sm:$0xff] %vm311_vm9, %v7294_v6   ;;  %4547 = vst.msk [vmem:[%s10388_s1 + $0x10] sm:$0xff] %vm311_vm9, %v7320_v18   ;;  %v5061_v6 = vld [vmem:[%s10387_s0 + $0x329] sm:$0x40]   ;;  %v2319_v39 = vsel %vm25_vm5, %v5035_v21, %v2315_v31  ;;  %v2411_v41 = vsel %vm13_vm2, %v5058_v19, %v2407_v51  ;;  %v2473_v61 = vsel %vm5_vm0, %v5074_v56, %v5073_v55  ;;  %vm1562_vm9 = vcmask 720544  }
  0xcf   :  { %v5062_v18 = vld [vmem:[%s10387_s0 + $0x3a8] sm:$0x80]   ;;  %4573 = vst.msk [vmem:[%s10388_s1 + $0x8] sm:$0xff] %vm450_vm10, %v7355_v38   ;;  %451 = vst.msk [vmem:[%s10388_s1] sm:$0xff] %vm450_vm10, %v7392_v57   ;;  %v2323_v38 = vsel %vm29_vm6, %v5036_v23, %v2319_v39  ;;  %v2415_v57 = vsel %vm17_vm3, %v5059_v33, %v2411_v41  ;;  %v5092_v39 = vld [vmem:[%s10387_s0 + $0x12c] sm:$0x4]  }
  0xd0   :  { %4591 = vst.msk [vmem:[%s10388_s1 + $0x18] sm:$0xff] %vm450_vm10, %v7418_v7   ;;  %4582 = vst.msk [vmem:[%s10388_s1 + $0x10] sm:$0xff] %vm450_vm10, %v7456_v27   ;;  %v2369_v7 = vsel %vm5_vm0, %v5048_v42, %v5047_v36  ;;  %v5051_v27 = vld [vmem:[%s10387_s0 + $0x20b] sm:$0x10]   ;;  %2324 = vrot.lane.b32.xlu0 %v2323_v38, %s5618_s21  ;;  %v2419_v52 = vsel %vm21_vm4, %v5060_v34, %v2415_v57  ;;  %v8057_v23 = vpop.permute.xlu1 %1108   ;;  %vm1701_vm10 = vcmask 687744  }
  0xd1   :  { %v2373_v53 = vsel %vm9_vm1, %v5049_v45, %v2369_v7  ;;  %v2423_v59 = vsel %vm25_vm5, %v5061_v6, %v2419_v52  ;;  %v5075_v62 = vld [vmem:[%s10387_s0 + $0x16d] sm:$0x4]   ;;  %v5091_v36 = vld [vmem:[%s10387_s0 + $0xad] sm:$0x2]   ;;  %4608 = vst.msk [vmem:[%s10388_s1 + $0x8] sm:$0xff] %vm589_vm11, %v7494_v49   ;;  %590 = vst.msk [vmem:[%s10388_s1] sm:$0xff] %vm589_vm11, %v7532_v8  }
  0xd2   :  { %v2377_v60 = vsel %vm13_vm2, %v5050_v46, %v2373_v53  ;;  %v5076_v2 = vld [vmem:[%s10387_s0 + $0x1ec] sm:$0x8]   ;;  %v2427_v4 = vsel %vm29_vm6, %v5062_v18, %v2423_v59  ;;  %v2477_v10 = vsel %vm9_vm1, %v5075_v62, %v2473_v61  ;;  %v5090_v18 = vld [vmem:[%s10387_s0 + $0x2e] sm:$0x1]   ;;  %4626 = vst.msk [vmem:[%s10388_s1 + $0x18] sm:$0xff] %vm589_vm11, %v7558_v22   ;;  %4617 = vst.msk [vmem:[%s10388_s1 + $0x10] sm:$0xff] %vm589_vm11, %v7596_v44  }
  0xd3   :  { %v5077_v3 = vld [vmem:[%s10387_s0 + $0x26b] sm:$0x10]   ;;  %v2381_v9 = vsel %vm17_vm3, %v5051_v27, %v2377_v60  ;;  %2428 = vrot.lane.b32.xlu1 %v2427_v4, %s5619_s24  ;;  %v2481_v15 = vsel %vm13_vm2, %v5076_v2, %v2477_v10  ;;  %v8080_v31 = vpop.permute.xlu0 %1073   ;;  %v2542_v22 = vsel %vm5_vm0, %v5091_v36, %v5090_v18  ;;  %v5093_v44 = vld [vmem:[%s10387_s0 + $0x1ab] sm:$0x8]   ;;  %4643 = vst.msk [vmem:[%s10388_s1 + $0x8] sm:$0xff] %vm728_vm12, %v7630_v0   ;;  %vm1840_vm11 = vcmask 654944  }
  0xd4   :  { %v5078_v11 = vld [vmem:[%s10387_s0 + $0x2ea] sm:$0x20]   ;;  %v2385_v14 = vsel %vm21_vm4, %v5052_v48, %v2381_v9  ;;  %v2485_v25 = vsel %vm17_vm3, %v5077_v3, %v2481_v15  ;;  %v5094_v41 = vld [vmem:[%s10387_s0 + $0x22a] sm:$0x10]   ;;  %v2546_v46 = vsel %vm9_vm1, %v5092_v39, %v2542_v22  ;;  %v8134_v27 = vpop.permute.xlu1 %1177   ;;  %729 = vst.msk [vmem:[%s10388_s1] sm:$0xff] %vm728_vm12, %v7656_v16   ;;  %4661 = vst.msk [vmem:[%s10388_s1 + $0x18] sm:$0xff] %vm728_vm12, %v7693_v40  }
  0xd5   :  { %v5079_v12 = vld [vmem:[%s10387_s0 + $0x369] sm:$0x40]   ;;  %v2389_v24 = vsel %vm25_vm5, %v5053_v50, %v2385_v14  ;;  %v2489_v1 = vsel %vm21_vm4, %v5078_v11, %v2485_v25  ;;  %v5095_v42 = vld [vmem:[%s10387_s0 + $0x2a9] sm:$0x20]   ;;  %v2550_v50 = vsel %vm13_vm2, %v5093_v44, %v2546_v46  ;;  %4652 = vst.msk [vmem:[%s10388_s1 + $0x10] sm:$0xff] %vm728_vm12, %v7731_v63   ;;  %vm1979_vm12 = vcmask 622144  }
  0xd6   :  { %v5080_v13 = vld [vmem:[%s10387_s0 + $0x3e8] sm:$0x80]   ;;  %v2393_v47 = vsel %vm29_vm6, %v5054_v54, %v2389_v24  ;;  %v2493_v51 = vsel %vm25_vm5, %v5079_v12, %v2489_v1  ;;  %v5096_v38 = vld [vmem:[%s10387_s0 + $0x328] sm:$0x40]   ;;  %v2554_v56 = vsel %vm17_vm3, %v5094_v41, %v2550_v50  ;;  %v5128_v63 = vld [vmem:[%s10387_s0 + $0x1aa] sm:$0x8]  }
  0xd7   :  { %v5064_v17 = vld [vmem:[%s10387_s0 + $0x4f] sm:$0x1]   ;;  %2394 = vrot.lane.b32.xlu0 %v2393_v47, %s5619_s24  ;;  %v2497_v49 = vsel %vm29_vm6, %v5080_v13, %v2493_v51  ;;  %v5097_v57 = vld [vmem:[%s10387_s0 + $0x3a7] sm:$0x80]   ;;  %v2558_v2 = vsel %vm21_vm4, %v5095_v42, %v2554_v56  ;;  %v8171_v11 = vpop.permute.xlu0 %1143   ;;  %v5129_v50 = vld [vmem:[%s10387_s0 + $0x229] sm:$0x10]  }
  0xd8   :  { %v5065_v20 = vld [vmem:[%s10387_s0 + $0xce] sm:$0x2]   ;;  %2498 = vrot.lane.b32.xlu1 %v2497_v49, %s5619_s24  ;;  %v5082_v7 = vld [vmem:[%s10387_s0 + $0xe] sm:$0x1]   ;;  %v2562_v12 = vsel %vm25_vm5, %v5096_v38, %v2558_v2  ;;  %v5132_v56 = vld [vmem:[%s10387_s0 + $0x3a6] sm:$0x80]  }
  0xd9   :  { %v5066_v21 = vld [vmem:[%s10387_s0 + $0x14d] sm:$0x4]   ;;  %v2438_v28 = vsel %vm5_vm0, %v5065_v20, %v5064_v17  ;;  %v5083_v52 = vld [vmem:[%s10387_s0 + $0x8d] sm:$0x2]   ;;  %v5118_v2 = vld [vmem:[%s10387_s0 + $0x8c] sm:$0x2]  }
  0xda   :  { %v5067_v29 = vld [vmem:[%s10387_s0 + $0x1cc] sm:$0x8]   ;;  %v2442_v19 = vsel %vm9_vm1, %v5066_v21, %v2438_v28  ;;  %v5084_v53 = vld [vmem:[%s10387_s0 + $0x10c] sm:$0x4]   ;;  %v2508_v59 = vsel %vm5_vm0, %v5083_v52, %v5082_v7  ;;  %v2566_v21 = vsel %vm29_vm6, %v5097_v57, %v2562_v12  ;;  %v5125_v57 = vld [vmem:[%s10387_s0 + $0x2d] sm:$0x1]  }
  0xdb   :  { %v5068_v30 = vld [vmem:[%s10387_s0 + $0x24b] sm:$0x10]   ;;  %v2446_v6 = vsel %vm13_vm2, %v5067_v29, %v2442_v19  ;;  %v5085_v54 = vld [vmem:[%s10387_s0 + $0x18b] sm:$0x8]   ;;  %v2512_v3 = vsel %vm9_vm1, %v5084_v53, %v2508_v59  ;;  %v5126_v7 = vld [vmem:[%s10387_s0 + $0xac] sm:$0x2]  }
  0xdc   :  { %v5069_v35 = vld [vmem:[%s10387_s0 + $0x2ca] sm:$0x20]   ;;  %v2450_v8 = vsel %vm17_vm3, %v5068_v30, %v2446_v6  ;;  %v5086_v60 = vld [vmem:[%s10387_s0 + $0x20a] sm:$0x10]   ;;  %v2516_v13 = vsel %vm13_vm2, %v5085_v54, %v2512_v3  ;;  %2567 = vrot.lane.b32.xlu1 %v2566_v21, %s5620_s11  ;;  %v2681_v40 = vsel %vm5_vm0, %v5126_v7, %v5125_v57  ;;  %v5130_v52 = vld [vmem:[%s10387_s0 + $0x2a8] sm:$0x20]  }
  0xdd   :  { %v5070_v33 = vld [vmem:[%s10387_s0 + $0x349] sm:$0x40]   ;;  %v2454_v45 = vsel %vm21_vm4, %v5069_v35, %v2450_v8  ;;  %v5087_v61 = vld [vmem:[%s10387_s0 + $0x289] sm:$0x20]   ;;  %v2520_v24 = vsel %vm17_vm3, %v5086_v60, %v2516_v13  ;;  %v5117_v59 = vld [vmem:[%s10387_s0 + $0xd] sm:$0x1]  }
  0xde   :  { %v5071_v34 = vld [vmem:[%s10387_s0 + $0x3c8] sm:$0x80]   ;;  %v2458_v48 = vsel %vm25_vm5, %v5070_v33, %v2454_v45  ;;  %v5088_v62 = vld [vmem:[%s10387_s0 + $0x308] sm:$0x40]   ;;  %v2524_v35 = vsel %vm21_vm4, %v5087_v61, %v2520_v24  ;;  %v8232_v45 = vpop.permute.xlu0 %1212   ;;  %v5119_v3 = vld [vmem:[%s10387_s0 + $0x10b] sm:$0x4]   ;;  %v2647_v12 = vsel %vm5_vm0, %v5118_v2, %v5117_v59 }
  0xdf   :  { %v2462_v55 = vsel %vm29_vm6, %v5071_v34, %v2458_v48  ;;  %v5089_v4 = vld [vmem:[%s10387_s0 + $0x387] sm:$0x80]   ;;  %v8209_v34 = vpop.permute.xlu1 %1247   ;;  %v2528_v51 = vsel %vm25_vm5, %v5088_v62, %v2524_v35  ;;  %v5127_v48 = vld [vmem:[%s10387_s0 + $0x12b] sm:$0x4]   ;;  %v5161_v59 = vld [vmem:[%s10387_s0 + $0xab] sm:$0x2]  }
  0xe0   :  { %2463 = vrot.lane.b32.xlu0 %v2462_v55, %s5619_s24  ;;  %v5108_v9 = vld [vmem:[%s10387_s0 + $0x6e] sm:$0x1]   ;;  %v2532_v8 = vsel %vm29_vm6, %v5089_v4, %v2528_v51  ;;  %v2685_v54 = vsel %vm9_vm1, %v5127_v48, %v2681_v40  ;;  %v5131_v55 = vld [vmem:[%s10387_s0 + $0x327] sm:$0x40]   ;;  %4678 = vst.msk [vmem:[%s10388_s1 + $0x8] sm:$0xff] %vm867_vm13, %v7776_v26  }
  0xe1   :  { %v5109_v10 = vld [vmem:[%s10387_s0 + $0xed] sm:$0x2]   ;;  %v2689_v62 = vsel %vm13_vm2, %v5128_v63, %v2685_v54  ;;  %v5120_v4 = vld [vmem:[%s10387_s0 + $0x18a] sm:$0x8]   ;;  %868 = vst.msk [vmem:[%s10388_s1] sm:$0xff] %vm867_vm13, %v7809_v43   ;;  %4696 = vst.msk [vmem:[%s10388_s1 + $0x18] sm:$0xff] %vm867_vm13, %v7854_v5  }
  0xe2   :  { %v2612_v14 = vsel %vm5_vm0, %v5109_v10, %v5108_v9  ;;  %v5110_v15 = vld [vmem:[%s10387_s0 + $0x16c] sm:$0x4]   ;;  %v2693_v10 = vsel %vm17_vm3, %v5129_v50, %v2689_v62  ;;  %v5121_v13 = vld [vmem:[%s10387_s0 + $0x209] sm:$0x10]   ;;  %4687 = vst.msk [vmem:[%s10388_s1 + $0x10] sm:$0xff] %vm867_vm13, %v7896_v32   ;;  %vm2118_vm13 = vcmask 589344  }
  0xe3   :  { %v5111_v17 = vld [vmem:[%s10387_s0 + $0x1eb] sm:$0x8]   ;;  %v2616_v25 = vsel %vm9_vm1, %v5110_v15, %v2612_v14  ;;  %v8286_v60 = vpop.permute.xlu1 %1316   ;;  %v5122_v14 = vld [vmem:[%s10387_s0 + $0x288] sm:$0x20]   ;;  %v5163_v32 = vld [vmem:[%s10387_s0 + $0x1a9] sm:$0x8]  }
  0xe4   :  { %v5112_v20 = vld [vmem:[%s10387_s0 + $0x26a] sm:$0x10]   ;;  %v2620_v47 = vsel %vm13_vm2, %v5111_v17, %v2616_v25  ;;  %2533 = vrot.lane.b32.xlu0 %v2532_v8, %s5620_s11  ;;  %v5123_v15 = vld [vmem:[%s10387_s0 + $0x307] sm:$0x40]   ;;  %v2697_v17 = vsel %vm21_vm4, %v5130_v52, %v2693_v10  ;;  %v5164_v62 = vld [vmem:[%s10387_s0 + $0x228] sm:$0x10]  }
  0xe5   :  { %v5113_v28 = vld [vmem:[%s10387_s0 + $0x2e9] sm:$0x20]   ;;  %v2624_v6 = vsel %vm17_vm3, %v5112_v20, %v2620_v47  ;;  %v2651_v20 = vsel %vm9_vm1, %v5119_v3, %v2647_v12  ;;  %v5124_v21 = vld [vmem:[%s10387_s0 + $0x386] sm:$0x80]   ;;  %v5165_v2 = vld [vmem:[%s10387_s0 + $0x2a7] sm:$0x20]  }
  0xe6   :  { %v5114_v29 = vld [vmem:[%s10387_s0 + $0x368] sm:$0x40]   ;;  %v2628_v22 = vsel %vm21_vm4, %v5113_v28, %v2624_v6  ;;  %v5143_v24 = vld [vmem:[%s10387_s0 + $0x6d] sm:$0x1]   ;;  %v8323_v28 = vpop.permute.xlu0 %1282   ;;  %v5167_v10 = vld [vmem:[%s10387_s0 + $0x3a5] sm:$0x80]  }
  0xe7   :  { %v5115_v30 = vld [vmem:[%s10387_s0 + $0x3e7] sm:$0x80]   ;;  %v2632_v46 = vsel %vm25_vm5, %v5114_v29, %v2628_v22  ;;  %v5144_v25 = vld [vmem:[%s10387_s0 + $0xec] sm:$0x2]   ;;  %v2701_v29 = vsel %vm25_vm5, %v5131_v55, %v2697_v17  ;;  %v5152_v12 = vld [vmem:[%s10387_s0 + $0xc] sm:$0x1]  }
  0xe8   :  { %v5099_v1 = vld [vmem:[%s10387_s0 + $0x4e] sm:$0x1]   ;;  %v2636_v0 = vsel %vm29_vm6, %v5115_v30, %v2632_v46  ;;  %v2655_v30 = vsel %vm13_vm2, %v5120_v4, %v2651_v20  ;;  %v2751_v35 = vsel %vm5_vm0, %v5144_v25, %v5143_v24  ;;  %v5145_v47 = vld [vmem:[%s10387_s0 + $0x16b] sm:$0x4]   ;;  %v5153_v17 = vld [vmem:[%s10387_s0 + $0x8b] sm:$0x2]  }
  0xe9   :  { %v5100_v19 = vld [vmem:[%s10387_s0 + $0xcd] sm:$0x2]   ;;  %2637 = vrot.lane.b32.xlu1 %v2636_v0, %s5620_s11  ;;  %v2659_v51 = vsel %vm17_vm3, %v5121_v13, %v2655_v30  ;;  %v2755_v6 = vsel %vm9_vm1, %v5145_v47, %v2751_v35  ;;  %v5137_v7 = vld [vmem:[%s10387_s0 + $0x1ca] sm:$0x8]   ;;  %v5154_v20 = vld [vmem:[%s10387_s0 + $0x10a] sm:$0x4]  }
  0xea   :  { %v5101_v33 = vld [vmem:[%s10387_s0 + $0x14c] sm:$0x4]   ;;  %v2577_v18 = vsel %vm5_vm0, %v5100_v19, %v5099_v1  ;;  %v5146_v1 = vld [vmem:[%s10387_s0 + $0x1ea] sm:$0x8]   ;;  %v2663_v8 = vsel %vm21_vm4, %v5122_v14, %v2659_v51  ;;  %v5156_v30 = vld [vmem:[%s10387_s0 + $0x208] sm:$0x10]  }
  0xeb   :  { %v5102_v36 = vld [vmem:[%s10387_s0 + $0x1cb] sm:$0x8]   ;;  %v2581_v44 = vsel %vm9_vm1, %v5101_v33, %v2577_v18  ;;  %v5147_v19 = vld [vmem:[%s10387_s0 + $0x269] sm:$0x10]   ;;  %v2705_v33 = vsel %vm29_vm6, %v5132_v56, %v2701_v29  ;;  %v2759_v22 = vsel %vm13_vm2, %v5146_v1, %v2755_v6  ;;  %v2667_v46 = vsel %vm25_vm5, %v5123_v15, %v2663_v8  ;;  %v5160_v56 = vld [vmem:[%s10387_s0 + $0x2c] sm:$0x1]  }
  0xec   :  { %v5103_v39 = vld [vmem:[%s10387_s0 + $0x24a] sm:$0x10]   ;;  %v2585_v38 = vsel %vm13_vm2, %v5102_v36, %v2581_v44  ;;  %v5148_v18 = vld [vmem:[%s10387_s0 + $0x2e8] sm:$0x20]   ;;  %v2820_v5 = vsel %vm5_vm0, %v5161_v59, %v5160_v56  ;;  %v2786_v29 = vsel %vm5_vm0, %v5153_v17, %v5152_v12  ;;  %v5157_v35 = vld [vmem:[%s10387_s0 + $0x287] sm:$0x20]  }
  0xed   :  { %v5104_v49 = vld [vmem:[%s10387_s0 + $0x2c9] sm:$0x20]   ;;  %v2589_v16 = vsel %vm17_vm3, %v5103_v39, %v2585_v38  ;;  %v5149_v36 = vld [vmem:[%s10387_s0 + $0x367] sm:$0x40]   ;;  %2706 = vrot.lane.b32.xlu1 %v2705_v33, %s5621_s9  ;;  %v2763_v38 = vsel %vm17_vm3, %v5147_v19, %v2759_v22  ;;  %v5158_v47 = vld [vmem:[%s10387_s0 + $0x306] sm:$0x40]   ;;  %v2790_v19 = vsel %vm9_vm1, %v5154_v20, %v2786_v29 }
  0xee   :  { %v5105_v41 = vld [vmem:[%s10387_s0 + $0x348] sm:$0x40]   ;;  %v2593_v53 = vsel %vm21_vm4, %v5104_v49, %v2589_v16  ;;  %v5150_v39 = vld [vmem:[%s10387_s0 + $0x3e6] sm:$0x80]   ;;  %v8349_v49 = vpop.permute.xlu1 %1386   ;;  %v2671_v16 = vsel %vm29_vm6, %v5124_v21, %v2667_v46  ;;  %v2767_v40 = vsel %vm21_vm4, %v5148_v18, %v2763_v38  ;;  %v5155_v21 = vld [vmem:[%s10387_s0 + $0x189] sm:$0x8]  }
  0xef   :  { %v5106_v42 = vld [vmem:[%s10387_s0 + $0x3c7] sm:$0x80]   ;;  %v2597_v61 = vsel %vm25_vm5, %v5105_v41, %v2593_v53  ;;  %v5134_v44 = vld [vmem:[%s10387_s0 + $0x4d] sm:$0x1]   ;;  %v8384_v53 = vpop.permute.xlu0 %1351   ;;  %v2771_v54 = vsel %vm25_vm5, %v5149_v36, %v2767_v40  ;;  %v5159_v33 = vld [vmem:[%s10387_s0 + $0x385] sm:$0x80]  }
  0xf0   :  { %v2601_v9 = vsel %vm29_vm6, %v5106_v42, %v2597_v61  ;;  %v5135_v41 = vld [vmem:[%s10387_s0 + $0xcc] sm:$0x2]   ;;  %v5162_v61 = vld [vmem:[%s10387_s0 + $0x12a] sm:$0x4]   ;;  %v2775_v26 = vsel %vm29_vm6, %v5150_v39, %v2771_v54  ;;  %v2794_v39 = vsel %vm13_vm2, %v5155_v21, %v2790_v19  ;;  %v5196_v12 = vld [vmem:[%s10387_s0 + $0xaa] sm:$0x2]  }
  0xf1   :  { %2602 = vrot.lane.b32.xlu0 %v2601_v9, %s5620_s11  ;;  %v5136_v42 = vld [vmem:[%s10387_s0 + $0x14b] sm:$0x4]   ;;  %v2716_v57 = vsel %vm5_vm0, %v5135_v41, %v5134_v44  ;;  %2776 = vrot.lane.b32.xlu1 %v2775_v26, %s5621_s9  ;;  %v2824_v4 = vsel %vm9_vm1, %v5162_v61, %v2820_v5  ;;  %v5166_v9 = vld [vmem:[%s10387_s0 + $0x326] sm:$0x40]   ;;  %v2798_v46 = vsel %vm17_vm3, %v5156_v30, %v2794_v39 }
  0xf2   :  { %v5138_v48 = vld [vmem:[%s10387_s0 + $0x249] sm:$0x10]   ;;  %v2720_v63 = vsel %vm9_vm1, %v5136_v42, %v2716_v57  ;;  %v8438_v13 = vpop.permute.xlu1 %1455   ;;  %v2828_v15 = vsel %vm13_vm2, %v5163_v32, %v2824_v4  ;;  %v5178_v51 = vld [vmem:[%s10387_s0 + $0x6c] sm:$0x1]   ;;  %4713 = vst.msk [vmem:[%s10388_s1 + $0x8] sm:$0xff] %vm1006_vm14, %v7962_v37   ;;  %1007 = vst.msk [vmem:[%s10388_s1] sm:$0xff] %vm1006_vm14, %v8019_v58  }
  0xf3   :  { %v5139_v0 = vld [vmem:[%s10387_s0 + $0x2c8] sm:$0x20]   ;;  %v2724_v55 = vsel %vm13_vm2, %v5137_v7, %v2720_v63  ;;  %v2832_v25 = vsel %vm17_vm3, %v5164_v62, %v2828_v15  ;;  %v5179_v6 = vld [vmem:[%s10387_s0 + $0xeb] sm:$0x2]   ;;  %v8475_v18 = vpop.permute.xlu0 %1421   ;;  %4731 = vst.msk [vmem:[%s10388_s1 + $0x18] sm:$0xff] %vm1006_vm14, %v8057_v23   ;;  %4722 = vst.msk [vmem:[%s10388_s1 + $0x10] sm:$0xff] %vm1006_vm14, %v8080_v31  }
  0xf4   :  { %v5140_v50 = vld [vmem:[%s10387_s0 + $0x347] sm:$0x40]   ;;  %v2728_v43 = vsel %vm17_vm3, %v5138_v48, %v2724_v55  ;;  %v2836_v1 = vsel %vm21_vm4, %v5165_v2, %v2832_v25  ;;  %v2890_v8 = vsel %vm5_vm0, %v5179_v6, %v5178_v51  ;;  %v5180_v22 = vld [vmem:[%s10387_s0 + $0x16a] sm:$0x4]   ;;  %v5198_v31 = vld [vmem:[%s10387_s0 + $0x1a8] sm:$0x8]  }
  0xf5   :  { %v5141_v52 = vld [vmem:[%s10387_s0 + $0x3c6] sm:$0x80]   ;;  %2672 = vrot.lane.b32.xlu0 %v2671_v16, %s5621_s9  ;;  %v2732_v3 = vsel %vm21_vm4, %v5139_v0, %v2728_v43  ;;  %v2840_v36 = vsel %vm25_vm5, %v5166_v9, %v2836_v1  ;;  %v5181_v44 = vld [vmem:[%s10387_s0 + $0x1e9] sm:$0x8]   ;;  %v2894_v38 = vsel %vm9_vm1, %v5180_v22, %v2890_v8  ;;  %v2802_v16 = vsel %vm21_vm4, %v5157_v35, %v2798_v46  ;;  %v5199_v15 = vld [vmem:[%s10387_s0 + $0x227] sm:$0x10]  }
  0xf6   :  { %v2736_v14 = vsel %vm25_vm5, %v5140_v50, %v2732_v3  ;;  %v5182_v41 = vld [vmem:[%s10387_s0 + $0x268] sm:$0x10]   ;;  %v2844_v42 = vsel %vm29_vm6, %v5167_v10, %v2840_v36  ;;  %v8501_v0 = vpop.permute.xlu1 %1525   ;;  %v2898_v40 = vsel %vm13_vm2, %v5181_v44, %v2894_v38  ;;  %v2806_v54 = vsel %vm25_vm5, %v5158_v47, %v2802_v16  ;;  %v5195_v10 = vld [vmem:[%s10387_s0 + $0x2b] sm:$0x1]   ;;  %4748 = vst.msk [vmem:[%s10388_s1 + $0x8] sm:$0xff] %vm1145_vm15, %v8134_v27  }
  0xf7   :  { %v2740_v24 = vsel %vm29_vm6, %v5141_v52, %v2736_v14  ;;  %v5183_v57 = vld [vmem:[%s10387_s0 + $0x2e7] sm:$0x20]   ;;  %2845 = vrot.lane.b32.xlu1 %v2844_v42, %s5622_s14  ;;  %v2902_v55 = vsel %vm17_vm3, %v5182_v41, %v2898_v40  ;;  %v2810_v43 = vsel %vm29_vm6, %v5159_v33, %v2806_v54  ;;  %v8536_v3 = vpop.permute.xlu0 %1490   ;;  %v5197_v14 = vld [vmem:[%s10387_s0 + $0x129] sm:$0x4]   ;;  %v2959_v23 = vsel %vm5_vm0, %v5196_v12, %v5195_v10 }
  0xf8   :  { %v5184_v7 = vld [vmem:[%s10387_s0 + $0x366] sm:$0x40]   ;;  %v2906_v5 = vsel %vm21_vm4, %v5183_v57, %v2902_v55  ;;  %v5200_v17 = vld [vmem:[%s10387_s0 + $0x2a6] sm:$0x20]   ;;  %v2963_v21 = vsel %vm9_vm1, %v5197_v14, %v2959_v23  ;;  %1146 = vst.msk [vmem:[%s10388_s1] sm:$0xff] %vm1145_vm15, %v8171_v11   ;;  %4766 = vst.msk [vmem:[%s10388_s1 + $0x18] sm:$0xff] %vm1145_vm15, %v8209_v34  }
  0xf9   :  { %2741 = vrot.lane.b32.xlu0 %v2740_v24, %s5621_s9  ;;  %v5185_v48 = vld [vmem:[%s10387_s0 + $0x3e5] sm:$0x80]   ;;  %v2910_v4 = vsel %vm25_vm5, %v5184_v7, %v2906_v5  ;;  %v5201_v24 = vld [vmem:[%s10387_s0 + $0x325] sm:$0x40]   ;;  %v2967_v47 = vsel %vm13_vm2, %v5198_v31, %v2963_v21  ;;  %4757 = vst.msk [vmem:[%s10388_s1 + $0x10] sm:$0xff] %vm1145_vm15, %v8232_v45   ;;  %vm2257_vm14 = vcmask 556544  }
  0xfa   :  { %v5169_v63 = vld [vmem:[%s10387_s0 + $0x4c] sm:$0x1]   ;;  %v2914_v37 = vsel %vm29_vm6, %v5185_v48, %v2910_v4  ;;  %v5202_v25 = vld [vmem:[%s10387_s0 + $0x3a4] sm:$0x80]   ;;  %v8590_v30 = vpop.permute.xlu1 %1594   ;;  %v2971_v6 = vsel %vm17_vm3, %v5199_v15, %v2967_v47  ;;  %v5233_v45 = vld [vmem:[%s10387_s0 + $0x1a7] sm:$0x8]  }
  0xfb   :  { %v5170_v50 = vld [vmem:[%s10387_s0 + $0xcb] sm:$0x2]   ;;  %2915 = vrot.lane.b32.xlu1 %v2914_v37, %s5622_s14  ;;  %v5187_v29 = vld [vmem:[%s10387_s0 + $0xb] sm:$0x1]   ;;  %v8615_v44 = vpop.permute.xlu0 %1560   ;;  %v2975_v41 = vsel %vm21_vm4, %v5200_v17, %v2971_v6  ;;  %v5234_v47 = vld [vmem:[%s10387_s0 + $0x226] sm:$0x10]  }
  0xfc   :  { %v5171_v52 = vld [vmem:[%s10387_s0 + $0x14a] sm:$0x4]   ;;  %v2855_v56 = vsel %vm5_vm0, %v5170_v50, %v5169_v63  ;;  %v5188_v1 = vld [vmem:[%s10387_s0 + $0x8a] sm:$0x2]   ;;  %v2979_v7 = vsel %vm25_vm5, %v5201_v24, %v2975_v41  ;;  %v5237_v6 = vld [vmem:[%s10387_s0 + $0x3a3] sm:$0x80]  }
  0xfd   :  { %v5172_v59 = vld [vmem:[%s10387_s0 + $0x1c9] sm:$0x8]   ;;  %v2859_v32 = vsel %vm9_vm1, %v5171_v52, %v2855_v56  ;;  %2811 = vrot.lane.b32.xlu0 %v2810_v43, %s5622_s14  ;;  %v5189_v19 = vld [vmem:[%s10387_s0 + $0x109] sm:$0x4]   ;;  %v2925_v36 = vsel %vm5_vm0, %v5188_v1, %v5187_v29  ;;  %v2983_v52 = vsel %vm29_vm6, %v5202_v25, %v2979_v7  ;;  %v5230_v25 = vld [vmem:[%s10387_s0 + $0x2a] sm:$0x1]  }
  0xfe   :  { %v5173_v61 = vld [vmem:[%s10387_s0 + $0x248] sm:$0x10]   ;;  %v2863_v9 = vsel %vm13_vm2, %v5172_v59, %v2859_v32  ;;  %v5190_v33 = vld [vmem:[%s10387_s0 + $0x188] sm:$0x8]   ;;  %v2929_v42 = vsel %vm9_vm1, %v5189_v19, %v2925_v36  ;;  %v5231_v29 = vld [vmem:[%s10387_s0 + $0xa9] sm:$0x2]  }
  0xff   :  { %v5174_v26 = vld [vmem:[%s10387_s0 + $0x2c7] sm:$0x20]   ;;  %v2867_v58 = vsel %vm17_vm3, %v5173_v61, %v2863_v9  ;;  %v5191_v39 = vld [vmem:[%s10387_s0 + $0x207] sm:$0x10]   ;;  %v2933_v48 = vsel %vm13_vm2, %v5190_v33, %v2929_v42  ;;  %2984 = vrot.lane.b32.xlu1 %v2983_v52, %s5623_s30  ;;  %v3098_v34 = vsel %vm5_vm0, %v5231_v29, %v5230_v25  ;;  %v5235_v1 = vld [vmem:[%s10387_s0 + $0x2a5] sm:$0x20]  }
 0x100   :  { %v5175_v62 = vld [vmem:[%s10387_s0 + $0x346] sm:$0x40]   ;;  %v2871_v20 = vsel %vm21_vm4, %v5174_v26, %v2867_v58  ;;  %v5192_v8 = vld [vmem:[%s10387_s0 + $0x286] sm:$0x20]   ;;  %v2937_v54 = vsel %vm17_vm3, %v5191_v39, %v2933_v48  ;;  %v8653_v26 = vpop.permute.xlu1 %1664   ;;  %v5222_v36 = vld [vmem:[%s10387_s0 + $0xa] sm:$0x1]  }
 0x101   :  { %v5176_v2 = vld [vmem:[%s10387_s0 + $0x3c5] sm:$0x80]   ;;  %v2875_v35 = vsel %vm25_vm5, %v5175_v62, %v2871_v20  ;;  %v5193_v22 = vld [vmem:[%s10387_s0 + $0x305] sm:$0x40]   ;;  %v2941_v43 = vsel %vm21_vm4, %v5192_v8, %v2937_v54  ;;  %v8688_v20 = vpop.permute.xlu0 %1629   ;;  %v5223_v41 = vld [vmem:[%s10387_s0 + $0x89] sm:$0x2]  }
 0x102   :  { %v2879_v51 = vsel %vm29_vm6, %v5176_v2, %v2875_v35  ;;  %v5194_v46 = vld [vmem:[%s10387_s0 + $0x384] sm:$0x80]   ;;  %v2945_v4 = vsel %vm25_vm5, %v5193_v22, %v2941_v43  ;;  %v5232_v35 = vld [vmem:[%s10387_s0 + $0x128] sm:$0x4]   ;;  %v3064_v7 = vsel %vm5_vm0, %v5223_v41, %v5222_v36  ;;  %v5266_v36 = vld [vmem:[%s10387_s0 + $0xa8] sm:$0x2]  }
 0x103   :  { %2880 = vrot.lane.b32.xlu0 %v2879_v51, %s5622_s14  ;;  %v5213_v38 = vld [vmem:[%s10387_s0 + $0x6b] sm:$0x1]   ;;  %v2949_v58 = vsel %vm29_vm6, %v5194_v46, %v2945_v4  ;;  %v3102_v33 = vsel %vm9_vm1, %v5232_v35, %v3098_v34  ;;  %v5236_v51 = vld [vmem:[%s10387_s0 + $0x324] sm:$0x40]   ;;  %4783 = vst.msk [vmem:[%s10388_s1 + $0x8] sm:$0xff] %vm1284_vm7, %v8286_v60   ;;  %vm2396_vm15 = vcmask 523744  }
 0x104   :  { %v5214_v57 = vld [vmem:[%s10387_s0 + $0xea] sm:$0x2]   ;;  %v8742_v39 = vpop.permute.xlu1 %1733   ;;  %v3106_v22 = vsel %vm13_vm2, %v5233_v45, %v3102_v33  ;;  %v5224_v42 = vld [vmem:[%s10387_s0 + $0x108] sm:$0x4]   ;;  %1285 = vst.msk [vmem:[%s10388_s1] sm:$0xff] %vm1284_vm7, %v8323_v28   ;;  %4801 = vst.msk [vmem:[%s10388_s1 + $0x18] sm:$0xff] %vm1284_vm7, %v8349_v49  }
 0x105   :  { %v3029_v16 = vsel %vm5_vm0, %v5214_v57, %v5213_v38  ;;  %v5215_v40 = vld [vmem:[%s10387_s0 + $0x169] sm:$0x4]   ;;  %v5225_v46 = vld [vmem:[%s10387_s0 + $0x187] sm:$0x8]   ;;  %v3110_v57 = vsel %vm17_vm3, %v5234_v47, %v3106_v22  ;;  %v3068_v52 = vsel %vm9_vm1, %v5224_v42, %v3064_v7  ;;  %4792 = vst.msk [vmem:[%s10388_s1 + $0x10] sm:$0xff] %vm1284_vm7, %v8384_v53   ;;  %vm3508_vm7 = vcmask 261344  }
 0x106   :  { %v5216_v63 = vld [vmem:[%s10387_s0 + $0x1e8] sm:$0x8]   ;;  %v3033_v55 = vsel %vm9_vm1, %v5215_v40, %v3029_v16  ;;  %v5226_v48 = vld [vmem:[%s10387_s0 + $0x206] sm:$0x10]   ;;  %v5268_v53 = vld [vmem:[%s10387_s0 + $0x1a6] sm:$0x8]  }
 0x107   :  { %v5217_v50 = vld [vmem:[%s10387_s0 + $0x267] sm:$0x10]   ;;  %v3037_v5 = vsel %vm13_vm2, %v5216_v63, %v3033_v55  ;;  %2950 = vrot.lane.b32.xlu0 %v2949_v58, %s5623_s30  ;;  %v5227_v16 = vld [vmem:[%s10387_s0 + $0x285] sm:$0x20]   ;;  %v8767_v63 = vpop.permute.xlu0 %1699   ;;  %v5269_v22 = vld [vmem:[%s10387_s0 + $0x225] sm:$0x10]  }
 0x108   :  { %v5218_v56 = vld [vmem:[%s10387_s0 + $0x2e6] sm:$0x20]   ;;  %v3041_v9 = vsel %vm17_vm3, %v5217_v50, %v3037_v5  ;;  %v5228_v40 = vld [vmem:[%s10387_s0 + $0x304] sm:$0x40]   ;;  %v3114_v50 = vsel %vm21_vm4, %v5235_v1, %v3110_v57  ;;  %v5270_v41 = vld [vmem:[%s10387_s0 + $0x2a4] sm:$0x20]  }
 0x109   :  { %v5219_v59 = vld [vmem:[%s10387_s0 + $0x365] sm:$0x40]   ;;  %v3045_v23 = vsel %vm21_vm4, %v5218_v56, %v3041_v9  ;;  %v5229_v54 = vld [vmem:[%s10387_s0 + $0x383] sm:$0x80]   ;;  %v5271_v57 = vld [vmem:[%s10387_s0 + $0x323] sm:$0x40]  }
 0x10a   :  { %v5220_v61 = vld [vmem:[%s10387_s0 + $0x3e4] sm:$0x80]   ;;  %v3049_v21 = vsel %vm25_vm5, %v5219_v59, %v3045_v23  ;;  %v5248_v55 = vld [vmem:[%s10387_s0 + $0x6a] sm:$0x1]   ;;  %v3118_v59 = vsel %vm25_vm5, %v5236_v51, %v3114_v50  ;;  %v5272_v7 = vld [vmem:[%s10387_s0 + $0x3a2] sm:$0x80]  }
 0x10b   :  { %v5204_v32 = vld [vmem:[%s10387_s0 + $0x4b] sm:$0x1]   ;;  %v3053_v27 = vsel %vm29_vm6, %v5220_v61, %v3049_v21  ;;  %v5249_v56 = vld [vmem:[%s10387_s0 + $0xe9] sm:$0x2]   ;;  %v3072_v61 = vsel %vm13_vm2, %v5225_v46, %v3068_v52  ;;  %v5258_v50 = vld [vmem:[%s10387_s0 + $0x88] sm:$0x2]  }
 0x10c   :  { %v5205_v62 = vld [vmem:[%s10387_s0 + $0xca] sm:$0x2]   ;;  %3054 = vrot.lane.b32.xlu1 %v3053_v27, %s5623_s30  ;;  %v3168_v43 = vsel %vm5_vm0, %v5249_v56, %v5248_v55  ;;  %v5250_v5 = vld [vmem:[%s10387_s0 + $0x168] sm:$0x4]   ;;  %v3076_v4 = vsel %vm17_vm3, %v5226_v48, %v3072_v61  ;;  %v5257_v48 = vld [vmem:[%s10387_s0 + $0x9] sm:$0x1]  }
 0x10d   :  { %v5206_v2 = vld [vmem:[%s10387_s0 + $0x149] sm:$0x4]   ;;  %v2994_v10 = vsel %vm5_vm0, %v5205_v62, %v5204_v32  ;;  %v5251_v32 = vld [vmem:[%s10387_s0 + $0x1e7] sm:$0x8]   ;;  %v3172_v9 = vsel %vm9_vm1, %v5250_v5, %v3168_v43  ;;  %v3080_v58 = vsel %vm21_vm4, %v5227_v16, %v3076_v4  ;;  %v5259_v52 = vld [vmem:[%s10387_s0 + $0x107] sm:$0x4]  }
 0x10e   :  { %v5207_v12 = vld [vmem:[%s10387_s0 + $0x1c8] sm:$0x8]   ;;  %v2998_v31 = vsel %vm9_vm1, %v5206_v2, %v2994_v10  ;;  %v5252_v62 = vld [vmem:[%s10387_s0 + $0x266] sm:$0x10]   ;;  %v3122_v2 = vsel %vm29_vm6, %v5237_v6, %v3118_v59  ;;  %v3176_v23 = vsel %vm13_vm2, %v5251_v32, %v3172_v9  ;;  %v3084_v21 = vsel %vm25_vm5, %v5228_v40, %v3080_v58  ;;  %v5265_v6 = vld [vmem:[%s10387_s0 + $0x29] sm:$0x1]  }
 0x10f   :  { %v5208_v14 = vld [vmem:[%s10387_s0 + $0x247] sm:$0x10]   ;;  %v3002_v24 = vsel %vm13_vm2, %v5207_v12, %v2998_v31  ;;  %v5253_v10 = vld [vmem:[%s10387_s0 + $0x2e5] sm:$0x20]   ;;  %v3237_v49 = vsel %vm5_vm0, %v5266_v36, %v5265_v6  ;;  %v3203_v59 = vsel %vm5_vm0, %v5258_v50, %v5257_v48  ;;  %v5261_v61 = vld [vmem:[%s10387_s0 + $0x205] sm:$0x10]  }
 0x110   :  { %v5209_v37 = vld [vmem:[%s10387_s0 + $0x2c6] sm:$0x20]   ;;  %v3006_v11 = vsel %vm17_vm3, %v5208_v14, %v3002_v24  ;;  %v5254_v12 = vld [vmem:[%s10387_s0 + $0x364] sm:$0x40]   ;;  %3123 = vrot.lane.b32.xlu1 %v3122_v2, %s5624_s26  ;;  %v3180_v24 = vsel %vm17_vm3, %v5252_v62, %v3176_v23  ;;  %v5262_v43 = vld [vmem:[%s10387_s0 + $0x284] sm:$0x20]   ;;  %v3207_v2 = vsel %vm9_vm1, %v5259_v52, %v3203_v59 }
 0x111   :  { %v5210_v15 = vld [vmem:[%s10387_s0 + $0x345] sm:$0x40]   ;;  %v3010_v19 = vsel %vm21_vm4, %v5209_v37, %v3006_v11  ;;  %v5255_v14 = vld [vmem:[%s10387_s0 + $0x3e3] sm:$0x80]   ;;  %v8805_v37 = vpop.permute.xlu1 %1803   ;;  %v3088_v11 = vsel %vm29_vm6, %v5229_v54, %v3084_v21  ;;  %v3184_v34 = vsel %vm21_vm4, %v5253_v10, %v3180_v24  ;;  %v5260_v54 = vld [vmem:[%s10387_s0 + $0x186] sm:$0x8]  }
 0x112   :  { %v5211_v17 = vld [vmem:[%s10387_s0 + $0x3c4] sm:$0x80]   ;;  %v3014_v8 = vsel %vm25_vm5, %v5210_v15, %v3010_v19  ;;  %v5239_v31 = vld [vmem:[%s10387_s0 + $0x4a] sm:$0x1]   ;;  %v8840_v19 = vpop.permute.xlu0 %1768   ;;  %v3188_v33 = vsel %vm25_vm5, %v5254_v12, %v3184_v34  ;;  %v5263_v5 = vld [vmem:[%s10387_s0 + $0x303] sm:$0x40]  }
 0x113   :  { %v3018_v38 = vsel %vm29_vm6, %v5211_v17, %v3014_v8  ;;  %v5240_v15 = vld [vmem:[%s10387_s0 + $0xc9] sm:$0x2]   ;;  %v5267_v8 = vld [vmem:[%s10387_s0 + $0x127] sm:$0x4]   ;;  %v3192_v60 = vsel %vm29_vm6, %v5255_v14, %v3188_v33  ;;  %v3211_v14 = vsel %vm13_vm2, %v5260_v54, %v3207_v2  ;;  %v5301_v48 = vld [vmem:[%s10387_s0 + $0xa7] sm:$0x2]  }
 0x114   :  { %3019 = vrot.lane.b32.xlu0 %v3018_v38, %s5623_s30  ;;  %v5241_v17 = vld [vmem:[%s10387_s0 + $0x148] sm:$0x4]   ;;  %v3133_v25 = vsel %vm5_vm0, %v5240_v15, %v5239_v31  ;;  %3193 = vrot.lane.b32.xlu1 %v3192_v60, %s5624_s26  ;;  %v3241_v38 = vsel %vm9_vm1, %v5267_v8, %v3237_v49  ;;  %v5264_v4 = vld [vmem:[%s10387_s0 + $0x382] sm:$0x80]   ;;  %v3215_v21 = vsel %vm17_vm3, %v5261_v61, %v3211_v14 }
 0x115   :  { %v5242_v29 = vld [vmem:[%s10387_s0 + $0x1c7] sm:$0x8]   ;;  %v3137_v45 = vsel %vm9_vm1, %v5241_v17, %v3133_v25  ;;  %v8882_v42 = vpop.permute.xlu1 %1872   ;;  %v3245_v40 = vsel %vm13_vm2, %v5268_v53, %v3241_v38  ;;  %v5283_v9 = vld [vmem:[%s10387_s0 + $0x69] sm:$0x1]   ;;  %4818 = vst.msk [vmem:[%s10388_s1 + $0x8] sm:$0xff] %vm1423_vm8, %v8438_v13   ;;  %1424 = vst.msk [vmem:[%s10388_s1] sm:$0xff] %vm1423_vm8, %v8475_v18  }
 0x116   :  { %v5243_v35 = vld [vmem:[%s10387_s0 + $0x246] sm:$0x10]   ;;  %v3141_v51 = vsel %vm13_vm2, %v5242_v29, %v3137_v45  ;;  %v3249_v56 = vsel %vm17_vm3, %v5269_v22, %v3245_v40  ;;  %v8919_v32 = vpop.permute.xlu0 %1838   ;;  %v5284_v10 = vld [vmem:[%s10387_s0 + $0xe8] sm:$0x2]   ;;  %4836 = vst.msk [vmem:[%s10388_s1 + $0x18] sm:$0xff] %vm1423_vm8, %v8501_v0   ;;  %4827 = vst.msk [vmem:[%s10388_s1 + $0x10] sm:$0xff] %vm1423_vm8, %v8536_v3  }
 0x117   :  { %v5244_v27 = vld [vmem:[%s10387_s0 + $0x2c5] sm:$0x20]   ;;  %v3145_v28 = vsel %vm17_vm3, %v5243_v35, %v3141_v51  ;;  %v3253_v62 = vsel %vm21_vm4, %v5270_v41, %v3249_v56  ;;  %v3307_v58 = vsel %vm5_vm0, %v5284_v10, %v5283_v9  ;;  %v5285_v23 = vld [vmem:[%s10387_s0 + $0x167] sm:$0x4]   ;;  %v5303_v3 = vld [vmem:[%s10387_s0 + $0x1a5] sm:$0x8]  }
 0x118   :  { %v5245_v47 = vld [vmem:[%s10387_s0 + $0x344] sm:$0x40]   ;;  %3089 = vrot.lane.b32.xlu0 %v3088_v11, %s5624_s26  ;;  %v3149_v46 = vsel %vm21_vm4, %v5244_v27, %v3145_v28  ;;  %v3257_v12 = vsel %vm25_vm5, %v5271_v57, %v3253_v62  ;;  %v5286_v31 = vld [vmem:[%s10387_s0 + $0x1e6] sm:$0x8]   ;;  %v3311_v24 = vsel %vm9_vm1, %v5285_v23, %v3307_v58  ;;  %v3219_v11 = vsel %vm21_vm4, %v5262_v43, %v3215_v21  ;;  %v5304_v40 = vld [vmem:[%s10387_s0 + $0x224] sm:$0x10]  }
 0x119   :  { %v5246_v1 = vld [vmem:[%s10387_s0 + $0x3c3] sm:$0x80]   ;;  %v3153_v16 = vsel %vm25_vm5, %v5245_v47, %v3149_v46  ;;  %v5287_v15 = vld [vmem:[%s10387_s0 + $0x265] sm:$0x10]   ;;  %v3261_v17 = vsel %vm29_vm6, %v5272_v7, %v3257_v12  ;;  %v8957_v27 = vpop.permute.xlu1 %1942   ;;  %v3315_v34 = vsel %vm13_vm2, %v5286_v31, %v3311_v24  ;;  %v3223_v33 = vsel %vm25_vm5, %v5263_v5, %v3219_v11  ;;  %v5300_v7 = vld [vmem:[%s10387_s0 + $0x28] sm:$0x1]  }
 0x11a   :  { %v3157_v55 = vsel %vm29_vm6, %v5246_v1, %v3153_v16  ;;  %v5288_v25 = vld [vmem:[%s10387_s0 + $0x2e4] sm:$0x20]   ;;  %3262 = vrot.lane.b32.xlu1 %v3261_v17, %s5625_s15  ;;  %v3319_v51 = vsel %vm17_vm3, %v5287_v15, %v3315_v34  ;;  %v8983_v28 = vpop.permute.xlu0 %1907   ;;  %v3227_v49 = vsel %vm29_vm6, %v5264_v4, %v3223_v33  ;;  %v5302_v16 = vld [vmem:[%s10387_s0 + $0x126] sm:$0x4]   ;;  %v3376_v0 = vsel %vm5_vm0, %v5301_v48, %v5300_v7 }
 0x11b   :  { %v5289_v29 = vld [vmem:[%s10387_s0 + $0x363] sm:$0x40]   ;;  %v3323_v53 = vsel %vm21_vm4, %v5288_v25, %v3319_v51  ;;  %v5305_v50 = vld [vmem:[%s10387_s0 + $0x2a3] sm:$0x20]   ;;  %4853 = vst.msk [vmem:[%s10388_s1 + $0x8] sm:$0xff] %vm1562_vm9, %v8590_v30   ;;  %1563 = vst.msk [vmem:[%s10388_s1] sm:$0xff] %vm1562_vm9, %v8615_v44  }
 0x11c   :  { %3158 = vrot.lane.b32.xlu0 %v3157_v55, %s5624_s26  ;;  %v5290_v35 = vld [vmem:[%s10387_s0 + $0x3e2] sm:$0x80]   ;;  %v3327_v38 = vsel %vm25_vm5, %v5289_v29, %v3323_v53  ;;  %v3380_v55 = vsel %vm9_vm1, %v5302_v16, %v3376_v0  ;;  %v5306_v56 = vld [vmem:[%s10387_s0 + $0x322] sm:$0x40]   ;;  %4871 = vst.msk [vmem:[%s10388_s1 + $0x18] sm:$0xff] %vm1562_vm9, %v8653_v26   ;;  %vm3647_vm8 = vcmask 228544  }
 0x11d   :  { %v5274_v45 = vld [vmem:[%s10387_s0 + $0x49] sm:$0x1]   ;;  %v3331_v13 = vsel %vm29_vm6, %v5290_v35, %v3327_v38  ;;  %v9034_v52 = vpop.permute.xlu1 %2011   ;;  %v5307_v59 = vld [vmem:[%s10387_s0 + $0x3a1] sm:$0x80]   ;;  %v3384_v5 = vsel %vm13_vm2, %v5303_v3, %v3380_v55  ;;  %4862 = vst.msk [vmem:[%s10388_s1 + $0x10] sm:$0xff] %vm1562_vm9, %v8688_v20   ;;  %vm3786_vm9 = vcmask 195744  }
 0x11e   :  { %v5275_v47 = vld [vmem:[%s10387_s0 + $0xc8] sm:$0x2]   ;;  %3332 = vrot.lane.b32.xlu1 %v3331_v13, %s5625_s15  ;;  %v5292_v61 = vld [vmem:[%s10387_s0 + $0x8] sm:$0x1]   ;;  %v3388_v10 = vsel %vm17_vm3, %v5304_v40, %v3384_v5  ;;  %v9071_v31 = vpop.permute.xlu0 %1977   ;;  %v5338_v20 = vld [vmem:[%s10387_s0 + $0x1a4] sm:$0x8]  }
 0x11f   :  { %v5276_v1 = vld [vmem:[%s10387_s0 + $0x147] sm:$0x4]   ;;  %v3272_v6 = vsel %vm5_vm0, %v5275_v47, %v5274_v45  ;;  %v5293_v62 = vld [vmem:[%s10387_s0 + $0x87] sm:$0x2]   ;;  %v3392_v15 = vsel %vm21_vm4, %v5305_v50, %v3388_v10  ;;  %v5339_v5 = vld [vmem:[%s10387_s0 + $0x223] sm:$0x10]  }
 0x120   :  { %v5277_v36 = vld [vmem:[%s10387_s0 + $0x1c6] sm:$0x8]   ;;  %v3276_v22 = vsel %vm9_vm1, %v5276_v1, %v3272_v6  ;;  %3228 = vrot.lane.b32.xlu0 %v3227_v49, %s5625_s15  ;;  %v5294_v2 = vld [vmem:[%s10387_s0 + $0x106] sm:$0x4]   ;;  %v3342_v12 = vsel %vm5_vm0, %v5293_v62, %v5292_v61  ;;  %v3396_v29 = vsel %vm25_vm5, %v5306_v56, %v3392_v15  ;;  %v5336_v61 = vld [vmem:[%s10387_s0 + $0xa6] sm:$0x2]  }
 0x121   :  { %v5278_v8 = vld [vmem:[%s10387_s0 + $0x245] sm:$0x10]   ;;  %v3280_v57 = vsel %vm13_vm2, %v5277_v36, %v3276_v22  ;;  %v5295_v4 = vld [vmem:[%s10387_s0 + $0x185] sm:$0x8]   ;;  %v3346_v17 = vsel %vm9_vm1, %v5294_v2, %v3342_v12  ;;  %v3400_v1 = vsel %vm29_vm6, %v5307_v59, %v3396_v29  ;;  %v5335_v59 = vld [vmem:[%s10387_s0 + $0x27] sm:$0x1]  }
 0x122   :  { %v5279_v60 = vld [vmem:[%s10387_s0 + $0x2c4] sm:$0x20]   ;;  %v3284_v18 = vsel %vm17_vm3, %v5278_v8, %v3280_v57  ;;  %v5296_v14 = vld [vmem:[%s10387_s0 + $0x204] sm:$0x10]   ;;  %v3350_v35 = vsel %vm13_vm2, %v5295_v4, %v3346_v17  ;;  %3401 = vrot.lane.b32.xlu1 %v3400_v1, %s5626_s19  ;;  %v3515_v26 = vsel %vm5_vm0, %v5336_v61, %v5335_v59  ;;  %v5340_v62 = vld [vmem:[%s10387_s0 + $0x2a2] sm:$0x20]  }
 0x123   :  { %v5280_v41 = vld [vmem:[%s10387_s0 + $0x343] sm:$0x40]   ;;  %v3288_v54 = vsel %vm21_vm4, %v5279_v60, %v3284_v18  ;;  %v5297_v58 = vld [vmem:[%s10387_s0 + $0x283] sm:$0x20]   ;;  %v3354_v33 = vsel %vm17_vm3, %v5296_v14, %v3350_v35  ;;  %v9109_v60 = vpop.permute.xlu1 %2081   ;;  %v9135_v18 = vpop.permute.xlu0 %2046   ;;  %v5341_v10 = vld [vmem:[%s10387_s0 + $0x321] sm:$0x40]  }
 0x124   :  { %v5281_v46 = vld [vmem:[%s10387_s0 + $0x3c2] sm:$0x80]   ;;  %v3292_v43 = vsel %vm25_vm5, %v5280_v41, %v3288_v54  ;;  %v5298_v23 = vld [vmem:[%s10387_s0 + $0x302] sm:$0x40]   ;;  %v3358_v49 = vsel %vm21_vm4, %v5297_v58, %v3354_v33  ;;  %v5342_v12 = vld [vmem:[%s10387_s0 + $0x3a0] sm:$0x80]  }
 0x125   :  { %v3296_v9 = vsel %vm29_vm6, %v5281_v46, %v3292_v43  ;;  %v5299_v21 = vld [vmem:[%s10387_s0 + $0x381] sm:$0x80]   ;;  %v3362_v38 = vsel %vm25_vm5, %v5298_v23, %v3358_v49  ;;  %v5337_v43 = vld [vmem:[%s10387_s0 + $0x125] sm:$0x4]   ;;  %4888 = vst.msk [vmem:[%s10388_s1 + $0x8] sm:$0xff] %vm1701_vm10, %v8742_v39   ;;  %1702 = vst.msk [vmem:[%s10388_s1] sm:$0xff] %vm1701_vm10, %v8767_v63  }
 0x126   :  { %3297 = vrot.lane.b32.xlu0 %v3296_v9, %s5625_s15  ;;  %v5318_v24 = vld [vmem:[%s10387_s0 + $0x68] sm:$0x1]   ;;  %v3366_v0 = vsel %vm29_vm6, %v5299_v21, %v3362_v38  ;;  %v3519_v9 = vsel %vm9_vm1, %v5337_v43, %v3515_v26  ;;  %v5327_v14 = vld [vmem:[%s10387_s0 + $0x7] sm:$0x1]   ;;  %4906 = vst.msk [vmem:[%s10388_s1 + $0x18] sm:$0xff] %vm1701_vm10, %v8805_v37  }
 0x127   :  { %v5319_v25 = vld [vmem:[%s10387_s0 + $0xe7] sm:$0x2]   ;;  %v9186_v2 = vpop.permute.xlu1 %2150   ;;  %v3523_v23 = vsel %vm13_vm2, %v5338_v20, %v3519_v9  ;;  %v5328_v15 = vld [vmem:[%s10387_s0 + $0x86] sm:$0x2]   ;;  %4897 = vst.msk [vmem:[%s10388_s1 + $0x10] sm:$0xff] %vm1701_vm10, %v8840_v19   ;;  %vm3925_vm10 = vcmask 162944  }
 0x128   :  { %v3446_v11 = vsel %vm5_vm0, %v5319_v25, %v5318_v24  ;;  %v5320_v34 = vld [vmem:[%s10387_s0 + $0x166] sm:$0x4]   ;;  %v5329_v17 = vld [vmem:[%s10387_s0 + $0x105] sm:$0x4]   ;;  %v3527_v25 = vsel %vm17_vm3, %v5339_v5, %v3523_v23  ;;  %v3481_v29 = vsel %vm5_vm0, %v5328_v15, %v5327_v14  ;;  %v5371_v14 = vld [vmem:[%s10387_s0 + $0xa5] sm:$0x2]  }
 0x129   :  { %v5321_v45 = vld [vmem:[%s10387_s0 + $0x1e5] sm:$0x8]   ;;  %v3450_v51 = vsel %vm9_vm1, %v5320_v34, %v3446_v11  ;;  %v5330_v21 = vld [vmem:[%s10387_s0 + $0x184] sm:$0x8]   ;;  %v3485_v1 = vsel %vm9_vm1, %v5329_v17, %v3481_v29  ;;  %v5373_v19 = vld [vmem:[%s10387_s0 + $0x1a3] sm:$0x8]  }
 0x12a   :  { %v5322_v47 = vld [vmem:[%s10387_s0 + $0x264] sm:$0x10]   ;;  %v3454_v53 = vsel %vm13_vm2, %v5321_v45, %v3450_v51  ;;  %3367 = vrot.lane.b32.xlu0 %v3366_v0, %s5626_s19  ;;  %v5331_v35 = vld [vmem:[%s10387_s0 + $0x203] sm:$0x10]   ;;  %v9223_v45 = vpop.permute.xlu0 %2116   ;;  %v5374_v23 = vld [vmem:[%s10387_s0 + $0x222] sm:$0x10]  }
 0x12b   :  { %v5323_v6 = vld [vmem:[%s10387_s0 + $0x2e3] sm:$0x20]   ;;  %v3458_v57 = vsel %vm17_vm3, %v5322_v47, %v3454_v53  ;;  %v5332_v11 = vld [vmem:[%s10387_s0 + $0x282] sm:$0x20]   ;;  %v3531_v47 = vsel %vm21_vm4, %v5340_v62, %v3527_v25  ;;  %v5375_v15 = vld [vmem:[%s10387_s0 + $0x2a1] sm:$0x20]  }
 0x12c   :  { %v5324_v36 = vld [vmem:[%s10387_s0 + $0x362] sm:$0x40]   ;;  %v3462_v3 = vsel %vm21_vm4, %v5323_v6, %v3458_v57  ;;  %v5333_v34 = vld [vmem:[%s10387_s0 + $0x301] sm:$0x40]   ;;  %v5376_v25 = vld [vmem:[%s10387_s0 + $0x320] sm:$0x40]  }
 0x12d   :  { %v5325_v8 = vld [vmem:[%s10387_s0 + $0x3e1] sm:$0x80]   ;;  %v3466_v55 = vsel %vm25_vm5, %v5324_v36, %v3462_v3  ;;  %v5334_v33 = vld [vmem:[%s10387_s0 + $0x380] sm:$0x80]   ;;  %v3535_v36 = vsel %vm25_vm5, %v5341_v10, %v3531_v47  ;;  %v5377_v29 = vld [vmem:[%s10387_s0 + $0x39f] sm:$0x80]  }
 0x12e   :  { %v5309_v22 = vld [vmem:[%s10387_s0 + $0x48] sm:$0x1]   ;;  %v3470_v30 = vsel %vm29_vm6, %v5325_v8, %v3466_v55  ;;  %v5353_v51 = vld [vmem:[%s10387_s0 + $0x67] sm:$0x1]   ;;  %v3489_v8 = vsel %vm13_vm2, %v5330_v21, %v3485_v1  ;;  %v3539_v38 = vsel %vm29_vm6, %v5342_v12, %v3535_v36  ;;  %v5370_v12 = vld [vmem:[%s10387_s0 + $0x26] sm:$0x1]  }
 0x12f   :  { %v5310_v41 = vld [vmem:[%s10387_s0 + $0xc7] sm:$0x2]   ;;  %3471 = vrot.lane.b32.xlu1 %v3470_v30, %s5626_s19  ;;  %v5354_v6 = vld [vmem:[%s10387_s0 + $0xe6] sm:$0x2]   ;;  %v3493_v57 = vsel %vm17_vm3, %v5331_v35, %v3489_v8  ;;  %v3654_v37 = vsel %vm5_vm0, %v5371_v14, %v5370_v12  ;;  %v5362_v35 = vld [vmem:[%s10387_s0 + $0x6] sm:$0x1]  }
 0x130   :  { %v5311_v46 = vld [vmem:[%s10387_s0 + $0x146] sm:$0x4]   ;;  %v3411_v7 = vsel %vm5_vm0, %v5310_v41, %v5309_v22  ;;  %v3585_v49 = vsel %vm5_vm0, %v5354_v6, %v5353_v51  ;;  %v5355_v53 = vld [vmem:[%s10387_s0 + $0x165] sm:$0x4]   ;;  %v3497_v0 = vsel %vm21_vm4, %v5332_v11, %v3493_v57  ;;  %v5363_v47 = vld [vmem:[%s10387_s0 + $0x85] sm:$0x2]  }
 0x131   :  { %v5312_v48 = vld [vmem:[%s10387_s0 + $0x1c5] sm:$0x8]   ;;  %v3415_v40 = vsel %vm9_vm1, %v5311_v46, %v3411_v7  ;;  %v5356_v22 = vld [vmem:[%s10387_s0 + $0x1e4] sm:$0x8]   ;;  %v9249_v46 = vpop.permute.xlu1 %2220   ;;  %v3589_v7 = vsel %vm9_vm1, %v5355_v53, %v3585_v49  ;;  %v3501_v55 = vsel %vm25_vm5, %v5333_v34, %v3497_v0  ;;  %v5364_v1 = vld [vmem:[%s10387_s0 + $0x104] sm:$0x4]   ;;  %v3620_v36 = vsel %vm5_vm0, %v5363_v47, %v5362_v35 }
 0x132   :  { %v5313_v16 = vld [vmem:[%s10387_s0 + $0x244] sm:$0x10]   ;;  %v3419_v56 = vsel %vm13_vm2, %v5312_v48, %v3415_v40  ;;  %v5357_v41 = vld [vmem:[%s10387_s0 + $0x263] sm:$0x10]   ;;  %v3593_v3 = vsel %vm13_vm2, %v5356_v22, %v3589_v7  ;;  %v3505_v26 = vsel %vm29_vm6, %v5334_v33, %v3501_v55  ;;  %v5365_v33 = vld [vmem:[%s10387_s0 + $0x183] sm:$0x8]  }
 0x133   :  { %v5314_v13 = vld [vmem:[%s10387_s0 + $0x2c3] sm:$0x20]   ;;  %v3423_v44 = vsel %vm17_vm3, %v5313_v16, %v3419_v56  ;;  %v5358_v48 = vld [vmem:[%s10387_s0 + $0x2e2] sm:$0x20]   ;;  %3540 = vrot.lane.b32.xlu1 %v3539_v38, %s5627_s7  ;;  %v3597_v56 = vsel %vm17_vm3, %v5357_v41, %v3593_v3  ;;  %v5366_v8 = vld [vmem:[%s10387_s0 + $0x202] sm:$0x10]   ;;  %v3624_v38 = vsel %vm9_vm1, %v5364_v1, %v3620_v36 }
 0x134   :  { %v5315_v50 = vld [vmem:[%s10387_s0 + $0x342] sm:$0x40]   ;;  %v3427_v4 = vsel %vm21_vm4, %v5314_v13, %v3423_v44  ;;  %v5359_v16 = vld [vmem:[%s10387_s0 + $0x361] sm:$0x40]   ;;  %v9287_v44 = vpop.permute.xlu0 %2185   ;;  %v3601_v20 = vsel %vm21_vm4, %v5358_v48, %v3597_v56  ;;  %v5367_v49 = vld [vmem:[%s10387_s0 + $0x281] sm:$0x20]  }
 0x135   :  { %v5316_v54 = vld [vmem:[%s10387_s0 + $0x3c1] sm:$0x80]   ;;  %v3431_v58 = vsel %vm25_vm5, %v5315_v50, %v3427_v4  ;;  %v5360_v13 = vld [vmem:[%s10387_s0 + $0x3e0] sm:$0x80]   ;;  %v3605_v9 = vsel %vm25_vm5, %v5359_v16, %v3601_v20  ;;  %v9338_v17 = vpop.permute.xlu1 %2289   ;;  %v5368_v53 = vld [vmem:[%s10387_s0 + $0x300] sm:$0x40]  }
 0x136   :  { %v3435_v24 = vsel %vm29_vm6, %v5316_v54, %v3431_v58  ;;  %v5344_v40 = vld [vmem:[%s10387_s0 + $0x47] sm:$0x1]   ;;  %v5372_v58 = vld [vmem:[%s10387_s0 + $0x124] sm:$0x4]   ;;  %v3609_v39 = vsel %vm29_vm6, %v5360_v13, %v3605_v9  ;;  %v3628_v13 = vsel %vm13_vm2, %v5365_v33, %v3624_v38  ;;  %4923 = vst.msk [vmem:[%s10388_s1 + $0x8] sm:$0xff] %vm1840_vm11, %v8882_v42   ;;  %1841 = vst.msk [vmem:[%s10388_s1] sm:$0xff] %vm1840_vm11, %v8919_v32  }
 0x137   :  { %3436 = vrot.lane.b32.xlu0 %v3435_v24, %s5626_s19  ;;  %v5345_v50 = vld [vmem:[%s10387_s0 + $0xc6] sm:$0x2]   ;;  %3610 = vrot.lane.b32.xlu1 %v3609_v39, %s5627_s7  ;;  %v3658_v24 = vsel %vm9_vm1, %v5372_v58, %v3654_v37  ;;  %v5369_v57 = vld [vmem:[%s10387_s0 + $0x37f] sm:$0x80]   ;;  %v3632_v55 = vsel %vm17_vm3, %v5366_v8, %v3628_v13 }
 0x138   :  { %v5346_v54 = vld [vmem:[%s10387_s0 + $0x145] sm:$0x4]   ;;  %v3550_v59 = vsel %vm5_vm0, %v5345_v50, %v5344_v40  ;;  %v3662_v34 = vsel %vm13_vm2, %v5373_v19, %v3658_v24  ;;  %v9375_v22 = vpop.permute.xlu0 %2255   ;;  %v5388_v7 = vld [vmem:[%s10387_s0 + $0x66] sm:$0x1]   ;;  %v5405_v24 = vld [vmem:[%s10387_s0 + $0x25] sm:$0x1]  }
 0x139   :  { %v5347_v61 = vld [vmem:[%s10387_s0 + $0x1c4] sm:$0x8]   ;;  %v3554_v5 = vsel %vm9_vm1, %v5346_v54, %v3550_v59  ;;  %v3666_v6 = vsel %vm17_vm3, %v5374_v23, %v3662_v34  ;;  %v5389_v48 = vld [vmem:[%s10387_s0 + $0xe5] sm:$0x2]   ;;  %4941 = vst.msk [vmem:[%s10388_s1 + $0x18] sm:$0xff] %vm1840_vm11, %v8957_v27   ;;  %4932 = vst.msk [vmem:[%s10388_s1 + $0x10] sm:$0xff] %vm1840_vm11, %v8983_v28  }
 0x13a   :  { %v5348_v43 = vld [vmem:[%s10387_s0 + $0x243] sm:$0x10]   ;;  %v3558_v10 = vsel %vm13_vm2, %v5347_v61, %v3554_v5  ;;  %v3670_v41 = vsel %vm21_vm4, %v5375_v15, %v3666_v6  ;;  %v3724_v0 = vsel %vm5_vm0, %v5389_v48, %v5388_v7  ;;  %v5390_v3 = vld [vmem:[%s10387_s0 + $0x164] sm:$0x4]   ;;  %v5408_v28 = vld [vmem:[%s10387_s0 + $0x1a2] sm:$0x8]  }
 0x13b   :  { %v5349_v30 = vld [vmem:[%s10387_s0 + $0x2c2] sm:$0x20]   ;;  %3506 = vrot.lane.b32.xlu0 %v3505_v26, %s5627_s7  ;;  %v3562_v63 = vsel %vm17_vm3, %v5348_v43, %v3558_v10  ;;  %v3674_v16 = vsel %vm25_vm5, %v5376_v25, %v3670_v41  ;;  %v5391_v40 = vld [vmem:[%s10387_s0 + $0x1e3] sm:$0x8]   ;;  %v3728_v56 = vsel %vm9_vm1, %v5390_v3, %v3724_v0  ;;  %v5406_v25 = vld [vmem:[%s10387_s0 + $0xa4] sm:$0x2]  }
 0x13c   :  { %v5350_v62 = vld [vmem:[%s10387_s0 + $0x341] sm:$0x40]   ;;  %v3566_v21 = vsel %vm21_vm4, %v5349_v30, %v3562_v63  ;;  %v5392_v50 = vld [vmem:[%s10387_s0 + $0x262] sm:$0x10]   ;;  %v3678_v54 = vsel %vm29_vm6, %v5377_v29, %v3674_v16  ;;  %v3636_v30 = vsel %vm21_vm4, %v5367_v49, %v3632_v55  ;;  %v3732_v26 = vsel %vm13_vm2, %v5391_v40, %v3728_v56  ;;  %v5407_v29 = vld [vmem:[%s10387_s0 + $0x123] sm:$0x4]  }
 0x13d   :  { %v5351_v4 = vld [vmem:[%s10387_s0 + $0x3c0] sm:$0x80]   ;;  %v3570_v11 = vsel %vm25_vm5, %v5350_v62, %v3566_v21  ;;  %v5393_v59 = vld [vmem:[%s10387_s0 + $0x2e1] sm:$0x20]   ;;  %3679 = vrot.lane.b32.xlu1 %v3678_v54, %s5628_s20  ;;  %v3736_v9 = vsel %vm17_vm3, %v5392_v50, %v3732_v26  ;;  %v3793_v27 = vsel %vm5_vm0, %v5406_v25, %v5405_v24  ;;  %v5409_v35 = vld [vmem:[%s10387_s0 + $0x221] sm:$0x10]  }
 0x13e   :  { %v3574_v51 = vsel %vm29_vm6, %v5351_v4, %v3570_v11  ;;  %v5394_v61 = vld [vmem:[%s10387_s0 + $0x360] sm:$0x40]   ;;  %v3640_v4 = vsel %vm25_vm5, %v5368_v53, %v3636_v30  ;;  %v3740_v63 = vsel %vm21_vm4, %v5393_v59, %v3736_v9  ;;  %v5410_v11 = vld [vmem:[%s10387_s0 + $0x2a0] sm:$0x20]   ;;  %v3797_v47 = vsel %vm9_vm1, %v5407_v29, %v3793_v27  ;;  %4958 = vst.msk [vmem:[%s10388_s1 + $0x8] sm:$0xff] %vm1979_vm12, %v9034_v52  }
 0x13f   :  { %3575 = vrot.lane.b32.xlu0 %v3574_v51, %s5627_s7  ;;  %v5395_v43 = vld [vmem:[%s10387_s0 + $0x3df] sm:$0x80]   ;;  %v3644_v39 = vsel %vm29_vm6, %v5369_v57, %v3640_v4  ;;  %v3744_v15 = vsel %vm25_vm5, %v5394_v61, %v3740_v63  ;;  %v5411_v1 = vld [vmem:[%s10387_s0 + $0x31f] sm:$0x40]   ;;  %v3801_v36 = vsel %vm13_vm2, %v5408_v28, %v3797_v47  ;;  %v9545_v30 = vpop.permute.xlu1 %2359   ;;  %v5442_v47 = vld [vmem:[%s10387_s0 + $0x122] sm:$0x4]  }
 0x140   :  { %v5379_v20 = vld [vmem:[%s10387_s0 + $0x46] sm:$0x1]   ;;  %v3748_v42 = vsel %vm29_vm6, %v5395_v43, %v3744_v15  ;;  %v5412_v33 = vld [vmem:[%s10387_s0 + $0x39e] sm:$0x80]   ;;  %v3805_v38 = vsel %vm17_vm3, %v5409_v35, %v3801_v36  ;;  %1980 = vst.msk [vmem:[%s10388_s1] sm:$0xff] %vm1979_vm12, %v9071_v31   ;;  %4976 = vst.msk [vmem:[%s10388_s1 + $0x18] sm:$0xff] %vm1979_vm12, %v9109_v60  }
 0x141   :  { %v5380_v5 = vld [vmem:[%s10387_s0 + $0xc5] sm:$0x2]   ;;  %3749 = vrot.lane.b32.xlu1 %v3748_v42, %s5628_s20  ;;  %v5397_v51 = vld [vmem:[%s10387_s0 + $0x5] sm:$0x1]   ;;  %v3809_v13 = vsel %vm21_vm4, %v5410_v11, %v3805_v38  ;;  %v5440_v11 = vld [vmem:[%s10387_s0 + $0x24] sm:$0x1]  }
 0x142   :  { %v5381_v62 = vld [vmem:[%s10387_s0 + $0x144] sm:$0x4]   ;;  %v3689_v10 = vsel %vm5_vm0, %v5380_v5, %v5379_v20  ;;  %v5398_v8 = vld [vmem:[%s10387_s0 + $0x84] sm:$0x2]   ;;  %v3813_v54 = vsel %vm25_vm5, %v5411_v1, %v3809_v13  ;;  %v9583_v24 = vpop.permute.xlu0 %2324   ;;  %4967 = vst.msk [vmem:[%s10388_s1 + $0x10] sm:$0xff] %vm1979_vm12, %v9135_v18   ;;  %vm4064_vm11 = vcmask 130144  }
 0x143   :  { %v5382_v12 = vld [vmem:[%s10387_s0 + $0x1c3] sm:$0x8]   ;;  %v3693_v37 = vsel %vm9_vm1, %v5381_v62, %v3689_v10  ;;  %3645 = vrot.lane.b32.xlu0 %v3644_v39, %s5628_s20  ;;  %v5399_v49 = vld [vmem:[%s10387_s0 + $0x103] sm:$0x4]   ;;  %v3759_v57 = vsel %vm5_vm0, %v5398_v8, %v5397_v51  ;;  %v3817_v26 = vsel %vm29_vm6, %v5412_v33, %v3813_v54  ;;  %v5443_v18 = vld [vmem:[%s10387_s0 + $0x1a1] sm:$0x8]  }
 0x144   :  { %v5383_v14 = vld [vmem:[%s10387_s0 + $0x242] sm:$0x10]   ;;  %v3697_v21 = vsel %vm13_vm2, %v5382_v12, %v3693_v37  ;;  %v5400_v53 = vld [vmem:[%s10387_s0 + $0x182] sm:$0x8]   ;;  %v3763_v0 = vsel %vm9_vm1, %v5399_v49, %v3759_v57  ;;  %v5444_v1 = vld [vmem:[%s10387_s0 + $0x220] sm:$0x10]  }
 0x145   :  { %v5384_v58 = vld [vmem:[%s10387_s0 + $0x2c1] sm:$0x20]   ;;  %v3701_v32 = vsel %vm17_vm3, %v5383_v14, %v3697_v21  ;;  %v5401_v7 = vld [vmem:[%s10387_s0 + $0x201] sm:$0x10]   ;;  %v3767_v55 = vsel %vm13_vm2, %v5400_v53, %v3763_v0  ;;  %3818 = vrot.lane.b32.xlu1 %v3817_v26, %s5629_s25  ;;  %v5445_v33 = vld [vmem:[%s10387_s0 + $0x29f] sm:$0x20]   ;;  %v9634_v51 = vpop.permute.xlu1 %2428  }
 0x146   :  { %v5385_v19 = vld [vmem:[%s10387_s0 + $0x340] sm:$0x40]   ;;  %v3705_v34 = vsel %vm21_vm4, %v5384_v58, %v3701_v32  ;;  %v5402_v48 = vld [vmem:[%s10387_s0 + $0x280] sm:$0x20]   ;;  %v3771_v20 = vsel %vm17_vm3, %v5401_v7, %v3767_v55  ;;  %v5446_v8 = vld [vmem:[%s10387_s0 + $0x31e] sm:$0x40]  }
 0x147   :  { %v5386_v23 = vld [vmem:[%s10387_s0 + $0x3bf] sm:$0x80]   ;;  %v3709_v6 = vsel %vm25_vm5, %v5385_v19, %v3705_v34  ;;  %v5403_v16 = vld [vmem:[%s10387_s0 + $0x2ff] sm:$0x40]   ;;  %v3775_v10 = vsel %vm21_vm4, %v5402_v48, %v3771_v20  ;;  %v5441_v34 = vld [vmem:[%s10387_s0 + $0xa3] sm:$0x2]  }
 0x148   :  { %v3713_v41 = vsel %vm29_vm6, %v5386_v23, %v3709_v6  ;;  %v5404_v3 = vld [vmem:[%s10387_s0 + $0x37e] sm:$0x80]   ;;  %v3779_v63 = vsel %vm25_vm5, %v5403_v16, %v3775_v10  ;;  %v3932_v60 = vsel %vm5_vm0, %v5441_v34, %v5440_v11  ;;  %v5447_v49 = vld [vmem:[%s10387_s0 + $0x39d] sm:$0x80]   ;;  %4993 = vst.msk [vmem:[%s10388_s1 + $0x8] sm:$0xff] %vm2118_vm13, %v9186_v2   ;;  %2119 = vst.msk [vmem:[%s10388_s1] sm:$0xff] %vm2118_vm13, %v9223_v45  }
 0x149   :  { %3714 = vrot.lane.b32.xlu0 %v3713_v41, %s5628_s20  ;;  %v5423_v40 = vld [vmem:[%s10387_s0 + $0x65] sm:$0x1]   ;;  %v3783_v25 = vsel %vm29_vm6, %v5404_v3, %v3779_v63  ;;  %v3936_v36 = vsel %vm9_vm1, %v5442_v47, %v3932_v60  ;;  %v5432_v53 = vld [vmem:[%s10387_s0 + $0x4] sm:$0x1]   ;;  %v9671_v54 = vpop.permute.xlu0 %2394   ;;  %5011 = vst.msk [vmem:[%s10388_s1 + $0x18] sm:$0xff] %vm2118_vm13, %v9249_v46   ;;  %vm4203_vm12 = vcmask 97344  }
 0x14a   :  { %v5424_v50 = vld [vmem:[%s10387_s0 + $0xe4] sm:$0x2]   ;;  %v3940_v38 = vsel %vm13_vm2, %v5443_v18, %v3936_v36  ;;  %v5433_v57 = vld [vmem:[%s10387_s0 + $0x83] sm:$0x2]   ;;  %v9697_v10 = vpop.permute.xlu1 %2498   ;;  %v5477_v36 = vld [vmem:[%s10387_s0 + $0x121] sm:$0x4]  }
 0x14b   :  { %v3863_v56 = vsel %vm5_vm0, %v5424_v50, %v5423_v40  ;;  %v5425_v59 = vld [vmem:[%s10387_s0 + $0x163] sm:$0x4]   ;;  %v5434_v7 = vld [vmem:[%s10387_s0 + $0x102] sm:$0x4]   ;;  %v3944_v13 = vsel %vm17_vm3, %v5444_v1, %v3940_v38  ;;  %v3898_v0 = vsel %vm5_vm0, %v5433_v57, %v5432_v53  ;;  %5002 = vst.msk [vmem:[%s10388_s1 + $0x10] sm:$0xff] %vm2118_vm13, %v9287_v44   ;;  %vm4342_vm13 = vcmask 64544  }
 0x14c   :  { %v5426_v61 = vld [vmem:[%s10387_s0 + $0x1e2] sm:$0x8]   ;;  %v3867_v5 = vsel %vm9_vm1, %v5425_v59, %v3863_v56  ;;  %v5435_v48 = vld [vmem:[%s10387_s0 + $0x181] sm:$0x8]   ;;  %v3948_v55 = vsel %vm21_vm4, %v5445_v33, %v3944_v13  ;;  %v3902_v56 = vsel %vm9_vm1, %v5434_v7, %v3898_v0  ;;  %v5475_v33 = vld [vmem:[%s10387_s0 + $0x23] sm:$0x1]  }
 0x14d   :  { %v5427_v43 = vld [vmem:[%s10387_s0 + $0x261] sm:$0x10]   ;;  %v3871_v12 = vsel %vm13_vm2, %v5426_v61, %v3867_v5  ;;  %3784 = vrot.lane.b32.xlu0 %v3783_v25, %s5629_s25  ;;  %v5436_v3 = vld [vmem:[%s10387_s0 + $0x200] sm:$0x10]   ;;  %v3952_v26 = vsel %vm25_vm5, %v5446_v8, %v3948_v55  ;;  %v3906_v20 = vsel %vm13_vm2, %v5435_v48, %v3902_v56  ;;  %v5478_v44 = vld [vmem:[%s10387_s0 + $0x1a0] sm:$0x8]  }
 0x14e   :  { %v5428_v62 = vld [vmem:[%s10387_s0 + $0x2e0] sm:$0x20]   ;;  %v3875_v37 = vsel %vm17_vm3, %v5427_v43, %v3871_v12  ;;  %v5437_v40 = vld [vmem:[%s10387_s0 + $0x27f] sm:$0x20]   ;;  %v3956_v12 = vsel %vm29_vm6, %v5447_v49, %v3952_v26  ;;  %v5479_v8 = vld [vmem:[%s10387_s0 + $0x21f] sm:$0x10]   ;;  %v9786_v53 = vpop.permute.xlu1 %2567  }
 0x14f   :  { %v5429_v4 = vld [vmem:[%s10387_s0 + $0x35f] sm:$0x40]   ;;  %v3879_v29 = vsel %vm21_vm4, %v5428_v62, %v3875_v37  ;;  %v5438_v50 = vld [vmem:[%s10387_s0 + $0x2fe] sm:$0x40]   ;;  %v5480_v49 = vld [vmem:[%s10387_s0 + $0x29e] sm:$0x20]  }
 0x150   :  { %v5430_v9 = vld [vmem:[%s10387_s0 + $0x3de] sm:$0x80]   ;;  %v3883_v28 = vsel %vm25_vm5, %v5429_v4, %v3879_v29  ;;  %v5439_v59 = vld [vmem:[%s10387_s0 + $0x37d] sm:$0x80]   ;;  %v5481_v57 = vld [vmem:[%s10387_s0 + $0x31d] sm:$0x40]  }
 0x151   :  { %v5414_v14 = vld [vmem:[%s10387_s0 + $0x45] sm:$0x1]   ;;  %v3887_v52 = vsel %vm29_vm6, %v5430_v9, %v3883_v28  ;;  %v5458_v61 = vld [vmem:[%s10387_s0 + $0x64] sm:$0x1]   ;;  %v5482_v7 = vld [vmem:[%s10387_s0 + $0x39c] sm:$0x80]  }
 0x152   :  { %v5415_v58 = vld [vmem:[%s10387_s0 + $0xc4] sm:$0x2]   ;;  %3888 = vrot.lane.b32.xlu1 %v3887_v52, %s5629_s25  ;;  %v5459_v43 = vld [vmem:[%s10387_s0 + $0xe3] sm:$0x2]   ;;  %v9735_v11 = vpop.permute.xlu0 %2463   ;;  %v5467_v48 = vld [vmem:[%s10387_s0 + $0x3] sm:$0x1]  }
 0x153   :  { %v5416_v39 = vld [vmem:[%s10387_s0 + $0x143] sm:$0x4]   ;;  %v3828_v19 = vsel %vm5_vm0, %v5415_v58, %v5414_v14  ;;  %v4002_v5 = vsel %vm5_vm0, %v5459_v43, %v5458_v61  ;;  %v5460_v62 = vld [vmem:[%s10387_s0 + $0x162] sm:$0x4]   ;;  %v3910_v14 = vsel %vm17_vm3, %v5436_v3, %v3906_v20  ;;  %v5468_v0 = vld [vmem:[%s10387_s0 + $0x82] sm:$0x2]  }
 0x154   :  { %v5417_v23 = vld [vmem:[%s10387_s0 + $0x1c2] sm:$0x8]   ;;  %v3832_v42 = vsel %vm9_vm1, %v5416_v39, %v3828_v19  ;;  %v5461_v4 = vld [vmem:[%s10387_s0 + $0x1e1] sm:$0x8]   ;;  %v4006_v58 = vsel %vm9_vm1, %v5460_v62, %v4002_v5  ;;  %v3914_v19 = vsel %vm21_vm4, %v5437_v40, %v3910_v14  ;;  %v5469_v3 = vld [vmem:[%s10387_s0 + $0x101] sm:$0x4]   ;;  %v4037_v56 = vsel %vm5_vm0, %v5468_v0, %v5467_v48 }
 0x155   :  { %v5418_v15 = vld [vmem:[%s10387_s0 + $0x241] sm:$0x10]   ;;  %v3836_v35 = vsel %vm13_vm2, %v5417_v23, %v3832_v42  ;;  %v5462_v9 = vld [vmem:[%s10387_s0 + $0x260] sm:$0x10]   ;;  %v4010_v23 = vsel %vm13_vm2, %v5461_v4, %v4006_v58  ;;  %v3918_v29 = vsel %vm25_vm5, %v5438_v50, %v3914_v19  ;;  %v5470_v40 = vld [vmem:[%s10387_s0 + $0x180] sm:$0x8]   ;;  %v4041_v5 = vsel %vm9_vm1, %v5469_v3, %v4037_v56 }
 0x156   :  { %v5419_v21 = vld [vmem:[%s10387_s0 + $0x2c0] sm:$0x20]   ;;  %v3840_v31 = vsel %vm17_vm3, %v5418_v15, %v3836_v35  ;;  %v5463_v39 = vld [vmem:[%s10387_s0 + $0x2df] sm:$0x20]   ;;  %3957 = vrot.lane.b32.xlu1 %v3956_v12, %s5630_s4  ;;  %v4014_v42 = vsel %vm17_vm3, %v5462_v9, %v4010_v23  ;;  %v3922_v34 = vsel %vm29_vm6, %v5439_v59, %v3918_v29  ;;  %v5471_v59 = vld [vmem:[%s10387_s0 + $0x1ff] sm:$0x10]   ;;  %v9823_v26 = vpop.permute.xlu0 %2533   ;;  %v4045_v14 = vsel %vm13_vm2, %v5470_v40, %v4041_v5 }
 0x157   :  { %v5420_v32 = vld [vmem:[%s10387_s0 + $0x33f] sm:$0x40]   ;;  %v3844_v6 = vsel %vm21_vm4, %v5419_v21, %v3840_v31  ;;  %v5464_v63 = vld [vmem:[%s10387_s0 + $0x35e] sm:$0x40]   ;;  %v4018_v47 = vsel %vm21_vm4, %v5463_v39, %v4014_v42  ;;  %v5472_v61 = vld [vmem:[%s10387_s0 + $0x27e] sm:$0x20]  }
 0x158   :  { %v5421_v27 = vld [vmem:[%s10387_s0 + $0x3be] sm:$0x80]   ;;  %v3848_v41 = vsel %vm25_vm5, %v5420_v32, %v3844_v6  ;;  %v5465_v37 = vld [vmem:[%s10387_s0 + $0x3dd] sm:$0x80]   ;;  %v4022_v18 = vsel %vm25_vm5, %v5464_v63, %v4018_v47  ;;  %v5476_v6 = vld [vmem:[%s10387_s0 + $0xa2] sm:$0x2]  }
 0x159   :  { %v3852_v16 = vsel %vm29_vm6, %v5421_v27, %v3848_v41  ;;  %v5449_v15 = vld [vmem:[%s10387_s0 + $0x44] sm:$0x1]   ;;  %v4026_v2 = vsel %vm29_vm6, %v5465_v37, %v4022_v18  ;;  %v4071_v46 = vsel %vm5_vm0, %v5476_v6, %v5475_v33  ;;  %v5473_v43 = vld [vmem:[%s10387_s0 + $0x2fd] sm:$0x40]   ;;  %5028 = vst.msk [vmem:[%s10388_s1 + $0x8] sm:$0xff] %vm2257_vm14, %v9338_v17   ;;  %2258 = vst.msk [vmem:[%s10388_s1] sm:$0xff] %vm2257_vm14, %v9375_v22  }
 0x15a   :  { %3853 = vrot.lane.b32.xlu0 %v3852_v16, %s5629_s25  ;;  %v5450_v21 = vld [vmem:[%s10387_s0 + $0xc3] sm:$0x2]   ;;  %4027 = vrot.lane.b32.xlu1 %v4026_v2, %s5630_s4  ;;  %v4075_v38 = vsel %vm9_vm1, %v5477_v36, %v4071_v46  ;;  %v5474_v62 = vld [vmem:[%s10387_s0 + $0x37c] sm:$0x80]  }
 0x15b   :  { %v5451_v25 = vld [vmem:[%s10387_s0 + $0x142] sm:$0x4]   ;;  %v3967_v32 = vsel %vm5_vm0, %v5450_v21, %v5449_v15  ;;  %v4079_v13 = vsel %vm13_vm2, %v5478_v44, %v4075_v38  ;;  %v5493_v4 = vld [vmem:[%s10387_s0 + $0x63] sm:$0x1]   ;;  %v9849_v19 = vpop.permute.xlu1 %2637   ;;  %v4049_v15 = vsel %vm17_vm3, %v5471_v59, %v4045_v14  ;;  %v5512_v38 = vld [vmem:[%s10387_s0 + $0x120] sm:$0x4]  }
 0x15c   :  { %v5452_v27 = vld [vmem:[%s10387_s0 + $0x1c1] sm:$0x8]   ;;  %v3971_v52 = vsel %vm9_vm1, %v5451_v25, %v3967_v32  ;;  %v4083_v55 = vsel %vm17_vm3, %v5479_v8, %v4079_v13  ;;  %v5494_v9 = vld [vmem:[%s10387_s0 + $0xe2] sm:$0x2]   ;;  %v4053_v32 = vsel %vm21_vm4, %v5472_v61, %v4049_v15  ;;  %5046 = vst.msk [vmem:[%s10388_s1 + $0x18] sm:$0xff] %vm2257_vm14, %v9545_v30   ;;  %5037 = vst.msk [vmem:[%s10388_s1 + $0x10] sm:$0xff] %vm2257_vm14, %v9583_v24  }
 0x15d   :  { %v5453_v28 = vld [vmem:[%s10387_s0 + $0x240] sm:$0x10]   ;;  %v3975_v1 = vsel %vm13_vm2, %v5452_v27, %v3971_v52  ;;  %v4087_v20 = vsel %vm21_vm4, %v5480_v49, %v4083_v55  ;;  %v4141_v58 = vsel %vm5_vm0, %v5494_v9, %v5493_v4  ;;  %v5495_v39 = vld [vmem:[%s10387_s0 + $0x161] sm:$0x4]   ;;  %v4057_v47 = vsel %vm25_vm5, %v5473_v43, %v4053_v32  ;;  %v5510_v49 = vld [vmem:[%s10387_s0 + $0x22] sm:$0x1]  }
 0x15e   :  { %v5454_v35 = vld [vmem:[%s10387_s0 + $0x2bf] sm:$0x20]   ;;  %3923 = vrot.lane.b32.xlu0 %v3922_v34, %s5630_s4  ;;  %v3979_v45 = vsel %vm17_vm3, %v5453_v28, %v3975_v1  ;;  %v4091_v12 = vsel %vm25_vm5, %v5481_v57, %v4087_v20  ;;  %v5496_v63 = vld [vmem:[%s10387_s0 + $0x1e0] sm:$0x8]   ;;  %v4145_v21 = vsel %vm9_vm1, %v5495_v39, %v4141_v58  ;;  %v4061_v6 = vsel %vm29_vm6, %v5474_v62, %v4057_v47  ;;  %v5513_v24 = vld [vmem:[%s10387_s0 + $0x19f] sm:$0x8]  }
 0x15f   :  { %v5455_v31 = vld [vmem:[%s10387_s0 + $0x33e] sm:$0x40]   ;;  %v3983_v41 = vsel %vm21_vm4, %v5454_v35, %v3979_v45  ;;  %v5497_v37 = vld [vmem:[%s10387_s0 + $0x25f] sm:$0x10]   ;;  %v4095_v23 = vsel %vm29_vm6, %v5482_v7, %v4091_v12  ;;  %v4149_v27 = vsel %vm13_vm2, %v5496_v63, %v4145_v21  ;;  %v5514_v57 = vld [vmem:[%s10387_s0 + $0x21e] sm:$0x10]   ;;  %v9938_v48 = vpop.permute.xlu1 %2706  }
 0x160   :  { %v5456_v60 = vld [vmem:[%s10387_s0 + $0x3bd] sm:$0x80]   ;;  %v3987_v16 = vsel %vm25_vm5, %v5455_v31, %v3983_v41  ;;  %v5498_v25 = vld [vmem:[%s10387_s0 + $0x2de] sm:$0x20]   ;;  %4096 = vrot.lane.b32.xlu1 %v4095_v23, %s5631_s12  ;;  %v4153_v52 = vsel %vm17_vm3, %v5497_v37, %v4149_v27  ;;  %v5511_v41 = vld [vmem:[%s10387_s0 + $0xa1] sm:$0x2]  }
 0x161   :  { %v3991_v50 = vsel %vm29_vm6, %v5456_v60, %v3987_v16  ;;  %v5499_v29 = vld [vmem:[%s10387_s0 + $0x35d] sm:$0x40]   ;;  %v4157_v36 = vsel %vm21_vm4, %v5498_v25, %v4153_v52  ;;  %v4210_v30 = vsel %vm5_vm0, %v5511_v41, %v5510_v49  ;;  %v5515_v7 = vld [vmem:[%s10387_s0 + $0x29d] sm:$0x20]   ;;  %5063 = vst.msk [vmem:[%s10388_s1 + $0x8] sm:$0xff] %vm2396_vm15, %v9634_v51   ;;  %2397 = vst.msk [vmem:[%s10388_s1] sm:$0xff] %vm2396_vm15, %v9671_v54  }
 0x162   :  { %3992 = vrot.lane.b32.xlu0 %v3991_v50, %s5630_s4  ;;  %v5500_v42 = vld [vmem:[%s10387_s0 + $0x3dc] sm:$0x80]   ;;  %v4161_v44 = vsel %vm25_vm5, %v5499_v29, %v4157_v36  ;;  %v4214_v13 = vsel %vm9_vm1, %v5512_v38, %v4210_v30  ;;  %v5516_v0 = vld [vmem:[%s10387_s0 + $0x31c] sm:$0x40]   ;;  %5081 = vst.msk [vmem:[%s10388_s1 + $0x18] sm:$0xff] %vm2396_vm15, %v9697_v10  }
 0x163   :  { %v5484_v28 = vld [vmem:[%s10387_s0 + $0x43] sm:$0x1]   ;;  %v9887_v33 = vpop.permute.xlu0 %2602   ;;  %v4165_v17 = vsel %vm29_vm6, %v5500_v42, %v4161_v44  ;;  %v5517_v3 = vld [vmem:[%s10387_s0 + $0x39b] sm:$0x80]   ;;  %v4218_v55 = vsel %vm13_vm2, %v5513_v24, %v4214_v13  ;;  %v10001_v32 = vpop.permute.xlu1 %2776   ;;  %v5547_v13 = vld [vmem:[%s10387_s0 + $0x11f] sm:$0x4]  }
 0x164   :  { %v5485_v35 = vld [vmem:[%s10387_s0 + $0xc2] sm:$0x2]   ;;  %4166 = vrot.lane.b32.xlu1 %v4165_v17, %s5631_s12  ;;  %v5502_v40 = vld [vmem:[%s10387_s0 + $0x2] sm:$0x1]   ;;  %v4222_v20 = vsel %vm17_vm3, %v5514_v57, %v4218_v55  ;;  %5072 = vst.msk [vmem:[%s10388_s1 + $0x10] sm:$0xff] %vm2396_vm15, %v9735_v11  }
 0x165   :  { %v5486_v34 = vld [vmem:[%s10387_s0 + $0x141] sm:$0x4]   ;;  %v4106_v31 = vsel %vm5_vm0, %v5485_v35, %v5484_v28  ;;  %v5503_v56 = vld [vmem:[%s10387_s0 + $0x81] sm:$0x2]   ;;  %v4226_v14 = vsel %vm21_vm4, %v5515_v7, %v4222_v20  ;;  %v5545_v7 = vld [vmem:[%s10387_s0 + $0x21] sm:$0x1]  }
 0x166   :  { %v5487_v60 = vld [vmem:[%s10387_s0 + $0x1c0] sm:$0x8]   ;;  %v4110_v2 = vsel %vm9_vm1, %v5486_v34, %v4106_v31  ;;  %4062 = vrot.lane.b32.xlu0 %v4061_v6, %s5631_s12  ;;  %v5504_v59 = vld [vmem:[%s10387_s0 + $0x100] sm:$0x4]   ;;  %v4176_v5 = vsel %vm5_vm0, %v5503_v56, %v5502_v40  ;;  %v4230_v23 = vsel %vm25_vm5, %v5516_v0, %v4226_v14  ;;  %v5548_v11 = vld [vmem:[%s10387_s0 + $0x19e] sm:$0x8]  }
 0x167   :  { %v5488_v18 = vld [vmem:[%s10387_s0 + $0x23f] sm:$0x10]   ;;  %v4114_v8 = vsel %vm13_vm2, %v5487_v60, %v4110_v2  ;;  %v5505_v61 = vld [vmem:[%s10387_s0 + $0x17f] sm:$0x8]   ;;  %v9975_v12 = vpop.permute.xlu0 %2672   ;;  %v4180_v58 = vsel %vm9_vm1, %v5504_v59, %v4176_v5  ;;  %v4234_v27 = vsel %vm29_vm6, %v5517_v3, %v4230_v23  ;;  %v5549_v0 = vld [vmem:[%s10387_s0 + $0x21d] sm:$0x10]  }
 0x168   :  { %v5489_v1 = vld [vmem:[%s10387_s0 + $0x2be] sm:$0x20]   ;;  %v4118_v22 = vsel %vm17_vm3, %v5488_v18, %v4114_v8  ;;  %v5506_v62 = vld [vmem:[%s10387_s0 + $0x1fe] sm:$0x10]   ;;  %v4184_v15 = vsel %vm13_vm2, %v5505_v61, %v4180_v58  ;;  %4235 = vrot.lane.b32.xlu1 %v4234_v27, %s5632_s10  ;;  %v5550_v55 = vld [vmem:[%s10387_s0 + $0x29c] sm:$0x20]  }
 0x169   :  { %v5490_v45 = vld [vmem:[%s10387_s0 + $0x33d] sm:$0x40]   ;;  %v4122_v16 = vsel %vm21_vm4, %v5489_v1, %v4118_v22  ;;  %v5507_v4 = vld [vmem:[%s10387_s0 + $0x27d] sm:$0x20]   ;;  %v4188_v28 = vsel %vm17_vm3, %v5506_v62, %v4184_v15  ;;  %v10087_v3 = vpop.permute.xlu1 %2845   ;;  %v5551_v56 = vld [vmem:[%s10387_s0 + $0x31b] sm:$0x40]  }
 0x16a   :  { %v5491_v46 = vld [vmem:[%s10387_s0 + $0x3bc] sm:$0x80]   ;;  %v4126_v50 = vsel %vm25_vm5, %v5490_v45, %v4122_v16  ;;  %v5508_v9 = vld [vmem:[%s10387_s0 + $0x2fc] sm:$0x40]   ;;  %v4192_v31 = vsel %vm21_vm4, %v5507_v4, %v4188_v28  ;;  %v5546_v16 = vld [vmem:[%s10387_s0 + $0xa0] sm:$0x2]  }
 0x16b   :  { %v4130_v43 = vsel %vm29_vm6, %v5491_v46, %v4126_v50  ;;  %v5509_v39 = vld [vmem:[%s10387_s0 + $0x37b] sm:$0x80]   ;;  %v4196_v36 = vsel %vm25_vm5, %v5508_v9, %v4192_v31  ;;  %v10039_v49 = vpop.permute.xlu0 %2741   ;;  %v4349_v10 = vsel %vm5_vm0, %v5546_v16, %v5545_v7  ;;  %v5537_v59 = vld [vmem:[%s10387_s0 + $0x1] sm:$0x1]  }
 0x16c   :  { %4131 = vrot.lane.b32.xlu0 %v4130_v43, %s5631_s12  ;;  %v5528_v63 = vld [vmem:[%s10387_s0 + $0x62] sm:$0x1]   ;;  %v4200_v41 = vsel %vm29_vm6, %v5509_v39, %v4196_v36  ;;  %v4353_v50 = vsel %vm9_vm1, %v5547_v13, %v4349_v10  ;;  %v5538_v20 = vld [vmem:[%s10387_s0 + $0x80] sm:$0x2]  }
 0x16d   :  { %v5529_v37 = vld [vmem:[%s10387_s0 + $0xe1] sm:$0x2]   ;;  %v4357_v43 = vsel %vm13_vm2, %v5548_v11, %v4353_v50  ;;  %v5539_v5 = vld [vmem:[%s10387_s0 + $0xff] sm:$0x4]   ;;  %v4315_v58 = vsel %vm5_vm0, %v5538_v20, %v5537_v59 }
 0x16e   :  { %v4280_v21 = vsel %vm5_vm0, %v5529_v37, %v5528_v63  ;;  %v5530_v25 = vld [vmem:[%s10387_s0 + $0x160] sm:$0x4]   ;;  %v5540_v62 = vld [vmem:[%s10387_s0 + $0x17e] sm:$0x8]   ;;  %v4361_v9 = vsel %vm17_vm3, %v5549_v0, %v4357_v43  ;;  %v4319_v15 = vsel %vm9_vm1, %v5539_v5, %v4315_v58 }
 0x16f   :  { %v5531_v29 = vld [vmem:[%s10387_s0 + $0x1df] sm:$0x8]   ;;  %v4284_v35 = vsel %vm9_vm1, %v5530_v25, %v4280_v21  ;;  %v5552_v14 = vld [vmem:[%s10387_s0 + $0x39a] sm:$0x80]   ;;  %v2812_v37 = vpop.permute.xlu0 %2811   ;;  %v4365_v23 = vsel %vm21_vm4, %v5550_v55, %v4361_v9  ;;  %v4323_v27 = vsel %vm13_vm2, %v5540_v62, %v4319_v15 }
 0x170   :  { %v5532_v42 = vld [vmem:[%s10387_s0 + $0x25e] sm:$0x10]   ;;  %v4288_v60 = vsel %vm13_vm2, %v5531_v29, %v4284_v35  ;;  %4201 = vrot.lane.b32.xlu0 %v4200_v41, %s5632_s10  ;;  %v5541_v39 = vld [vmem:[%s10387_s0 + $0x1fd] sm:$0x10]  }
 0x171   :  { %v5533_v34 = vld [vmem:[%s10387_s0 + $0x2dd] sm:$0x20]   ;;  %v4292_v2 = vsel %vm17_vm3, %v5532_v42, %v4288_v60  ;;  %v5542_v63 = vld [vmem:[%s10387_s0 + $0x27c] sm:$0x20]   ;;  %v4369_v42 = vsel %vm25_vm5, %v5551_v56, %v4365_v23  ;;  %v4327_v60 = vsel %vm17_vm3, %v5541_v39, %v4323_v27 }
 0x172   :  { %v5534_v47 = vld [vmem:[%s10387_s0 + $0x35c] sm:$0x40]   ;;  %v4296_v38 = vsel %vm21_vm4, %v5533_v34, %v4292_v2  ;;  %v5543_v21 = vld [vmem:[%s10387_s0 + $0x2fb] sm:$0x40]   ;;  %v4373_v31 = vsel %vm29_vm6, %v5552_v14, %v4369_v42  ;;  %v4331_v2 = vsel %vm21_vm4, %v5542_v63, %v4327_v60 }
 0x173   :  { %v5535_v52 = vld [vmem:[%s10387_s0 + $0x3db] sm:$0x80]   ;;  %v4300_v24 = vsel %vm25_vm5, %v5534_v47, %v4296_v38  ;;  %v5563_v25 = vld [vmem:[%s10387_s0 + $0x61] sm:$0x1]   ;;  %v4335_v41 = vsel %vm25_vm5, %v5543_v21, %v4331_v2 }
 0x174   :  { %v5519_v18 = vld [vmem:[%s10387_s0 + $0x42] sm:$0x1]   ;;  %v4304_v51 = vsel %vm29_vm6, %v5535_v52, %v4300_v24  ;;  %v5564_v29 = vld [vmem:[%s10387_s0 + $0xe0] sm:$0x2]   ;;  %v2916_v52 = vpop.permute.xlu1 %2915  }
 0x175   :  { %v5520_v1 = vld [vmem:[%s10387_s0 + $0xc1] sm:$0x2]   ;;  %4305 = vrot.lane.b32.xlu1 %v4304_v51, %s5632_s10  ;;  %v4419_v28 = vsel %vm5_vm0, %v5564_v29, %v5563_v25  ;;  %v5565_v35 = vld [vmem:[%s10387_s0 + $0x15f] sm:$0x4]  }
 0x176   :  { %v5521_v6 = vld [vmem:[%s10387_s0 + $0x140] sm:$0x4]   ;;  %v4245_v45 = vsel %vm5_vm0, %v5520_v1, %v5519_v18  ;;  %v5566_v34 = vld [vmem:[%s10387_s0 + $0x1de] sm:$0x8]   ;;  %v4423_v1 = vsel %vm9_vm1, %v5565_v35, %v4419_v28 }
 0x177   :  { %v5522_v46 = vld [vmem:[%s10387_s0 + $0x1bf] sm:$0x8]   ;;  %v4249_v17 = vsel %vm9_vm1, %v5521_v6, %v4245_v45  ;;  %v5567_v47 = vld [vmem:[%s10387_s0 + $0x25d] sm:$0x10]   ;;  %v4427_v45 = vsel %vm13_vm2, %v5566_v34, %v4423_v1 }
 0x178   :  { %v5523_v44 = vld [vmem:[%s10387_s0 + $0x23e] sm:$0x10]   ;;  %v4253_v57 = vsel %vm13_vm2, %v5522_v46, %v4249_v17  ;;  %v5544_v18 = vld [vmem:[%s10387_s0 + $0x37a] sm:$0x80]   ;;  %v4431_v38 = vsel %vm17_vm3, %v5567_v47, %v4427_v45 }
 0x179   :  { %v5524_v8 = vld [vmem:[%s10387_s0 + $0x2bd] sm:$0x20]   ;;  %v4257_v54 = vsel %vm17_vm3, %v5523_v44, %v4253_v57  ;;  %v5568_v6 = vld [vmem:[%s10387_s0 + $0x2dc] sm:$0x20]   ;;  %4374 = vrot.lane.b32.xlu1 %v4373_v31, %s5633_s13  ;;  %v2881_v57 = vpop.permute.xlu0 %2880   ;;  %v4339_v7 = vsel %vm29_vm6, %v5544_v18, %v4335_v41 }
 0x17a   :  { %v5525_v22 = vld [vmem:[%s10387_s0 + $0x33c] sm:$0x40]   ;;  %v4261_v40 = vsel %vm21_vm4, %v5524_v8, %v4257_v54  ;;  %v5569_v36 = vld [vmem:[%s10387_s0 + $0x35b] sm:$0x40]   ;;  %v4435_v16 = vsel %vm21_vm4, %v5568_v6, %v4431_v38 }
 0x17b   :  { %v5526_v30 = vld [vmem:[%s10387_s0 + $0x3bb] sm:$0x80]   ;;  %v4265_v61 = vsel %vm25_vm5, %v5525_v22, %v4261_v40  ;;  %v5554_v46 = vld [vmem:[%s10387_s0 + $0x41] sm:$0x1]   ;;  %v4439_v54 = vsel %vm25_vm5, %v5569_v36, %v4435_v16 }
 0x17c   :  { %v4269_v4 = vsel %vm29_vm6, %v5526_v30, %v4265_v61  ;;  %v5555_v44 = vld [vmem:[%s10387_s0 + $0xc0] sm:$0x2]  }
 0x17d   :  { %4270 = vrot.lane.b32.xlu0 %v4269_v4, %s5632_s10  ;;  %v5556_v8 = vld [vmem:[%s10387_s0 + $0x13f] sm:$0x4]   ;;  %v4384_v22 = vsel %vm5_vm0, %v5555_v44, %v5554_v46  ;;  %vm2535_vm0 = vcmask 490944  }
 0x17e   :  { %v5570_v17 = vld [vmem:[%s10387_s0 + $0x3da] sm:$0x80]   ;;  %v4388_v13 = vsel %vm9_vm1, %v5556_v8, %v4384_v22  ;;  %5098 = vst.msk [vmem:[%s10388_s1 + $0x8] sm:$0xff] %vm2535_vm0, %v9786_v53   ;;  %2536 = vst.msk [vmem:[%s10388_s1] sm:$0xff] %vm2535_vm0, %v9823_v26   ;;  %vm2674_vm1 = vcmask 458144  }
 0x17f   :  { %v5557_v30 = vld [vmem:[%s10387_s0 + $0x1be] sm:$0x8]   ;;  %5116 = vst.msk [vmem:[%s10388_s1 + $0x18] sm:$0xff] %vm2535_vm0, %v9849_v19   ;;  %5107 = vst.msk [vmem:[%s10388_s1 + $0x10] sm:$0xff] %vm2535_vm0, %v9887_v33   ;;  %v4443_v53 = vsel %vm29_vm6, %v5570_v17, %v4439_v54  ;;  %v2985_v33 = vpop.permute.xlu1 %2984  }
 0x180   :  { %v5558_v24 = vld [vmem:[%s10387_s0 + $0x23d] sm:$0x10]   ;;  %v4392_v10 = vsel %vm13_vm2, %v5557_v30, %v4388_v13  ;;  %vm2813_vm2 = vcmask 425344   ;;  %5133 = vst.msk [vmem:[%s10388_s1 + $0x8] sm:$0xff] %vm2674_vm1, %v9938_v48   ;;  %2675 = vst.msk [vmem:[%s10388_s1] sm:$0xff] %vm2674_vm1, %v9975_v12   ;;  %4444 = vrot.lane.b32.xlu1 %v4443_v53, %s5633_s13 }
 0x181   :  { %v5559_v51 = vld [vmem:[%s10387_s0 + $0x2bc] sm:$0x20]   ;;  %4340 = vrot.lane.b32.xlu0 %v4339_v7, %s5633_s13  ;;  %v4396_v26 = vsel %vm17_vm3, %v5558_v24, %v4392_v10  ;;  %5151 = vst.msk [vmem:[%s10388_s1 + $0x18] sm:$0xff] %vm2674_vm1, %v10001_v32   ;;  %5142 = vst.msk [vmem:[%s10388_s1 + $0x10] sm:$0xff] %vm2674_vm1, %v10039_v49   ;;  %vm2952_vm3 = vcmask 392544   ;;  %v2951_v49 = vpop.permute.xlu0 %2950  }
 0x182   :  { %v5560_v11 = vld [vmem:[%s10387_s0 + $0x33b] sm:$0x40]   ;;  %v4400_v48 = vsel %vm21_vm4, %v5559_v51, %v4396_v26  ;;  %5168 = vst.msk [vmem:[%s10388_s1 + $0x8] sm:$0xff] %vm2813_vm2, %v10087_v3   ;;  %2814 = vst.msk [vmem:[%s10388_s1] sm:$0xff] %vm2813_vm2, %v2812_v37   ;;  %vm3091_vm4 = vcmask 359744  }
 0x183   :  { %v5561_v19 = vld [vmem:[%s10387_s0 + $0x3ba] sm:$0x80]   ;;  %5186 = vst.msk [vmem:[%s10388_s1 + $0x18] sm:$0xff] %vm2813_vm2, %v2916_v52   ;;  %5177 = vst.msk [vmem:[%s10388_s1 + $0x10] sm:$0xff] %vm2813_vm2, %v2881_v57   ;;  %v4404_v12 = vsel %vm25_vm5, %v5560_v11, %v4400_v48  ;;  %v3055_v0 = vpop.permute.xlu1 %3054   ;;  %vm3230_vm5 = vcmask 326944  }
 0x184   :  { %5203 = vst.msk [vmem:[%s10388_s1 + $0x8] sm:$0xff] %vm2952_vm3, %v2985_v33   ;;  %v4408_v32 = vsel %vm29_vm6, %v5561_v19, %v4404_v12  ;;  %2953 = vst.msk [vmem:[%s10388_s1] sm:$0xff] %vm2952_vm3, %v2951_v49   ;;  %vm3369_vm6 = vcmask 294144  }
 0x185   :  { %4409 = vrot.lane.b32.xlu0 %v4408_v32, %s5633_s13  ;;  %5221 = vst.msk [vmem:[%s10388_s1 + $0x18] sm:$0xff] %vm2952_vm3, %v3055_v0  }
 0x186   :  { %v3020_v3 = vpop.permute.xlu0 %3019  }
 0x187   :  { %5212 = vst.msk [vmem:[%s10388_s1 + $0x10] sm:$0xff] %vm2952_vm3, %v3020_v3   ;;  %v3124_v40 = vpop.permute.xlu1 %3123  }
 0x188   :  { %5238 = vst.msk [vmem:[%s10388_s1 + $0x8] sm:$0xff] %vm3091_vm4, %v3124_v40  }
 0x18a   :  { %v3090_v50 = vpop.permute.xlu0 %3089  }
 0x18b   :  { %3092 = vst.msk [vmem:[%s10388_s1] sm:$0xff] %vm3091_vm4, %v3090_v50   ;;  %v3194_v55 = vpop.permute.xlu1 %3193  }
 0x18c   :  { %5256 = vst.msk [vmem:[%s10388_s1 + $0x18] sm:$0xff] %vm3091_vm4, %v3194_v55  }
 0x18e   :  { %v3159_v56 = vpop.permute.xlu0 %3158  }
 0x18f   :  { %5247 = vst.msk [vmem:[%s10388_s1 + $0x10] sm:$0xff] %vm3091_vm4, %v3159_v56   ;;  %v3263_v59 = vpop.permute.xlu1 %3262  }
 0x190   :  { %5273 = vst.msk [vmem:[%s10388_s1 + $0x8] sm:$0xff] %vm3230_vm5, %v3263_v59  }
 0x192   :  { %v3229_v61 = vpop.permute.xlu0 %3228  }
 0x193   :  { %3231 = vst.msk [vmem:[%s10388_s1] sm:$0xff] %vm3230_vm5, %v3229_v61   ;;  %v3333_v43 = vpop.permute.xlu1 %3332  }
 0x194   :  { %5291 = vst.msk [vmem:[%s10388_s1 + $0x18] sm:$0xff] %vm3230_vm5, %v3333_v43  }
 0x197   :  { %v3402_v5 = vpop.permute.xlu1 %3401  }
 0x198   :  { %v3298_v20 = vpop.permute.xlu0 %3297   ;;  %5308 = vst.msk [vmem:[%s10388_s1 + $0x8] sm:$0xff] %vm3369_vm6, %v3402_v5  }
 0x199   :  { %5282 = vst.msk [vmem:[%s10388_s1 + $0x10] sm:$0xff] %vm3230_vm5, %v3298_v20  }
 0x19c   :  { %v3368_v62 = vpop.permute.xlu0 %3367  }
 0x19d   :  { %3370 = vst.msk [vmem:[%s10388_s1] sm:$0xff] %vm3369_vm6, %v3368_v62  }
 0x1a1   :  { %v3472_v4 = vpop.permute.xlu1 %3471  }
 0x1a2   :  { %5326 = vst.msk [vmem:[%s10388_s1 + $0x18] sm:$0xff] %vm3369_vm6, %v3472_v4  }
 0x1a5   :  { %v3541_v14 = vpop.permute.xlu1 %3540  }
 0x1a6   :  { %5343 = vst.msk [vmem:[%s10388_s1 + $0x8] sm:$0xff] %vm3508_vm7, %v3541_v14  }
 0x1a9   :  { %v3437_v9 = vpop.permute.xlu0 %3436   ;;  %v3611_v39 = vpop.permute.xlu1 %3610  }
 0x1aa   :  { %5317 = vst.msk [vmem:[%s10388_s1 + $0x10] sm:$0xff] %vm3369_vm6, %v3437_v9  }
 0x1ab   :  { %5361 = vst.msk [vmem:[%s10388_s1 + $0x18] sm:$0xff] %vm3508_vm7, %v3611_v39  }
 0x1ad   :  { %v3507_v58 = vpop.permute.xlu0 %3506  }
 0x1ae   :  { %3509 = vst.msk [vmem:[%s10388_s1] sm:$0xff] %vm3508_vm7, %v3507_v58  }
 0x1af   :  { %v3680_v37 = vpop.permute.xlu1 %3679  }
 0x1b0   :  { %5378 = vst.msk [vmem:[%s10388_s1 + $0x8] sm:$0xff] %vm3647_vm8, %v3680_v37  }
 0x1b1   :  { %v3576_v63 = vpop.permute.xlu0 %3575  }
 0x1b2   :  { %5352 = vst.msk [vmem:[%s10388_s1 + $0x10] sm:$0xff] %vm3508_vm7, %v3576_v63  }
 0x1b3   :  { %v3750_v15 = vpop.permute.xlu1 %3749  }
 0x1b4   :  { %5396 = vst.msk [vmem:[%s10388_s1 + $0x18] sm:$0xff] %vm3647_vm8, %v3750_v15  }
 0x1b5   :  { %v3646_v23 = vpop.permute.xlu0 %3645  }
 0x1b6   :  { %3648 = vst.msk [vmem:[%s10388_s1] sm:$0xff] %vm3647_vm8, %v3646_v23  }
 0x1b7   :  { %v3819_v25 = vpop.permute.xlu1 %3818  }
 0x1b8   :  { %5413 = vst.msk [vmem:[%s10388_s1 + $0x8] sm:$0xff] %vm3786_vm9, %v3819_v25  }
 0x1bb   :  { %v3715_v21 = vpop.permute.xlu0 %3714  }
 0x1bc   :  { %5387 = vst.msk [vmem:[%s10388_s1 + $0x10] sm:$0xff] %vm3647_vm8, %v3715_v21  }
 0x1bf   :  { %v3785_v29 = vpop.permute.xlu0 %3784  }
 0x1c0   :  { %3787 = vst.msk [vmem:[%s10388_s1] sm:$0xff] %vm3786_vm9, %v3785_v29  }
 0x1c4   :  { %v3889_v42 = vpop.permute.xlu1 %3888  }
 0x1c5   :  { %5431 = vst.msk [vmem:[%s10388_s1 + $0x18] sm:$0xff] %vm3786_vm9, %v3889_v42  }
 0x1c8   :  { %v3958_v28 = vpop.permute.xlu1 %3957  }
 0x1c9   :  { %5448 = vst.msk [vmem:[%s10388_s1 + $0x8] sm:$0xff] %vm3925_vm10, %v3958_v28  }
 0x1cc   :  { %v3854_v27 = vpop.permute.xlu0 %3853   ;;  %v4028_v34 = vpop.permute.xlu1 %4027  }
 0x1cd   :  { %5422 = vst.msk [vmem:[%s10388_s1 + $0x10] sm:$0xff] %vm3786_vm9, %v3854_v27  }
 0x1ce   :  { %5466 = vst.msk [vmem:[%s10388_s1 + $0x18] sm:$0xff] %vm3925_vm10, %v4028_v34  }
 0x1d0   :  { %v3924_v35 = vpop.permute.xlu0 %3923  }
 0x1d1   :  { %3926 = vst.msk [vmem:[%s10388_s1] sm:$0xff] %vm3925_vm10, %v3924_v35  }
 0x1d2   :  { %v4097_v52 = vpop.permute.xlu1 %4096  }
 0x1d3   :  { %5483 = vst.msk [vmem:[%s10388_s1 + $0x8] sm:$0xff] %vm4064_vm11, %v4097_v52  }
 0x1d4   :  { %v3993_v47 = vpop.permute.xlu0 %3992  }
 0x1d5   :  { %5457 = vst.msk [vmem:[%s10388_s1 + $0x10] sm:$0xff] %vm3925_vm10, %v3993_v47  }
 0x1d6   :  { %v4167_v60 = vpop.permute.xlu1 %4166  }
 0x1d7   :  { %5501 = vst.msk [vmem:[%s10388_s1 + $0x18] sm:$0xff] %vm4064_vm11, %v4167_v60  }
 0x1d8   :  { %v4063_v31 = vpop.permute.xlu0 %4062  }
 0x1d9   :  { %4065 = vst.msk [vmem:[%s10388_s1] sm:$0xff] %vm4064_vm11, %v4063_v31  }
 0x1da   :  { %v4236_v1 = vpop.permute.xlu1 %4235  }
 0x1db   :  { %5518 = vst.msk [vmem:[%s10388_s1 + $0x8] sm:$0xff] %vm4203_vm12, %v4236_v1  }
 0x1de   :  { %v4132_v18 = vpop.permute.xlu0 %4131  }
 0x1df   :  { %5492 = vst.msk [vmem:[%s10388_s1 + $0x10] sm:$0xff] %vm4064_vm11, %v4132_v18  }
 0x1e2   :  { %v4202_v6 = vpop.permute.xlu0 %4201  }
 0x1e3   :  { %4204 = vst.msk [vmem:[%s10388_s1] sm:$0xff] %vm4203_vm12, %v4202_v6  }
 0x1e7   :  { %v4306_v36 = vpop.permute.xlu1 %4305  }
 0x1e8   :  { %5536 = vst.msk [vmem:[%s10388_s1 + $0x18] sm:$0xff] %vm4203_vm12, %v4306_v36  }
 0x1eb   :  { %v4375_v45 = vpop.permute.xlu1 %4374  }
 0x1ec   :  { %5553 = vst.msk [vmem:[%s10388_s1 + $0x8] sm:$0xff] %vm4342_vm13, %v4375_v45  }
 0x1ef   :  { %v4271_v2 = vpop.permute.xlu0 %4270  }
 0x1f0   :  { %5527 = vst.msk [vmem:[%s10388_s1 + $0x10] sm:$0xff] %vm4203_vm12, %v4271_v2  }
 0x1f2   :  { %v4445_v44 = vpop.permute.xlu1 %4444  }
 0x1f3   :  { %v4341_v46 = vpop.permute.xlu0 %4340   ;;  %5571 = vst.msk [vmem:[%s10388_s1 + $0x18] sm:$0xff] %vm4342_vm13, %v4445_v44  }
 0x1f4   :  { %4343 = vst.msk [vmem:[%s10388_s1] sm:$0xff] %vm4342_vm13, %v4341_v46  }
 0x1f7   :  { %v4410_v8 = vpop.permute.xlu0 %4409  }
 0x1f8   :  { %5562 = vst.msk [vmem:[%s10388_s1 + $0x10] sm:$0xff] %vm4342_vm13, %v4410_v8  }

// kernel: loss_fn.1
= control target key start
LH: loop header
LB: loop body
LE: loop exit
PB: predicated region body
PF: predicated region fallthrough
CT: control target
= control target key end

     0   :  { %s520_s24 = smov 0   ;;  %s595_s0 = inlined_call_operand.vmem [shape: f32[8,512], index: 0, kind: input, shape index: {}]   ;;  %s596_s1 = inlined_call_operand.vmem [shape: f32[8,512], index: 1, kind: input, shape index: {}]   ;;  %s597_s2 = inlined_call_operand.vmem [shape: f32[8,128], index: 2, kind: output, shape index: {0}]   ;;  %s598_s3 = inlined_call_operand.vmem [shape: f32[8,128], index: 3, kind: output, shape index: {1}]   ;;  %s599_s4 = inlined_call_operand.vmem [shape: f32[8,128], index: 4, kind: output, shape index: {2}]   ;;  %s600_s5 = inlined_call_operand.vmem [shape: f32[8,128], index: 5, kind: output, shape index: {3}]   ;;  %s601_s6 = inlined_call_operand.vmem [shape: f32[8,4], index: 6, kind: output, shape index: {4}]   ;;  %s602_s7 = inlined_call_operand.vmem [shape: f32[8,4], index: 7, kind: output, shape index: {5}]  }
   0x1 LB: > { %s449_s25 = sadd.s32 4294967295, %s476_s24   ;;  %p452_p0 = scmp.ge.s32.totalorder %s476_s24, 1  ;;  %s476_s24 = sphi %s520_s24, %s18_s24  }
   0x2   : > { %p230_p1 = scmp.lt.s32.totalorder %s476_s24, 3 }
   0x4   : > { %p231_p2 = pnand %p452_p0, %p230_p1 }
   0x5   : > { %s453_s26 = sshll.u32 (!%p231_p2), %s449_s25, 1  ;;  %p457_p4 = scmp.ne.s32.totalorder (!%p231_p2), %s449_s25, 0 }
   0x6   : > { %234 = sbr.rel (%p231_p2) target bundleno = 156 (0x9c), region = 28  ;;  %p263_p3 = scmp.lt.s32.totalorder (!%p231_p2), %s453_s26, 3 }
   0xd   : > { %s604_s26 = smov (!%p263_p3, %s453_s26), 3  ;;  %277 = sbr.rel (%p457_p4) target bundleno = 20 (0x14), region = 32 }
   0xe   : > { %s454_s27 = sshll.u32 %s604_s26, 3  ;;  %vm282_vm0 = vcmask (!%p457_p4), 31744   ;;  %v478_v0 = vmov (!%p457_p4), 0.0  }
   0xf   : > { %s266_s30 = scalar_lea.vmem %s595_s0, %s454_s27  ;;  %s272_s10 = scalar_lea.vmem %s596_s1, %s454_s27  ;;  %278 = vst [vmem:[%s597_s2] sm:$0xff] (!%p457_p4), %v478_v0  ;;  %279 = vst [vmem:[%s598_s3] sm:$0xff] (!%p457_p4), %v478_v0 }
  0x10   : > { %280 = vst [vmem:[%s599_s4] sm:$0xff] (!%p457_p4), %v478_v0  ;;  %281 = vst [vmem:[%s600_s5] sm:$0xff] (!%p457_p4), %v478_v0 }
  0x11   : > { %283 = vst.msk [vmem:[%s601_s6] sm:$0xff] (!%p457_p4), %vm282_vm0, %v478_v0  ;;  %284 = vst.msk [vmem:[%s602_s7] sm:$0xff] (!%p457_p4), %vm282_vm0, %v478_v0 }
  0x12   : > { %285 = vst.msk [vmem:[#allocation2] sm:$0xff] (!%p457_p4), %vm282_vm0, %v478_v0  ;;  %286 = vst.msk [vmem:[#allocation3] sm:$0xff] (!%p457_p4), %vm282_vm0, %v478_v0 }
  0x14 PF: > { %v291_v1 = vld [vmem:[%s272_s10] sm:$0xff]  ;;  %v292_v3 = vld [vmem:[%s272_s10 + $0x8] sm:$0xff]  ;;  %s479_s23 = smov 4   ;;  %v299_v17 = vlaneseq  ;;  %vm361_vm2 = vcmask 31744  }
  0x15   : > { %v289_v2 = vld [vmem:[%s266_s30] sm:$0xff]  ;;  %304 = vrot.lane.b32.xlu1 %v291_v1, %s479_s23  ;;  %v331_v4 = vmul.f32 %v291_v1, %v291_v1  ;;  %v332_v6 = vmul.f32 %v292_v3, %v292_v3  ;;  %v290_v7 = vld [vmem:[%s266_s30 + $0x8] sm:$0xff]  ;;  %v348_v14 = vmul.f32 0.95, %v292_v3 }
  0x16   : > { %v293_v5 = vsub.f32 %v291_v1, %v289_v2  ;;  %v294_v9 = vsub.f32 %v292_v3, %v290_v7  ;;  %v300_v18 = vand.u32 127, %v299_v17  ;;  %v326_v47 = vld [vmem:[%s598_s3] sm:$0xff] }
  0x17   : > { %v330_v8 = vld [vmem:[%s599_s4] sm:$0xff]  ;;  %v333_v10 = vadd.f32 %v332_v6, %v331_v4 }
  0x18   : > { %295 = vrot.lane.b32.xlu0 %v293_v5, %s479_s23  ;;  %v336_v11 = vld [vmem:[%s600_s5] sm:$0xff]  ;;  %v337_v12 = vadd.f32 %v294_v9, %v293_v5  ;;  %v340_v16 = vmul.f32 0.95, %v294_v9  ;;  %vm301_vm1 = vcmp.lt.s32.totalorder %v300_v18, 4 }
  0x19   : > { %306 = vrot.lane.b32.xlu1 %v292_v3, %s479_s23  ;;  %v334_v13 = vadd.f32 %v333_v10, %v330_v8  ;;  %v288_v19 = vld [vmem:[#allocation3] sm:$0xff]  ;;  %v287_v21 = vld [vmem:[#allocation2] sm:$0xff] }
  0x1a   : > { %v338_v15 = vadd.f32 %v337_v12, %v336_v11  ;;  %v354_v22 = vmul.f32 0.95, %v288_v19  ;;  %v346_v24 = vmul.f32 0.95, %v287_v21  ;;  %v363_v54 = vld [vmem:[%s602_s7] sm:$0xff] }
  0x1b   : > { %335 = vst [vmem:[%s599_s4] sm:$0xff] %v334_v13  ;;  %v322_v56 = vld [vmem:[%s597_s2] sm:$0xff] }
  0x1c   : > { %297 = vrot.lane.b32.xlu0 %v294_v9, %s479_s23  ;;  %339 = vst [vmem:[%s600_s5] sm:$0xff] %v338_v15  ;;  %v355_v28 = vsub.f32 %v291_v1, %v354_v22  ;;  %v347_v34 = vsub.f32 %v293_v5, %v346_v24  ;;  %v356_v61 = vld [vmem:[%s601_s6] sm:$0xff] }
  0x1d   : > { %350 = vrot.lane.b32.xlu1 %v348_v14, %s479_s23 }
  0x1e   : > { %v364_v41 = vmul.f32 %v355_v28, %v355_v28  ;;  %v357_v50 = vmul.f32 %v347_v34, %v347_v34 }
  0x20   : > { %342 = vrot.lane.b32.xlu0 %v340_v16, %s479_s23 }
  0x21   : > { %375 = vrot.lane.b32.xlu1 %v292_v3, %s479_s23 }
  0x24   : > { %370 = vrot.lane.b32.xlu0 %v294_v9, %s479_s23 }
  0x87   : > { %v305_v20 = vpop.permute.xlu1 %304 }
  0x8a   : > { %v296_v23 = vpop.permute.xlu0 %295 }
  0x8b   : > { %v307_v25 = vpop.permute.xlu1 %306 }
  0x8c   : > { %v308_v26 = vsel %vm301_vm1, %v305_v20, %v307_v25  ;;  %v309_v27 = vsel %vm301_vm1, %v307_v25, %v305_v20 }
  0x8d   : > { %v314_v29 = vmul.f32 0.95, %v309_v27  ;;  %v315_v30 = vmul.f32 0.95, %v308_v26 }
  0x8e   : > { %v298_v31 = vpop.permute.xlu0 %297 }
  0x8f   : > { %v302_v32 = vsel %vm301_vm1, %v296_v23, %v298_v31  ;;  %v303_v33 = vsel %vm301_vm1, %v298_v31, %v296_v23  ;;  %v316_v35 = vsub.f32 %v291_v1, %v314_v29  ;;  %v317_v36 = vsub.f32 %v292_v3, %v315_v30  ;;  %v351_v39 = vpop.permute.xlu1 %350 }
  0x90   : > { %v310_v37 = vmul.f32 0.95, %v303_v33  ;;  %v311_v38 = vmul.f32 0.95, %v302_v32  ;;  %v353_v40 = vsub.f32 %v291_v1, %v351_v39 }
  0x91   : > { %v320_v42 = vmul.f32 %v316_v35, %v316_v35  ;;  %v321_v43 = vmul.f32 %v317_v36, %v317_v36 }
  0x92   : > { %v312_v44 = vsub.f32 %v293_v5, %v310_v37  ;;  %v313_v45 = vsub.f32 %v294_v9, %v311_v38  ;;  %v343_v46 = vpop.permute.xlu0 %342  ;;  %v365_v48 = vmul.f32 %v353_v40, %v353_v40 }
  0x93   : > { %v345_v49 = vsub.f32 %v293_v5, %v343_v46  ;;  %v327_v51 = vadd.f32 %v321_v43, %v320_v42  ;;  %v376_v55 = vpop.permute.xlu1 %375 }
  0x94   : > { %v318_v52 = vmul.f32 %v312_v44, %v312_v44  ;;  %v319_v53 = vmul.f32 %v313_v45, %v313_v45  ;;  %v366_v57 = vsub.f32 %v364_v41, %v365_v48  ;;  %378 = vst.msk [vmem:[#allocation3] sm:$0xff] %vm361_vm2, %v376_v55 }
  0x95   : > { %v358_v58 = vmul.f32 %v345_v49, %v345_v49  ;;  %v328_v59 = vadd.f32 %v327_v51, %v326_v47 }
  0x96   : > { %v323_v60 = vadd.f32 %v319_v53, %v318_v52  ;;  %v371_v62 = vpop.permute.xlu0 %370  ;;  %v367_v63 = vadd.f32 %v366_v57, %v363_v54 }
  0x97   : > { %v359_v0 = vsub.f32 %v357_v50, %v358_v58  ;;  %373 = vst.msk [vmem:[#allocation2] sm:$0xff] %vm361_vm2, %v371_v62  ;;  %329 = vst [vmem:[%s598_s3] sm:$0xff] %v328_v59 }
  0x98   : > { %v324_v1 = vadd.f32 %v323_v60, %v322_v56  ;;  %368 = vst.msk [vmem:[%s602_s7] sm:$0xff] %vm361_vm2, %v367_v63 }
  0x99   : > { %v360_v2 = vadd.f32 %v359_v0, %v356_v61 }
  0x9a   : > { %325 = vst [vmem:[%s597_s2] sm:$0xff] %v324_v1 }
  0x9b   : > { %362 = vst.msk [vmem:[%s601_s6] sm:$0xff] %vm361_vm2, %v360_v2 }
  0x9c PF: > { %s18_s24 = sadd.s32 1, %s476_s24  }
  0x9d   : > { %p15_p5 = scmp.ge.s32.totalorder %s18_s24, 4  }
  0x9f   :  { %17 = sbr.rel (!%p15_p5) target bundleno = 1 (0x1), region = 101 }

</bundles_post_ra>
